<compile_context>
chip_gen: v7x
topology: tpu7x:2x2x1
jax: 0.10.0
libtpu: 0.0.40
codegen_flags: <defaults>
</compile_context>

<pallas_src>
import functools
import math

import jax
import jax.numpy as jnp
from jax.experimental import pallas as pl
from jax.experimental.pallas import tpu as pltpu


_VMEM_LIMIT = 32 * 1024 * 1024  # explicit scoped-VMEM budget; safe on v5e / v6e / v7x


# ----------------------------------------------------------------------------- helpers


def _round_up(n, m):
    return ((n + m - 1) // m) * m


def _lcm(a, b):
    return a * b // math.gcd(a, b)


def _tile(dim, pref):
    """Largest multiple of 128 that is <= pref and divides dim (dim is a multiple of 128)."""
    t = min(pref, dim)
    while dim % t:
        t -= 128
    return t


def _pad2(a, rows, cols, fill=0.0):
    pr, pc = rows - a.shape[0], cols - a.shape[1]
    if pr or pc:
        a = jnp.pad(a, ((0, pr), (0, pc)), constant_values=fill)
    return a


# ----------------------------------------------------------------------------- kernels


def _matmul_kernel(x_ref, w_ref, o_ref, acc_ref):
    # Generic tiled matmul: grid = (M/tm, N/tn, K/tk), K last ("arbitrary"),
    # bf16 inputs, f32 accumulator resident in VMEM, bf16 output.
    @pl.when(pl.program_id(2) == 0)
    def _():
        acc_ref[...] = jnp.zeros_like(acc_ref)

    acc_ref[...] += jnp.dot(x_ref[...], w_ref[...],
                            preferred_element_type=jnp.float32)

    @pl.when(pl.program_id(2) == pl.num_programs(2) - 1)
    def _():
        o_ref[...] = acc_ref[...].astype(o_ref.dtype)


def _graphconv_agg_kernel(a_ref, xwr_ref, root_ref, b_ref, o_ref, acc_ref):
    # out = relu( A @ XW_rel + XW_root + b_rel ) for one (tm, H) row block.
    # grid = (N/tm, N/tk); k (program_id(1)) is the aggregation contraction ("arbitrary").
    @pl.when(pl.program_id(1) == 0)
    def _():
        acc_ref[...] = jnp.zeros_like(acc_ref)

    acc_ref[...] += jnp.dot(a_ref[...], xwr_ref[...],
                            preferred_element_type=jnp.float32)

    @pl.when(pl.program_id(1) == pl.num_programs(1) - 1)
    def _():
        out = acc_ref[...] + root_ref[...].astype(jnp.float32) + b_ref[...]
        o_ref[...] = jnp.maximum(out, 0.0).astype(o_ref.dtype)


def _lin_logsoftmax_kernel(x1_ref, x2_ref, x3_ref, w1_ref, w2_ref, w3_ref,
                           b_ref, o_ref):
    # Fused concat([x1,x2,x3]) @ W_lin + b -> log_softmax for one (tm, C_pad) row block.
    y = jnp.dot(x1_ref[...], w1_ref[...], preferred_element_type=jnp.float32)
    y += jnp.dot(x2_ref[...], w2_ref[...], preferred_element_type=jnp.float32)
    y += jnp.dot(x3_ref[...], w3_ref[...], preferred_element_type=jnp.float32)
    y += b_ref[...]                      # padded class columns carry a -1e30 bias
    m = jnp.max(y, axis=-1, keepdims=True)
    z = y - m
    lse = jnp.log(jnp.sum(jnp.exp(z), axis=-1, keepdims=True))
    o_ref[...] = z - lse


# ----------------------------------------------------------------------------- wrappers


def _matmul_bf16(x, w, *, tm):
    m, k = x.shape
    _, n = w.shape
    tn = _tile(n, 256)
    tk = _tile(k, 512)
    grid = (m // tm, n // tn, k // tk)
    return pl.pallas_call(
        _matmul_kernel,
        out_shape=jax.ShapeDtypeStruct((m, n), jnp.bfloat16),
        grid_spec=pltpu.PrefetchScalarGridSpec(
            num_scalar_prefetch=0,
            grid=grid,
            in_specs=[
                pl.BlockSpec((tm, tk), lambda i, j, kk: (i, kk)),
                pl.BlockSpec((tk, tn), lambda i, j, kk: (kk, j)),
            ],
            out_specs=pl.BlockSpec((tm, tn), lambda i, j, kk: (i, j)),
            scratch_shapes=[pltpu.VMEM((tm, tn), jnp.float32)]),
        compiler_params=pltpu.CompilerParams(
            dimension_semantics=("parallel", "parallel", "arbitrary"),
            vmem_limit_bytes=_VMEM_LIMIT),
    )(x, w)


def _graph_conv_relu(adj_bf16, x_bf16, w_rel, b_rel, w_root, *, h_pad, tm, tk):
    """One GraphConv + ReLU. adj/x are padded bf16; returns (n_pad, h_pad) bf16."""
    n_pad = adj_bf16.shape[0]
    f_pad = x_bf16.shape[1]

    # Hoist X @ [W_rel | W_root]: Fin contraction happens once, not per row block.
    w_cat = jnp.concatenate(
        [_pad2(w_rel, f_pad, h_pad), _pad2(w_root, f_pad, h_pad)],
        axis=1).astype(jnp.bfloat16)
    xw = _matmul_bf16(x_bf16, w_cat, tm=tm)                 # (n_pad, 2*h_pad) bf16
    b = _pad2(b_rel, 1, h_pad).astype(jnp.float32)

    grid = (n_pad // tm, n_pad // tk)                       # rows parallel, k arbitrary
    return pl.pallas_call(
        _graphconv_agg_kernel,
        out_shape=jax.ShapeDtypeStruct((n_pad, h_pad), jnp.bfloat16),
        grid_spec=pltpu.PrefetchScalarGridSpec(
            num_scalar_prefetch=0,
            grid=grid,
            in_specs=[
                pl.BlockSpec((tm, tk), lambda i, kk: (i, kk)),       # A row/col block
                pl.BlockSpec((tk, h_pad), lambda i, kk: (kk, 0)),    # XW_rel (cols 0:H)
                pl.BlockSpec((tm, h_pad), lambda i, kk: (i, 1)),     # XW_root rows (cols H:2H)
                pl.BlockSpec((1, h_pad), lambda i, kk: (0, 0)),      # b_rel
            ],
            out_specs=pl.BlockSpec((tm, h_pad), lambda i, kk: (i, 0)),
            scratch_shapes=[pltpu.VMEM((tm, h_pad), jnp.float32)]),
        compiler_params=pltpu.CompilerParams(
            dimension_semantics=("parallel", "arbitrary"),
            vmem_limit_bytes=_VMEM_LIMIT),
    )(adj_bf16, xw, xw, b)


def _lin_log_softmax(x1, x2, x3, w_pad, b_pad, *, tm):
    n_pad, h_pad = x1.shape
    c_pad = w_pad.shape[1]
    grid = (n_pad // tm,)
    return pl.pallas_call(
        _lin_logsoftmax_kernel,
        out_shape=jax.ShapeDtypeStruct((n_pad, c_pad), jnp.float32),
        grid_spec=pltpu.PrefetchScalarGridSpec(
            num_scalar_prefetch=0,
            grid=grid,
            in_specs=[
                pl.BlockSpec((tm, h_pad), lambda i: (i, 0)),
                pl.BlockSpec((tm, h_pad), lambda i: (i, 0)),
                pl.BlockSpec((tm, h_pad), lambda i: (i, 0)),
                pl.BlockSpec((h_pad, c_pad), lambda i: (0, 0)),    # W_lin rows 0:H
                pl.BlockSpec((h_pad, c_pad), lambda i: (1, 0)),    # W_lin rows H:2H
                pl.BlockSpec((h_pad, c_pad), lambda i: (2, 0)),    # W_lin rows 2H:3H
                pl.BlockSpec((1, c_pad), lambda i: (0, 0)),        # bias (padded = -1e30)
            ],
            out_specs=pl.BlockSpec((tm, c_pad), lambda i: (i, 0))),
        compiler_params=pltpu.CompilerParams(
            dimension_semantics=("parallel",),
            vmem_limit_bytes=_VMEM_LIMIT),
    )(x1, x2, x3, w_pad, w_pad, w_pad, b_pad)


# ----------------------------------------------------------------------------- forward


@functools.partial(jax.jit, static_argnames=("tm", "tk"))
def net_forward(x0, adj, params, *, tm=256, tk=256):
    """Eval-mode forward of `Net` (dropout = identity)."""
    n, f_in = x0.shape
    h = params["w_rel1"].shape[1]
    c = params["w_lin"].shape[1]

    n_pad = _round_up(n, _lcm(tm, tk))
    f_pad = _round_up(f_in, 128)
    h_pad = _round_up(h, 128)
    c_pad = _round_up(c, 128)

    x = _pad2(x0, n_pad, f_pad).astype(jnp.bfloat16)
    a = _pad2(adj, n_pad, n_pad).astype(jnp.bfloat16)

    x1 = _graph_conv_relu(a, x, params["w_rel1"], params["b_rel1"],
                          params["w_root1"], h_pad=h_pad, tm=tm, tk=tk)
    x2 = _graph_conv_relu(a, x1, params["w_rel2"], params["b_rel2"],
                          params["w_root2"], h_pad=h_pad, tm=tm, tk=tk)
    x3 = _graph_conv_relu(a, x2, params["w_rel3"], params["b_rel3"],
                          params["w_root3"], h_pad=h_pad, tm=tm, tk=tk)

    # Pad W_lin: chunk j (rows j*h .. (j+1)*h of the original) goes to rows j*h_pad..j*h_pad+h.
    w_lin = params["w_lin"]
    w_pad = jnp.zeros((3 * h_pad, c_pad), jnp.float32)
    for j in range(3):
        w_pad = w_pad.at[j * h_pad:j * h_pad + h, :c].set(w_lin[j * h:(j + 1) * h])
    b_pad = jnp.full((1, c_pad), -1e30, jnp.float32).at[:, :c].set(params["b_lin"])

    out = _lin_log_softmax(x1, x2, x3, w_pad.astype(jnp.bfloat16), b_pad, tm=tm)
    return out[:n, :c]


# ----------------------------------------------------------------------------- reference


def net_forward_ref(x0, adj, params):
    """Pure-JAX reference matching the kernel's bf16-input / f32-accumulate dtype flow."""
    bf = jnp.bfloat16

    def conv(a, x, w_rel, b_rel, w_root):
        xw_rel = jnp.dot(x, w_rel.astype(bf),
                         preferred_element_type=jnp.float32).astype(bf)
        xw_root = jnp.dot(x, w_root.astype(bf),
                          preferred_element_type=jnp.float32).astype(bf)
        agg = jnp.dot(a, xw_rel, preferred_element_type=jnp.float32)
        return jnp.maximum(agg + xw_root.astype(jnp.float32) + b_rel, 0.0).astype(bf)

    a = adj.astype(bf)
    x = x0.astype(bf)
    x1 = conv(a, x, params["w_rel1"], params["b_rel1"], params["w_root1"])
    x2 = conv(a, x1, params["w_rel2"], params["b_rel2"], params["w_root2"])
    x3 = conv(a, x2, params["w_rel3"], params["b_rel3"], params["w_root3"])
    xc = jnp.concatenate([x1, x2, x3], axis=-1)
    y = jnp.dot(xc, params["w_lin"].astype(bf),
                preferred_element_type=jnp.float32) + params["b_lin"]
    return jax.nn.log_softmax(y, axis=-1)


# ----------------------------------------------------------------------------- setup


def make_params(key, in_channels, hidden, num_classes):
    ks = jax.random.split(key, 8)
    s = 0.1

    def lin(k, fi, fo):
        return s * jax.random.normal(k, (fi, fo), jnp.float32)

    return {
        "w_rel1": lin(ks[0], in_channels, hidden),
        "b_rel1": jnp.zeros((1, hidden), jnp.float32),
        "w_root1": lin(ks[1], in_channels, hidden),
        "w_rel2": lin(ks[2], hidden, hidden),
        "b_rel2": jnp.zeros((1, hidden), jnp.float32),
        "w_root2": lin(ks[3], hidden, hidden),
        "w_rel3": lin(ks[4], hidden, hidden),
        "b_rel3": jnp.zeros((1, hidden), jnp.float32),
        "w_root3": lin(ks[5], hidden, hidden),
        "w_lin": lin(ks[6], 3 * hidden, num_classes),
        "b_lin": s * jax.random.normal(ks[7], (1, num_classes), jnp.float32),
    }


def dense_adjacency(edge_index, edge_weight, num_nodes):
    # GraphConv propagates x_j (j = edge_index[0]) to i = edge_index[1): A[i, j] += w.
    src, dst = edge_index[0], edge_index[1]
    adj = jnp.zeros((num_nodes, num_nodes), jnp.float32)
    return adj.at[dst, src].add(edge_weight)


if __name__ == "__main__":
    # Small Flickr-like GraphSAINT subgraph (pads to N=512 -> two 256-row blocks).
    N = 500
    E = 2500
    IN_CHANNELS = 500
    HIDDEN = 128
    NUM_CLASSES = 7

    key = jax.random.PRNGKey(0)
    k_x, k_src, k_dst, k_w, k_p = jax.random.split(key, 5)

    x0 = jax.random.normal(k_x, (N, IN_CHANNELS), jnp.float32)
    edge_index = jnp.stack([
        jax.random.randint(k_src, (E,), 0, N),
        jax.random.randint(k_dst, (E,), 0, N),
    ], axis=0)
    edge_weight = jax.random.uniform(k_w, (E,), jnp.float32)

    adj = dense_adjacency(edge_index, edge_weight, N)
    params = make_params(k_p, IN_CHANNELS, HIDDEN, NUM_CLASSES)

    out = net_forward(x0, adj, params)
    out = jax.block_until_ready(out)

    assert out.shape == (N, NUM_CLASSES)
    # log_softmax rows must sum to ~1 in prob space.
    assert jnp.allclose(jnp.sum(jnp.exp(out), axis=-1), 1.0, atol=1e-3)
    # Match the matched-precision pure-JAX reference.
    ref = net_forward_ref(x0, adj, params)
    err = jnp.max(jnp.abs(out - ref))
    assert err < 5e-2, f"max |out - ref| = {err}"
    print("KERNEL_OK")
</pallas_src>

<mosaic_0001>
module attributes {stable_mosaic.version = 11 : i64} {
  func.func @_matmul_kernel(%arg0: i32, %arg1: i32, %arg2: i32, %arg3: memref<256x512xbf16, #tpu.memory_space<vmem>>, %arg4: memref<512x256xbf16, #tpu.memory_space<vmem>>, %arg5: memref<256x256xbf16, #tpu.memory_space<vmem>>, %arg6: memref<256x256xf32, #tpu.memory_space<vmem>>) attributes {dimension_semantics = [#tpu.dimension_semantics<parallel>, #tpu.dimension_semantics<parallel>, #tpu.dimension_semantics<arbitrary>], iteration_bounds = array<i64: 2, 1, 1>, scalar_prefetch = 0 : i64, scratch_operands = 1 : i64, tpu.core_type = #tpu.core_type<tc>, window_params = [{transform_indices = @transform_0, window_bounds = array<i64: 256, 512>}, {transform_indices = @transform_1, window_bounds = array<i64: 512, 256>}, {transform_indices = @transform_2, window_bounds = array<i64: 256, 256>}]} {
    %c0_i32 = arith.constant 0 : i32
    %0 = arith.cmpi eq, %arg2, %c0_i32 : i32
    %1 = arith.extui %0 : i1 to i32
    %c0_i32_0 = arith.constant 0 : i32
    %2 = arith.cmpi ne, %1, %c0_i32_0 : i32
    scf.if %2 {
      %cst_10 = arith.constant 0.000000e+00 : f32
      %12 = vector.broadcast %cst_10 : f32 to vector<256x256xf32>
      %c0_11 = arith.constant 0 : index
      %c0_12 = arith.constant 0 : index
      %13 = vector.load %arg6[%c0_11, %c0_12] : memref<256x256xf32, #tpu.memory_space<vmem>>, vector<256x256xf32>
      tpu.vector_store %arg6[%c0_11, %c0_12], %12 {strides = array<i32>} : memref<256x256xf32, #tpu.memory_space<vmem>>, vector<256x256xf32>,
    } else {
    }
    %c0 = arith.constant 0 : index
    %c0_1 = arith.constant 0 : index
    %3 = vector.load %arg6[%c0, %c0_1] : memref<256x256xf32, #tpu.memory_space<vmem>>, vector<256x256xf32>
    %c0_2 = arith.constant 0 : index
    %c0_3 = arith.constant 0 : index
    %4 = vector.load %arg3[%c0_2, %c0_3] : memref<256x512xbf16, #tpu.memory_space<vmem>>, vector<256x512xbf16>
    %c0_4 = arith.constant 0 : index
    %c0_5 = arith.constant 0 : index
    %5 = vector.load %arg4[%c0_4, %c0_5] : memref<512x256xbf16, #tpu.memory_space<vmem>>, vector<512x256xbf16>
    %cst = arith.constant dense<0.000000e+00> : vector<256x256xf32>
    %6 = tpu.matmul %4, %5, %cst {dimension_numbers = #tpu.dot_dimension_numbers<[1], [0], [0], [1], [0, 0, 1, 1], [], []>} : vector<256x512xbf16>, vector<512x256xbf16>, vector<256x256xf32> -> vector<256x256xf32>
    %7 = arith.addf %3, %6 : vector<256x256xf32>
    %c0_6 = arith.constant 0 : index
    %c0_7 = arith.constant 0 : index
    %8 = vector.load %arg6[%c0_6, %c0_7] : memref<256x256xf32, #tpu.memory_space<vmem>>, vector<256x256xf32>
    tpu.vector_store %arg6[%c0_6, %c0_7], %7 {strides = array<i32>} : memref<256x256xf32, #tpu.memory_space<vmem>>, vector<256x256xf32>,
    %c0_i32_8 = arith.constant 0 : i32
    %9 = arith.cmpi eq, %arg2, %c0_i32_8 : i32
    %10 = arith.extui %9 : i1 to i32
    %c0_i32_9 = arith.constant 0 : i32
    %11 = arith.cmpi ne, %10, %c0_i32_9 : i32
    scf.if %11 {
      %c0_10 = arith.constant 0 : index
      %c0_11 = arith.constant 0 : index
      %12 = vector.load %arg6[%c0_10, %c0_11] : memref<256x256xf32, #tpu.memory_space<vmem>>, vector<256x256xf32>
      %13 = arith.truncf %12 : vector<256x256xf32> to vector<256x256xbf16>
      %c0_12 = arith.constant 0 : index
      %c0_13 = arith.constant 0 : index
      %14 = vector.load %arg5[%c0_12, %c0_13] : memref<256x256xbf16, #tpu.memory_space<vmem>>, vector<256x256xbf16>
      tpu.vector_store %arg5[%c0_12, %c0_13], %13 {strides = array<i32>} : memref<256x256xbf16, #tpu.memory_space<vmem>>, vector<256x256xbf16>,
    } else {
    }
    return
  }
  func.func @transform_0(%arg0: i32, %arg1: i32, %arg2: i32) -> (i32, i32) {
    %c0_i32 = arith.constant 0 : i32
    return %arg0, %arg2 : i32, i32
  }
  func.func @transform_1(%arg0: i32, %arg1: i32, %arg2: i32) -> (i32, i32) {
    %c0_i32 = arith.constant 0 : i32
    return %arg2, %arg1 : i32, i32
  }
  func.func @transform_2(%arg0: i32, %arg1: i32, %arg2: i32) -> (i32, i32) {
    %c0_i32 = arith.constant 0 : i32
    return %arg0, %arg1 : i32, i32
  }
}

module attributes {stable_mosaic.version = 11 : i64} {
  func.func @_graphconv_agg_kernel(%arg0: i32, %arg1: i32, %arg2: memref<256x256xbf16, #tpu.memory_space<vmem>>, %arg3: memref<256x128xbf16, #tpu.memory_space<vmem>>, %arg4: memref<256x128xbf16, #tpu.memory_space<vmem>>, %arg5: memref<1x128xf32, #tpu.memory_space<vmem>>, %arg6: memref<256x128xbf16, #tpu.memory_space<vmem>>, %arg7: memref<256x128xf32, #tpu.memory_space<vmem>>) attributes {dimension_semantics = [#tpu.dimension_semantics<parallel>, #tpu.dimension_semantics<arbitrary>], iteration_bounds = array<i64: 2, 2>, scalar_prefetch = 0 : i64, scratch_operands = 1 : i64, tpu.core_type = #tpu.core_type<tc>, window_params = [{transform_indices = @transform_0, window_bounds = array<i64: 256, 256>}, {transform_indices = @transform_1, window_bounds = array<i64: 256, 128>}, {transform_indices = @transform_2, window_bounds = array<i64: 256, 128>}, {pipeline_mode = #tpu.pipeline_mode<synchronous>, transform_indices = @transform_3, window_bounds = array<i64: 1, 128>}, {transform_indices = @transform_4, window_bounds = array<i64: 256, 128>}]} {
    %c0_i32 = arith.constant 0 : i32
    %0 = arith.cmpi eq, %arg1, %c0_i32 : i32
    %1 = arith.extui %0 : i1 to i32
    %c0_i32_0 = arith.constant 0 : i32
    %2 = arith.cmpi ne, %1, %c0_i32_0 : i32
    scf.if %2 {
      %cst_9 = arith.constant 0.000000e+00 : f32
      %12 = vector.broadcast %cst_9 : f32 to vector<256x128xf32>
      %c0_10 = arith.constant 0 : index
      %c0_11 = arith.constant 0 : index
      %13 = vector.load %arg7[%c0_10, %c0_11] : memref<256x128xf32, #tpu.memory_space<vmem>>, vector<256x128xf32>
      tpu.vector_store %arg7[%c0_10, %c0_11], %12 {strides = array<i32>} : memref<256x128xf32, #tpu.memory_space<vmem>>, vector<256x128xf32>,
    } else {
    }
    %c0 = arith.constant 0 : index
    %c0_1 = arith.constant 0 : index
    %3 = vector.load %arg7[%c0, %c0_1] : memref<256x128xf32, #tpu.memory_space<vmem>>, vector<256x128xf32>
    %c0_2 = arith.constant 0 : index
    %c0_3 = arith.constant 0 : index
    %4 = vector.load %arg2[%c0_2, %c0_3] : memref<256x256xbf16, #tpu.memory_space<vmem>>, vector<256x256xbf16>
    %c0_4 = arith.constant 0 : index
    %c0_5 = arith.constant 0 : index
    %5 = vector.load %arg3[%c0_4, %c0_5] : memref<256x128xbf16, #tpu.memory_space<vmem>>, vector<256x128xbf16>
    %cst = arith.constant dense<0.000000e+00> : vector<256x128xf32>
    %6 = tpu.matmul %4, %5, %cst {dimension_numbers = #tpu.dot_dimension_numbers<[1], [0], [0], [1], [0, 0, 1, 1], [], []>} : vector<256x256xbf16>, vector<256x128xbf16>, vector<256x128xf32> -> vector<256x128xf32>
    %7 = arith.addf %3, %6 : vector<256x128xf32>
    %c0_6 = arith.constant 0 : index
    %c0_7 = arith.constant 0 : index
    %8 = vector.load %arg7[%c0_6, %c0_7] : memref<256x128xf32, #tpu.memory_space<vmem>>, vector<256x128xf32>
    tpu.vector_store %arg7[%c0_6, %c0_7], %7 {strides = array<i32>} : memref<256x128xf32, #tpu.memory_space<vmem>>, vector<256x128xf32>,
    %c1_i32 = arith.constant 1 : i32
    %9 = arith.cmpi eq, %arg1, %c1_i32 : i32
    %10 = arith.extui %9 : i1 to i32
    %c0_i32_8 = arith.constant 0 : i32
    %11 = arith.cmpi ne, %10, %c0_i32_8 : i32
    scf.if %11 {
      %c0_9 = arith.constant 0 : index
      %c0_10 = arith.constant 0 : index
      %12 = vector.load %arg7[%c0_9, %c0_10] : memref<256x128xf32, #tpu.memory_space<vmem>>, vector<256x128xf32>
      %c0_11 = arith.constant 0 : index
      %c0_12 = arith.constant 0 : index
      %13 = vector.load %arg4[%c0_11, %c0_12] : memref<256x128xbf16, #tpu.memory_space<vmem>>, vector<256x128xbf16>
      %14 = arith.extf %13 : vector<256x128xbf16> to vector<256x128xf32>
      %15 = arith.addf %12, %14 : vector<256x128xf32>
      %c0_13 = arith.constant 0 : index
      %c0_14 = arith.constant 0 : index
      %16 = vector.load %arg5[%c0_13, %c0_14] : memref<1x128xf32, #tpu.memory_space<vmem>>, vector<1x128xf32>
      %17 = vector.broadcast %16 : vector<1x128xf32> to vector<256x128xf32>
      %18 = arith.addf %15, %17 : vector<256x128xf32>
      %cst_15 = arith.constant 0.000000e+00 : f32
      %19 = vector.broadcast %cst_15 : f32 to vector<256x128xf32>
      %20 = arith.maximumf %18, %19 : vector<256x128xf32>
      %21 = arith.truncf %20 : vector<256x128xf32> to vector<256x128xbf16>
      %c0_16 = arith.constant 0 : index
      %c0_17 = arith.constant 0 : index
      %22 = vector.load %arg6[%c0_16, %c0_17] : memref<256x128xbf16, #tpu.memory_space<vmem>>, vector<256x128xbf16>
      tpu.vector_store %arg6[%c0_16, %c0_17], %21 {strides = array<i32>} : memref<256x128xbf16, #tpu.memory_space<vmem>>, vector<256x128xbf16>,
    } else {
    }
    return
  }
  func.func @transform_0(%arg0: i32, %arg1: i32) -> (i32, i32) {
    %c0_i32 = arith.constant 0 : i32
    return %arg0, %arg1 : i32, i32
  }
  func.func @transform_1(%arg0: i32, %arg1: i32) -> (i32, i32) {
    %c0_i32 = arith.constant 0 : i32
    %c0_i32_0 = arith.constant 0 : i32
    return %arg1, %c0_i32 : i32, i32
  }
  func.func @transform_2(%arg0: i32, %arg1: i32) -> (i32, i32) {
    %c1_i32 = arith.constant 1 : i32
    %c0_i32 = arith.constant 0 : i32
    return %arg0, %c1_i32 : i32, i32
  }
  func.func @transform_3(%arg0: i32, %arg1: i32) -> (i32, i32) {
    %c0_i32 = arith.constant 0 : i32
    %c0_i32_0 = arith.constant 0 : i32
    %c0_i32_1 = arith.constant 0 : i32
    return %c0_i32, %c0_i32_0 : i32, i32
  }
  func.func @transform_4(%arg0: i32, %arg1: i32) -> (i32, i32) {
    %c0_i32 = arith.constant 0 : i32
    %c0_i32_0 = arith.constant 0 : i32
    return %arg0, %c0_i32 : i32, i32
  }
}

module attributes {stable_mosaic.version = 11 : i64} {
  func.func @_matmul_kernel(%arg0: i32, %arg1: i32, %arg2: i32, %arg3: memref<256x128xbf16, #tpu.memory_space<vmem>>, %arg4: memref<128x256xbf16, #tpu.memory_space<vmem>>, %arg5: memref<256x256xbf16, #tpu.memory_space<vmem>>, %arg6: memref<256x256xf32, #tpu.memory_space<vmem>>) attributes {dimension_semantics = [#tpu.dimension_semantics<parallel>, #tpu.dimension_semantics<parallel>, #tpu.dimension_semantics<arbitrary>], iteration_bounds = array<i64: 2, 1, 1>, scalar_prefetch = 0 : i64, scratch_operands = 1 : i64, tpu.core_type = #tpu.core_type<tc>, window_params = [{transform_indices = @transform_0, window_bounds = array<i64: 256, 128>}, {transform_indices = @transform_1, window_bounds = array<i64: 128, 256>}, {transform_indices = @transform_2, window_bounds = array<i64: 256, 256>}]} {
    %c0_i32 = arith.constant 0 : i32
    %0 = arith.cmpi eq, %arg2, %c0_i32 : i32
    %1 = arith.extui %0 : i1 to i32
    %c0_i32_0 = arith.constant 0 : i32
    %2 = arith.cmpi ne, %1, %c0_i32_0 : i32
    scf.if %2 {
      %cst_10 = arith.constant 0.000000e+00 : f32
      %12 = vector.broadcast %cst_10 : f32 to vector<256x256xf32>
      %c0_11 = arith.constant 0 : index
      %c0_12 = arith.constant 0 : index
      %13 = vector.load %arg6[%c0_11, %c0_12] : memref<256x256xf32, #tpu.memory_space<vmem>>, vector<256x256xf32>
      tpu.vector_store %arg6[%c0_11, %c0_12], %12 {strides = array<i32>} : memref<256x256xf32, #tpu.memory_space<vmem>>, vector<256x256xf32>,
    } else {
    }
    %c0 = arith.constant 0 : index
    %c0_1 = arith.constant 0 : index
    %3 = vector.load %arg6[%c0, %c0_1] : memref<256x256xf32, #tpu.memory_space<vmem>>, vector<256x256xf32>
    %c0_2 = arith.constant 0 : index
    %c0_3 = arith.constant 0 : index
    %4 = vector.load %arg3[%c0_2, %c0_3] : memref<256x128xbf16, #tpu.memory_space<vmem>>, vector<256x128xbf16>
    %c0_4 = arith.constant 0 : index
    %c0_5 = arith.constant 0 : index
    %5 = vector.load %arg4[%c0_4, %c0_5] : memref<128x256xbf16, #tpu.memory_space<vmem>>, vector<128x256xbf16>
    %cst = arith.constant dense<0.000000e+00> : vector<256x256xf32>
    %6 = tpu.matmul %4, %5, %cst {dimension_numbers = #tpu.dot_dimension_numbers<[1], [0], [0], [1], [0, 0, 1, 1], [], []>} : vector<256x128xbf16>, vector<128x256xbf16>, vector<256x256xf32> -> vector<256x256xf32>
    %7 = arith.addf %3, %6 : vector<256x256xf32>
    %c0_6 = arith.constant 0 : index
    %c0_7 = arith.constant 0 : index
    %8 = vector.load %arg6[%c0_6, %c0_7] : memref<256x256xf32, #tpu.memory_space<vmem>>, vector<256x256xf32>
    tpu.vector_store %arg6[%c0_6, %c0_7], %7 {strides = array<i32>} : memref<256x256xf32, #tpu.memory_space<vmem>>, vector<256x256xf32>,
    %c0_i32_8 = arith.constant 0 : i32
    %9 = arith.cmpi eq, %arg2, %c0_i32_8 : i32
    %10 = arith.extui %9 : i1 to i32
    %c0_i32_9 = arith.constant 0 : i32
    %11 = arith.cmpi ne, %10, %c0_i32_9 : i32
    scf.if %11 {
      %c0_10 = arith.constant 0 : index
      %c0_11 = arith.constant 0 : index
      %12 = vector.load %arg6[%c0_10, %c0_11] : memref<256x256xf32, #tpu.memory_space<vmem>>, vector<256x256xf32>
      %13 = arith.truncf %12 : vector<256x256xf32> to vector<256x256xbf16>
      %c0_12 = arith.constant 0 : index
      %c0_13 = arith.constant 0 : index
      %14 = vector.load %arg5[%c0_12, %c0_13] : memref<256x256xbf16, #tpu.memory_space<vmem>>, vector<256x256xbf16>
      tpu.vector_store %arg5[%c0_12, %c0_13], %13 {strides = array<i32>} : memref<256x256xbf16, #tpu.memory_space<vmem>>, vector<256x256xbf16>,
    } else {
    }
    return
  }
  func.func @transform_0(%arg0: i32, %arg1: i32, %arg2: i32) -> (i32, i32) {
    %c0_i32 = arith.constant 0 : i32
    return %arg0, %arg2 : i32, i32
  }
  func.func @transform_1(%arg0: i32, %arg1: i32, %arg2: i32) -> (i32, i32) {
    %c0_i32 = arith.constant 0 : i32
    return %arg2, %arg1 : i32, i32
  }
  func.func @transform_2(%arg0: i32, %arg1: i32, %arg2: i32) -> (i32, i32) {
    %c0_i32 = arith.constant 0 : i32
    return %arg0, %arg1 : i32, i32
  }
}

module attributes {stable_mosaic.version = 11 : i64} {
  func.func @_lin_logsoftmax_kernel(%arg0: i32, %arg1: memref<256x128xbf16, #tpu.memory_space<vmem>>, %arg2: memref<256x128xbf16, #tpu.memory_space<vmem>>, %arg3: memref<256x128xbf16, #tpu.memory_space<vmem>>, %arg4: memref<128x128xbf16, #tpu.memory_space<vmem>>, %arg5: memref<128x128xbf16, #tpu.memory_space<vmem>>, %arg6: memref<128x128xbf16, #tpu.memory_space<vmem>>, %arg7: memref<1x128xf32, #tpu.memory_space<vmem>>, %arg8: memref<256x128xf32, #tpu.memory_space<vmem>>) attributes {dimension_semantics = [#tpu.dimension_semantics<parallel>], iteration_bounds = array<i64: 2>, scalar_prefetch = 0 : i64, scratch_operands = 0 : i64, tpu.core_type = #tpu.core_type<tc>, window_params = [{transform_indices = @transform_0, window_bounds = array<i64: 256, 128>}, {transform_indices = @transform_1, window_bounds = array<i64: 256, 128>}, {transform_indices = @transform_2, window_bounds = array<i64: 256, 128>}, {transform_indices = @transform_3, window_bounds = array<i64: 128, 128>}, {transform_indices = @transform_4, window_bounds = array<i64: 128, 128>}, {transform_indices = @transform_5, window_bounds = array<i64: 128, 128>}, {pipeline_mode = #tpu.pipeline_mode<synchronous>, transform_indices = @transform_6, window_bounds = array<i64: 1, 128>}, {transform_indices = @transform_7, window_bounds = array<i64: 256, 128>}]} {
    %c0 = arith.constant 0 : index
    %c0_0 = arith.constant 0 : index
    %0 = vector.load %arg1[%c0, %c0_0] : memref<256x128xbf16, #tpu.memory_space<vmem>>, vector<256x128xbf16>
    %c0_1 = arith.constant 0 : index
    %c0_2 = arith.constant 0 : index
    %1 = vector.load %arg4[%c0_1, %c0_2] : memref<128x128xbf16, #tpu.memory_space<vmem>>, vector<128x128xbf16>
    %cst = arith.constant dense<0.000000e+00> : vector<256x128xf32>
    %2 = tpu.matmul %0, %1, %cst {dimension_numbers = #tpu.dot_dimension_numbers<[1], [0], [0], [1], [0, 0, 1, 1], [], []>} : vector<256x128xbf16>, vector<128x128xbf16>, vector<256x128xf32> -> vector<256x128xf32>
    %c0_3 = arith.constant 0 : index
    %c0_4 = arith.constant 0 : index
    %3 = vector.load %arg2[%c0_3, %c0_4] : memref<256x128xbf16, #tpu.memory_space<vmem>>, vector<256x128xbf16>
    %c0_5 = arith.constant 0 : index
    %c0_6 = arith.constant 0 : index
    %4 = vector.load %arg5[%c0_5, %c0_6] : memref<128x128xbf16, #tpu.memory_space<vmem>>, vector<128x128xbf16>
    %cst_7 = arith.constant dense<0.000000e+00> : vector<256x128xf32>
    %5 = tpu.matmul %3, %4, %cst_7 {dimension_numbers = #tpu.dot_dimension_numbers<[1], [0], [0], [1], [0, 0, 1, 1], [], []>} : vector<256x128xbf16>, vector<128x128xbf16>, vector<256x128xf32> -> vector<256x128xf32>
    %6 = arith.addf %2, %5 : vector<256x128xf32>
    %c0_8 = arith.constant 0 : index
    %c0_9 = arith.constant 0 : index
    %7 = vector.load %arg3[%c0_8, %c0_9] : memref<256x128xbf16, #tpu.memory_space<vmem>>, vector<256x128xbf16>
    %c0_10 = arith.constant 0 : index
    %c0_11 = arith.constant 0 : index
    %8 = vector.load %arg6[%c0_10, %c0_11] : memref<128x128xbf16, #tpu.memory_space<vmem>>, vector<128x128xbf16>
    %cst_12 = arith.constant dense<0.000000e+00> : vector<256x128xf32>
    %9 = tpu.matmul %7, %8, %cst_12 {dimension_numbers = #tpu.dot_dimension_numbers<[1], [0], [0], [1], [0, 0, 1, 1], [], []>} : vector<256x128xbf16>, vector<128x128xbf16>, vector<256x128xf32> -> vector<256x128xf32>
    %10 = arith.addf %6, %9 : vector<256x128xf32>
    %c0_13 = arith.constant 0 : index
    %c0_14 = arith.constant 0 : index
    %11 = vector.load %arg7[%c0_13, %c0_14] : memref<1x128xf32, #tpu.memory_space<vmem>>, vector<1x128xf32>
    %12 = vector.broadcast %11 : vector<1x128xf32> to vector<256x128xf32>
    %13 = arith.addf %10, %12 : vector<256x128xf32>
    %cst_15 = arith.constant dense<0xFF800000> : vector<256xf32>
    %14 = vector.multi_reduction <maximumf>, %13, %cst_15 [1] : vector<256x128xf32> to vector<256xf32>
    %15 = vector.shape_cast %14 : vector<256xf32> to vector<256x1xf32>
    %16 = vector.broadcast %15 : vector<256x1xf32> to vector<256x128xf32>
    %17 = arith.subf %13, %16 : vector<256x128xf32>
    %18 = math.exp %17 : vector<256x128xf32>
    %cst_16 = arith.constant dense<0.000000e+00> : vector<256xf32>
    %19 = vector.multi_reduction <add>, %18, %cst_16 [1] : vector<256x128xf32> to vector<256xf32>
    %20 = vector.shape_cast %19 : vector<256xf32> to vector<256x1xf32>
    %21 = math.log %20 : vector<256x1xf32>
    %22 = vector.broadcast %21 : vector<256x1xf32> to vector<256x128xf32>
    %23 = arith.subf %17, %22 : vector<256x128xf32>
    %c0_17 = arith.constant 0 : index
    %c0_18 = arith.constant 0 : index
    %24 = vector.load %arg8[%c0_17, %c0_18] : memref<256x128xf32, #tpu.memory_space<vmem>>, vector<256x128xf32>
    tpu.vector_store %arg8[%c0_17, %c0_18], %23 {strides = array<i32>} : memref<256x128xf32, #tpu.memory_space<vmem>>, vector<256x128xf32>,
    return
  }
  func.func @transform_0(%arg0: i32) -> (i32, i32) {
    %c0_i32 = arith.constant 0 : i32
    %c0_i32_0 = arith.constant 0 : i32
    return %arg0, %c0_i32 : i32, i32
  }
  func.func @transform_1(%arg0: i32) -> (i32, i32) {
    %c0_i32 = arith.constant 0 : i32
    %c0_i32_0 = arith.constant 0 : i32
    return %arg0, %c0_i32 : i32, i32
  }
  func.func @transform_2(%arg0: i32) -> (i32, i32) {
    %c0_i32 = arith.constant 0 : i32
    %c0_i32_0 = arith.constant 0 : i32
    return %arg0, %c0_i32 : i32, i32
  }
  func.func @transform_3(%arg0: i32) -> (i32, i32) {
    %c0_i32 = arith.constant 0 : i32
    %c0_i32_0 = arith.constant 0 : i32
    %c0_i32_1 = arith.constant 0 : i32
    return %c0_i32, %c0_i32_0 : i32, i32
  }
  func.func @transform_4(%arg0: i32) -> (i32, i32) {
    %c1_i32 = arith.constant 1 : i32
    %c0_i32 = arith.constant 0 : i32
    %c0_i32_0 = arith.constant 0 : i32
    return %c1_i32, %c0_i32 : i32, i32
  }
  func.func @transform_5(%arg0: i32) -> (i32, i32) {
    %c2_i32 = arith.constant 2 : i32
    %c0_i32 = arith.constant 0 : i32
    %c0_i32_0 = arith.constant 0 : i32
    return %c2_i32, %c0_i32 : i32, i32
  }
  func.func @transform_6(%arg0: i32) -> (i32, i32) {
    %c0_i32 = arith.constant 0 : i32
    %c0_i32_0 = arith.constant 0 : i32
    %c0_i32_1 = arith.constant 0 : i32
    return %c0_i32, %c0_i32_0 : i32, i32
  }
  func.func @transform_7(%arg0: i32) -> (i32, i32) {
    %c0_i32 = arith.constant 0 : i32
    %c0_i32_0 = arith.constant 0 : i32
    return %arg0, %c0_i32 : i32, i32
  }
}

</mosaic_0001>

<bundles_post_ra>
// kernel: net_forward.8
= control target key start
LH: loop header
LB: loop body
LE: loop exit
PB: predicated region body
PF: predicated region fallthrough
CT: control target
= control target key end

     0   :  { %s3089_s0 = inlined_call_operand.vmem [shape: bf16[512,512], index: 0, kind: input, shape index: {}]   ;;  %s3090_s1 = inlined_call_operand.vmem [shape: bf16[512,256], index: 1, kind: input, shape index: {}, may-alias: {1,2}]   ;;  %s3091_s2 = inlined_call_operand.vmem [shape: bf16[512,256], index: 2, kind: input, shape index: {}, may-alias: {1,2}]   ;;  %s3092_s3 = inlined_call_operand.vmem [shape: f32[1,128], index: 3, kind: input, shape index: {}]   ;;  %s3093_s4 = inlined_call_operand.vmem [shape: bf16[512,128], index: 4, kind: output, shape index: {}]  }
   0x1   :  { %3096 = sst [smem:[#allocation8_spill]] %s3089_s0 }
   0x2   :  { %3097 = sst [smem:[#allocation9_spill]] %s3090_s1 }
   0x3   :  { %s2590_s15 = smov 0   ;;  %s2592_s16 = smov 0  }
   0x4   :  { %s2594_s17 = smov 0   ;;  %s2596_s18 = smov 0  }
   0x5   :  { %s2598_s19 = smov 0   ;;  %s2600_s20 = smov 0  }
   0x6   :  { %s2602_s21 = smov 0   ;;  %s2604_s22 = smov 0  }
   0x7   :  { %s2606_s23 = smov 0   ;;  %s2608_s24 = smov 0  }
   0x8   :  { %s2610_s25 = smov 0  }
   0x9 LB: > { %s23_s26 = sadd.s32 1, %s2554_s23  ;;  %s26_s27 = sadd.s32 1, %s2558_s24  ;;  %s2562_s25 = sphi %s2610_s25, %s14_s25   ;;  %s2558_s24 = sphi %s2608_s24, %s3116_s24   ;;  %s2554_s23 = sphi %s2606_s23, %s3115_s23   ;;  %s2550_s22 = sphi %s2604_s22, %s3114_s22   ;;  %s2546_s21 = sphi %s2602_s21, %s3113_s21   ;;  %s2542_s20 = sphi %s2600_s20, %s3112_s20   ;;  %s2538_s19 = sphi %s2598_s19, %s3111_s19   ;;  %s2534_s18 = sphi %s2596_s18, %s3110_s18   ;;  %s2530_s17 = sphi %s2594_s17, %s3109_s17   ;;  %s2526_s16 = sphi %s2592_s16, %s3108_s16   ;;  %s2522_s15 = sphi %s2590_s15, %s3107_s15  }
   0xa   : > { %p24_p0 = scmp.ge.s32.totalorder %s23_s26, 2  ;;  %s35_s28 = sadd.s32 1, %s2542_s20 }
   0xb   : > { %p42_p1 = scmp.ne.s32.totalorder %s2542_s20, %s2538_s19  ;;  %p43_p2 = scmp.eq.s32.totalorder %s2562_s25, 0 }
   0xc   : > { %s3118_s26 = smov (%p24_p0, %s23_s26), 0  ;;  %s3120_s27 = smov (!%p24_p0, %s26_s27), %s2558_s24 }
   0xd   : > { %3098 = sst [smem:[#allocation6_spill]] %s3118_s26  ;;  %s31_s29 = ssub.s32 %s2554_s23, %s3118_s26 }
   0xe   : > { %p2658_p3 = por %p43_p2, %p42_p1  ;;  %p28_p4 = scmp.ge.s32.totalorder %s3120_s27, 2 }
   0xf   : > { %p59_p5 = scmp.eq.s32.totalorder %s31_s29, 0  ;;  %s61_s5 = sadd.s32 1, %s2534_s18 }
  0x10   : > { %p68_p6 = scmp.ne.s32.totalorder %s2534_s18, %s2530_s17  ;;  %s3122_s27 = smov (%p28_p4, %s3120_s27), 0 }
  0x11   : > { %3100 = sst [smem:[#allocation7_spill]] %s3122_s27  ;;  %s30_s7 = ssub.s32 %s2558_s24, %s3122_s27 }
  0x12   : > { %s2668_s6 = scalar_select %p59_p5, %s2534_s18, %s61_s5  }
  0x13   : > { %p2674_p7 = por %p68_p6, %p43_p2  ;;  %s32_s9 = sor.u32 %s31_s29, %s30_s7 }
  0x14   : > { %p85_p8 = scmp.eq.s32.totalorder %s30_s7, 0  ;;  %p33_p9 = scmp.eq.s32.totalorder %s32_s9, 0 }
  0x15   : > { %s87_s10 = sadd.s32 1, %s2526_s16  ;;  %p94_p10 = scmp.ne.s32.totalorder %s2526_s16, %s2522_s15 }
  0x16   : > { %s2680_s11 = scalar_select %p85_p8, %s2526_s16, %s87_s10  }
  0x17   : > { %s2683_s12 = scalar_select %p33_p9, %s2542_s20, %s35_s28  }
  0x18   : > { %p2689_p11 = por %p94_p10, %p43_p2  ;;  %p1849_p12 = scmp.ge.s32.totalorder %s2562_s25, 4 }
  0x1a   : > { %170 = sbr.rel (%p1849_p12) target bundleno = 115 (0x73), region = 20 }
  0x21   : > { %173 = sbr.rel (!%p2658_p3) target bundleno = 59 (0x3b), region = 24  ;;  %s175_s14 = sand.u32 (%p2658_p3), 1, %s2542_s20  }
  0x22   : > { %s1852_s29 = sshll.u32 (%p2658_p3), %s2554_s23, 1  ;;  %s1850_s5 = sshll.u32 (%p2658_p3), %s175_s14, 8 }
  0x23   : > { %s1985_s28 = sshll.u32 (%p2658_p3), %s2558_s24, 7  ;;  %s3103_s0 = sld [smem:[#allocation8_spill]] (%p2658_p3) }
  0x24   : > { %s181_s7 = sadd.s32 (%p2658_p3), %s1985_s28, %s1852_s29  ;;  %s2707_s30 = scalar_lea.vmem (%p2658_p3), [#allocation3], %s1850_s5 }
  0x25   : > { %s1854_s9 = sshll.u32 (%p2658_p3), %s181_s7, 2 }
  0x29   : > { %s2702_s26 = scalar_lea.vmem %s3103_s0, %s1854_s9 }
  0x2a   : > { %v273_v0 = vld [vmem:[%s2702_s26] sm:$0xff]  ;;  %v275_v1 = vld [vmem:[%s2702_s26 + $0x10] sm:$0xff] }
  0x2b   : > { %v277_v2 = vld [vmem:[%s2702_s26 + $0x20] sm:$0xff]  ;;  %274 = vst [vmem:[%s2707_s30] sm:$0xff] %v273_v0  ;;  %276 = vst [vmem:[%s2707_s30 + $0x8] sm:$0xff] %v275_v1  ;;  %v279_v3 = vld [vmem:[%s2702_s26 + $0x30] sm:$0xff] }
  0x2c   : > { %278 = vst [vmem:[%s2707_s30 + $0x10] sm:$0xff] %v277_v2  ;;  %v281_v4 = vld [vmem:[%s2702_s26 + $0x40] sm:$0xff]  ;;  %v283_v5 = vld [vmem:[%s2702_s26 + $0x50] sm:$0xff]  ;;  %280 = vst [vmem:[%s2707_s30 + $0x18] sm:$0xff] %v279_v3 }
  0x2d   : > { %282 = vst [vmem:[%s2707_s30 + $0x20] sm:$0xff] %v281_v4  ;;  %284 = vst [vmem:[%s2707_s30 + $0x28] sm:$0xff] %v283_v5  ;;  %v285_v6 = vld [vmem:[%s2702_s26 + $0x60] sm:$0xff]  ;;  %v287_v7 = vld [vmem:[%s2702_s26 + $0x70] sm:$0xff] }
  0x2e   : > { %v289_v8 = vld [vmem:[%s2702_s26 + $0x80] sm:$0xff]  ;;  %286 = vst [vmem:[%s2707_s30 + $0x30] sm:$0xff] %v285_v6  ;;  %288 = vst [vmem:[%s2707_s30 + $0x38] sm:$0xff] %v287_v7  ;;  %v291_v9 = vld [vmem:[%s2702_s26 + $0x90] sm:$0xff] }
  0x2f   : > { %290 = vst [vmem:[%s2707_s30 + $0x40] sm:$0xff] %v289_v8  ;;  %v293_v10 = vld [vmem:[%s2702_s26 + $0xa0] sm:$0xff]  ;;  %v295_v11 = vld [vmem:[%s2702_s26 + $0xb0] sm:$0xff]  ;;  %292 = vst [vmem:[%s2707_s30 + $0x48] sm:$0xff] %v291_v9 }
  0x30   : > { %294 = vst [vmem:[%s2707_s30 + $0x50] sm:$0xff] %v293_v10  ;;  %296 = vst [vmem:[%s2707_s30 + $0x58] sm:$0xff] %v295_v11  ;;  %v297_v12 = vld [vmem:[%s2702_s26 + $0xc0] sm:$0xff]  ;;  %v299_v13 = vld [vmem:[%s2702_s26 + $0xd0] sm:$0xff] }
  0x31   : > { %v301_v14 = vld [vmem:[%s2702_s26 + $0xe0] sm:$0xff]  ;;  %298 = vst [vmem:[%s2707_s30 + $0x60] sm:$0xff] %v297_v12  ;;  %300 = vst [vmem:[%s2707_s30 + $0x68] sm:$0xff] %v299_v13  ;;  %v303_v15 = vld [vmem:[%s2702_s26 + $0xf0] sm:$0xff] }
  0x32   : > { %302 = vst [vmem:[%s2707_s30 + $0x70] sm:$0xff] %v301_v14  ;;  %v305_v16 = vld [vmem:[%s2702_s26 + $0x100] sm:$0xff]  ;;  %v307_v17 = vld [vmem:[%s2702_s26 + $0x110] sm:$0xff]  ;;  %304 = vst [vmem:[%s2707_s30 + $0x78] sm:$0xff] %v303_v15 }
  0x33   : > { %306 = vst [vmem:[%s2707_s30 + $0x80] sm:$0xff] %v305_v16  ;;  %308 = vst [vmem:[%s2707_s30 + $0x88] sm:$0xff] %v307_v17  ;;  %v309_v18 = vld [vmem:[%s2702_s26 + $0x120] sm:$0xff]  ;;  %v311_v19 = vld [vmem:[%s2702_s26 + $0x130] sm:$0xff] }
  0x34   : > { %v313_v20 = vld [vmem:[%s2702_s26 + $0x140] sm:$0xff]  ;;  %310 = vst [vmem:[%s2707_s30 + $0x90] sm:$0xff] %v309_v18  ;;  %312 = vst [vmem:[%s2707_s30 + $0x98] sm:$0xff] %v311_v19  ;;  %v315_v21 = vld [vmem:[%s2702_s26 + $0x150] sm:$0xff] }
  0x35   : > { %314 = vst [vmem:[%s2707_s30 + $0xa0] sm:$0xff] %v313_v20  ;;  %v317_v22 = vld [vmem:[%s2702_s26 + $0x160] sm:$0xff]  ;;  %v319_v23 = vld [vmem:[%s2702_s26 + $0x170] sm:$0xff]  ;;  %316 = vst [vmem:[%s2707_s30 + $0xa8] sm:$0xff] %v315_v21 }
  0x36   : > { %318 = vst [vmem:[%s2707_s30 + $0xb0] sm:$0xff] %v317_v22  ;;  %320 = vst [vmem:[%s2707_s30 + $0xb8] sm:$0xff] %v319_v23  ;;  %v321_v24 = vld [vmem:[%s2702_s26 + $0x180] sm:$0xff]  ;;  %v323_v25 = vld [vmem:[%s2702_s26 + $0x190] sm:$0xff] }
  0x37   : > { %v325_v26 = vld [vmem:[%s2702_s26 + $0x1a0] sm:$0xff]  ;;  %322 = vst [vmem:[%s2707_s30 + $0xc0] sm:$0xff] %v321_v24  ;;  %324 = vst [vmem:[%s2707_s30 + $0xc8] sm:$0xff] %v323_v25  ;;  %v327_v27 = vld [vmem:[%s2702_s26 + $0x1b0] sm:$0xff] }
  0x38   : > { %326 = vst [vmem:[%s2707_s30 + $0xd0] sm:$0xff] %v325_v26  ;;  %v329_v28 = vld [vmem:[%s2702_s26 + $0x1c0] sm:$0xff]  ;;  %v331_v29 = vld [vmem:[%s2702_s26 + $0x1d0] sm:$0xff]  ;;  %328 = vst [vmem:[%s2707_s30 + $0xd8] sm:$0xff] %v327_v27 }
  0x39   : > { %330 = vst [vmem:[%s2707_s30 + $0xe0] sm:$0xff] %v329_v28  ;;  %332 = vst [vmem:[%s2707_s30 + $0xe8] sm:$0xff] %v331_v29  ;;  %v333_v30 = vld [vmem:[%s2702_s26 + $0x1e0] sm:$0xff]  ;;  %v335_v31 = vld [vmem:[%s2702_s26 + $0x1f0] sm:$0xff] }
  0x3a   : > { %334 = vst [vmem:[%s2707_s30 + $0xf0] sm:$0xff] %v333_v30  ;;  %336 = vst [vmem:[%s2707_s30 + $0xf8] sm:$0xff] %v335_v31 }
  0x3b PF: > { %342 = sbr.rel (!%p2674_p7) target bundleno = 90 (0x5a), region = 62  ;;  %s344_s27 = sand.u32 (%p2674_p7), 1, %s2534_s18  }
  0x3c   : > { %s1987_s14 = sshll.u32 (%p2674_p7), %s2554_s23, 8  ;;  %s1855_s29 = sshll.u32 (%p2674_p7), %s344_s27, 7 }
  0x3d   : > { %s3104_s1 = sld [smem:[#allocation9_spill]] (%p2674_p7)  ;;  %s2781_s26 = scalar_lea.vmem (%p2674_p7), [#allocation4], %s1855_s29 }
  0x43   : > { %s2777_s7 = scalar_lea.vmem %s3104_s1, %s1987_s14 }
  0x44   : > { %v366_v32 = vld [vmem:[%s2777_s7] sm:$0xf]  ;;  %v368_v33 = vld [vmem:[%s2777_s7 + $0x8] sm:$0xf]  ;;  %v370_v34 = vld [vmem:[%s2777_s7 + $0x10] sm:$0xf] }
  0x45   : > { %367 = vst [vmem:[%s2781_s26] sm:$0xf] %v366_v32  ;;  %369 = vst [vmem:[%s2781_s26 + $0x4] sm:$0xf] %v368_v33  ;;  %v372_v35 = vld [vmem:[%s2777_s7 + $0x18] sm:$0xf] }
  0x46   : > { %v374_v36 = vld [vmem:[%s2777_s7 + $0x20] sm:$0xf]  ;;  %371 = vst [vmem:[%s2781_s26 + $0x8] sm:$0xf] %v370_v34  ;;  %373 = vst [vmem:[%s2781_s26 + $0xc] sm:$0xf] %v372_v35 }
  0x47   : > { %375 = vst [vmem:[%s2781_s26 + $0x10] sm:$0xf] %v374_v36  ;;  %v376_v37 = vld [vmem:[%s2777_s7 + $0x28] sm:$0xf]  ;;  %v378_v38 = vld [vmem:[%s2777_s7 + $0x30] sm:$0xf] }
  0x48   : > { %v380_v39 = vld [vmem:[%s2777_s7 + $0x38] sm:$0xf]  ;;  %377 = vst [vmem:[%s2781_s26 + $0x14] sm:$0xf] %v376_v37  ;;  %379 = vst [vmem:[%s2781_s26 + $0x18] sm:$0xf] %v378_v38 }
  0x49   : > { %381 = vst [vmem:[%s2781_s26 + $0x1c] sm:$0xf] %v380_v39  ;;  %v382_v40 = vld [vmem:[%s2777_s7 + $0x40] sm:$0xf]  ;;  %v384_v41 = vld [vmem:[%s2777_s7 + $0x48] sm:$0xf] }
  0x4a   : > { %v386_v42 = vld [vmem:[%s2777_s7 + $0x50] sm:$0xf]  ;;  %383 = vst [vmem:[%s2781_s26 + $0x20] sm:$0xf] %v382_v40  ;;  %385 = vst [vmem:[%s2781_s26 + $0x24] sm:$0xf] %v384_v41 }
  0x4b   : > { %387 = vst [vmem:[%s2781_s26 + $0x28] sm:$0xf] %v386_v42  ;;  %v388_v43 = vld [vmem:[%s2777_s7 + $0x58] sm:$0xf]  ;;  %v390_v44 = vld [vmem:[%s2777_s7 + $0x60] sm:$0xf] }
  0x4c   : > { %v392_v45 = vld [vmem:[%s2777_s7 + $0x68] sm:$0xf]  ;;  %389 = vst [vmem:[%s2781_s26 + $0x2c] sm:$0xf] %v388_v43  ;;  %391 = vst [vmem:[%s2781_s26 + $0x30] sm:$0xf] %v390_v44 }
  0x4d   : > { %393 = vst [vmem:[%s2781_s26 + $0x34] sm:$0xf] %v392_v45  ;;  %v394_v46 = vld [vmem:[%s2777_s7 + $0x70] sm:$0xf]  ;;  %v396_v47 = vld [vmem:[%s2777_s7 + $0x78] sm:$0xf] }
  0x4e   : > { %v398_v48 = vld [vmem:[%s2777_s7 + $0x80] sm:$0xf]  ;;  %395 = vst [vmem:[%s2781_s26 + $0x38] sm:$0xf] %v394_v46  ;;  %397 = vst [vmem:[%s2781_s26 + $0x3c] sm:$0xf] %v396_v47 }
  0x4f   : > { %399 = vst [vmem:[%s2781_s26 + $0x40] sm:$0xf] %v398_v48  ;;  %v400_v49 = vld [vmem:[%s2777_s7 + $0x88] sm:$0xf]  ;;  %v402_v50 = vld [vmem:[%s2777_s7 + $0x90] sm:$0xf] }
  0x50   : > { %v404_v51 = vld [vmem:[%s2777_s7 + $0x98] sm:$0xf]  ;;  %401 = vst [vmem:[%s2781_s26 + $0x44] sm:$0xf] %v400_v49  ;;  %403 = vst [vmem:[%s2781_s26 + $0x48] sm:$0xf] %v402_v50 }
  0x51   : > { %405 = vst [vmem:[%s2781_s26 + $0x4c] sm:$0xf] %v404_v51  ;;  %v406_v52 = vld [vmem:[%s2777_s7 + $0xa0] sm:$0xf]  ;;  %v408_v53 = vld [vmem:[%s2777_s7 + $0xa8] sm:$0xf] }
  0x52   : > { %v410_v54 = vld [vmem:[%s2777_s7 + $0xb0] sm:$0xf]  ;;  %407 = vst [vmem:[%s2781_s26 + $0x50] sm:$0xf] %v406_v52  ;;  %409 = vst [vmem:[%s2781_s26 + $0x54] sm:$0xf] %v408_v53 }
  0x53   : > { %411 = vst [vmem:[%s2781_s26 + $0x58] sm:$0xf] %v410_v54  ;;  %v412_v55 = vld [vmem:[%s2777_s7 + $0xb8] sm:$0xf]  ;;  %v414_v56 = vld [vmem:[%s2777_s7 + $0xc0] sm:$0xf] }
  0x54   : > { %v416_v57 = vld [vmem:[%s2777_s7 + $0xc8] sm:$0xf]  ;;  %413 = vst [vmem:[%s2781_s26 + $0x5c] sm:$0xf] %v412_v55  ;;  %415 = vst [vmem:[%s2781_s26 + $0x60] sm:$0xf] %v414_v56 }
  0x55   : > { %417 = vst [vmem:[%s2781_s26 + $0x64] sm:$0xf] %v416_v57  ;;  %v418_v58 = vld [vmem:[%s2777_s7 + $0xd0] sm:$0xf]  ;;  %v420_v59 = vld [vmem:[%s2777_s7 + $0xd8] sm:$0xf] }
  0x56   : > { %v422_v60 = vld [vmem:[%s2777_s7 + $0xe0] sm:$0xf]  ;;  %419 = vst [vmem:[%s2781_s26 + $0x68] sm:$0xf] %v418_v58  ;;  %421 = vst [vmem:[%s2781_s26 + $0x6c] sm:$0xf] %v420_v59 }
  0x57   : > { %423 = vst [vmem:[%s2781_s26 + $0x70] sm:$0xf] %v422_v60  ;;  %v424_v61 = vld [vmem:[%s2777_s7 + $0xe8] sm:$0xf]  ;;  %v426_v62 = vld [vmem:[%s2777_s7 + $0xf0] sm:$0xf] }
  0x58   : > { %v428_v63 = vld [vmem:[%s2777_s7 + $0xf8] sm:$0xf]  ;;  %425 = vst [vmem:[%s2781_s26 + $0x74] sm:$0xf] %v424_v61  ;;  %427 = vst [vmem:[%s2781_s26 + $0x78] sm:$0xf] %v426_v62 }
  0x59   : > { %429 = vst [vmem:[%s2781_s26 + $0x7c] sm:$0xf] %v428_v63 }
  0x5a PF: > { %516 = sbr.rel (!%p2689_p11) target bundleno = 115 (0x73), region = 103  ;;  %s518_s8 = sand.u32 (%p2689_p11), 1, %s2526_s16  }
  0x5b   : > { %s1988_s9 = sshll.u32 (%p2689_p11), %s2558_s24, 8  ;;  %s1859_s10 = sshll.u32 (%p2689_p11), %s518_s8, 7 }
  0x5c   : > { %s2852_s14 = scalar_lea.vmem (%p2689_p11), %s3091_s2, %s1988_s9  ;;  %s2856_s13 = scalar_lea.vmem (%p2689_p11), [#allocation5], %s1859_s10 }
  0x5d   : > { %v1862_v0 = vld [vmem:[%s2852_s14 + $0x4] sm:$0xf] (%p2689_p11)  ;;  %v1863_v1 = vld [vmem:[%s2852_s14 + $0xc] sm:$0xf] (%p2689_p11)  ;;  %v1864_v2 = vld [vmem:[%s2852_s14 + $0x14] sm:$0xf] (%p2689_p11) }
  0x5e   : > { %542 = vst [vmem:[%s2856_s13] sm:$0xf] (%p2689_p11), %v1862_v0  ;;  %544 = vst [vmem:[%s2856_s13 + $0x4] sm:$0xf] (%p2689_p11), %v1863_v1  ;;  %v1865_v3 = vld [vmem:[%s2852_s14 + $0x1c] sm:$0xf] (%p2689_p11) }
  0x5f   : > { %v1866_v4 = vld [vmem:[%s2852_s14 + $0x24] sm:$0xf] (%p2689_p11)  ;;  %546 = vst [vmem:[%s2856_s13 + $0x8] sm:$0xf] (%p2689_p11), %v1864_v2  ;;  %548 = vst [vmem:[%s2856_s13 + $0xc] sm:$0xf] (%p2689_p11), %v1865_v3 }
  0x60   : > { %550 = vst [vmem:[%s2856_s13 + $0x10] sm:$0xf] (%p2689_p11), %v1866_v4  ;;  %v1867_v5 = vld [vmem:[%s2852_s14 + $0x2c] sm:$0xf] (%p2689_p11)  ;;  %v1868_v6 = vld [vmem:[%s2852_s14 + $0x34] sm:$0xf] (%p2689_p11) }
  0x61   : > { %v1869_v7 = vld [vmem:[%s2852_s14 + $0x3c] sm:$0xf]  ;;  %552 = vst [vmem:[%s2856_s13 + $0x14] sm:$0xf] %v1867_v5  ;;  %554 = vst [vmem:[%s2856_s13 + $0x18] sm:$0xf] %v1868_v6 }
  0x62   : > { %556 = vst [vmem:[%s2856_s13 + $0x1c] sm:$0xf] %v1869_v7  ;;  %v1870_v8 = vld [vmem:[%s2852_s14 + $0x44] sm:$0xf]  ;;  %v1871_v9 = vld [vmem:[%s2852_s14 + $0x4c] sm:$0xf] }
  0x63   : > { %v1872_v10 = vld [vmem:[%s2852_s14 + $0x54] sm:$0xf]  ;;  %558 = vst [vmem:[%s2856_s13 + $0x20] sm:$0xf] %v1870_v8  ;;  %560 = vst [vmem:[%s2856_s13 + $0x24] sm:$0xf] %v1871_v9 }
  0x64   : > { %562 = vst [vmem:[%s2856_s13 + $0x28] sm:$0xf] %v1872_v10  ;;  %v1873_v11 = vld [vmem:[%s2852_s14 + $0x5c] sm:$0xf]  ;;  %v1874_v12 = vld [vmem:[%s2852_s14 + $0x64] sm:$0xf] }
  0x65   : > { %v1875_v13 = vld [vmem:[%s2852_s14 + $0x6c] sm:$0xf]  ;;  %564 = vst [vmem:[%s2856_s13 + $0x2c] sm:$0xf] %v1873_v11  ;;  %566 = vst [vmem:[%s2856_s13 + $0x30] sm:$0xf] %v1874_v12 }
  0x66   : > { %568 = vst [vmem:[%s2856_s13 + $0x34] sm:$0xf] %v1875_v13  ;;  %v1876_v14 = vld [vmem:[%s2852_s14 + $0x74] sm:$0xf]  ;;  %v1877_v15 = vld [vmem:[%s2852_s14 + $0x7c] sm:$0xf] }
  0x67   : > { %v1878_v16 = vld [vmem:[%s2852_s14 + $0x84] sm:$0xf]  ;;  %570 = vst [vmem:[%s2856_s13 + $0x38] sm:$0xf] %v1876_v14  ;;  %572 = vst [vmem:[%s2856_s13 + $0x3c] sm:$0xf] %v1877_v15 }
  0x68   : > { %574 = vst [vmem:[%s2856_s13 + $0x40] sm:$0xf] %v1878_v16  ;;  %v1879_v17 = vld [vmem:[%s2852_s14 + $0x8c] sm:$0xf]  ;;  %v1880_v18 = vld [vmem:[%s2852_s14 + $0x94] sm:$0xf] }
  0x69   : > { %v1881_v19 = vld [vmem:[%s2852_s14 + $0x9c] sm:$0xf]  ;;  %576 = vst [vmem:[%s2856_s13 + $0x44] sm:$0xf] %v1879_v17  ;;  %578 = vst [vmem:[%s2856_s13 + $0x48] sm:$0xf] %v1880_v18 }
  0x6a   : > { %580 = vst [vmem:[%s2856_s13 + $0x4c] sm:$0xf] %v1881_v19  ;;  %v1882_v20 = vld [vmem:[%s2852_s14 + $0xa4] sm:$0xf]  ;;  %v1883_v21 = vld [vmem:[%s2852_s14 + $0xac] sm:$0xf] }
  0x6b   : > { %v1884_v22 = vld [vmem:[%s2852_s14 + $0xb4] sm:$0xf]  ;;  %582 = vst [vmem:[%s2856_s13 + $0x50] sm:$0xf] %v1882_v20  ;;  %584 = vst [vmem:[%s2856_s13 + $0x54] sm:$0xf] %v1883_v21 }
  0x6c   : > { %586 = vst [vmem:[%s2856_s13 + $0x58] sm:$0xf] %v1884_v22  ;;  %v1885_v23 = vld [vmem:[%s2852_s14 + $0xbc] sm:$0xf]  ;;  %v1886_v24 = vld [vmem:[%s2852_s14 + $0xc4] sm:$0xf] }
  0x6d   : > { %v1887_v25 = vld [vmem:[%s2852_s14 + $0xcc] sm:$0xf]  ;;  %588 = vst [vmem:[%s2856_s13 + $0x5c] sm:$0xf] %v1885_v23  ;;  %590 = vst [vmem:[%s2856_s13 + $0x60] sm:$0xf] %v1886_v24 }
  0x6e   : > { %592 = vst [vmem:[%s2856_s13 + $0x64] sm:$0xf] %v1887_v25  ;;  %v1888_v26 = vld [vmem:[%s2852_s14 + $0xd4] sm:$0xf]  ;;  %v1889_v27 = vld [vmem:[%s2852_s14 + $0xdc] sm:$0xf] }
  0x6f   : > { %v1890_v28 = vld [vmem:[%s2852_s14 + $0xe4] sm:$0xf]  ;;  %594 = vst [vmem:[%s2856_s13 + $0x68] sm:$0xf] %v1888_v26  ;;  %596 = vst [vmem:[%s2856_s13 + $0x6c] sm:$0xf] %v1889_v27 }
  0x70   : > { %598 = vst [vmem:[%s2856_s13 + $0x70] sm:$0xf] %v1890_v28  ;;  %v1891_v29 = vld [vmem:[%s2852_s14 + $0xec] sm:$0xf]  ;;  %v1892_v30 = vld [vmem:[%s2852_s14 + $0xf4] sm:$0xf] }
  0x71   : > { %v1893_v31 = vld [vmem:[%s2852_s14 + $0xfc] sm:$0xf]  ;;  %600 = vst [vmem:[%s2856_s13 + $0x74] sm:$0xf] %v1891_v29  ;;  %602 = vst [vmem:[%s2856_s13 + $0x78] sm:$0xf] %v1892_v30 }
  0x72   : > { %604 = vst [vmem:[%s2856_s13 + $0x7c] sm:$0xf] %v1893_v31 }
  0x73 PF: > { %p1894_p13 = scmp.ge.s32.totalorder %s2562_s25, 1  ;;  %p690_p0 = scmp.lt.s32.totalorder %s2562_s25, 5 }
  0x75   : > { %p691_p1 = pnand %p1894_p13, %p690_p0 }
  0x76   : > { %s697_s29 = sand.u32 (!%p691_p1), 1, %s2538_s19   ;;  %s704_s5 = sand.u32 (!%p691_p1), 1, %s2530_s17  }
  0x77   : > { %694 = sbr.rel (%p691_p1) target bundleno = 483 (0x1e3), region = 144  ;;  %s1895_s28 = sshll.u32 (!%p691_p1), %s697_s29, 8 }
  0x78   : > { %s1896_s7 = sshll.u32 (!%p691_p1), %s704_s5, 7  ;;  %s711_s26 = sand.u32 (!%p691_p1), 1, %s2522_s15  }
  0x79   : > { %s1898_s8 = sshll.u32 (!%p691_p1), %s2550_s22, 5  ;;  %s1897_s9 = sshll.u32 (!%p691_p1), %s711_s26, 7 }
  0x7a   : > { %p749_p2 = scmp.lt.s32.totalorder (!%p691_p1), %s1898_s8, 63  ;;  %s2931_s13 = scalar_lea.vmem (!%p691_p1), [#allocation3], %s1895_s28 }
  0x7b   : > { %s2933_s0 = scalar_lea.vmem (!%p691_p1), [#allocation4], %s1896_s7  ;;  %s2935_s1 = scalar_lea.vmem (!%p691_p1), [#allocation5], %s1897_s9 }
  0x7c   : > { %p1900_p3 = scmp.ne.s32.totalorder (!%p691_p1), %s2546_s21, 0 }
  0x7e   : > { %s3124_s8 = smov (!%p749_p2, %s1898_s8), 63  ;;  %758 = sbr.rel (%p1900_p3) target bundleno = 144 (0x90), region = 160 }
  0x7f   : > { %s1899_s10 = sshll.u32 %s3124_s8, 2  ;;  %v2564_v32 = vmov (!%p1900_p3), 0.0  }
  0x80   : > { %s2929_s14 = scalar_lea.vmem %s3093_s4, %s1899_s10  ;;  %759 = vst [vmem:[#allocation2] sm:$0xff] (!%p1900_p3), %v2564_v32  ;;  %760 = vst [vmem:[#allocation2 + $0x8] sm:$0xff] (!%p1900_p3), %v2564_v32 }
  0x81   : > { %761 = vst [vmem:[#allocation2 + $0x10] sm:$0xff] (!%p1900_p3), %v2564_v32  ;;  %762 = vst [vmem:[#allocation2 + $0x18] sm:$0xff] (!%p1900_p3), %v2564_v32 }
  0x82   : > { %763 = vst [vmem:[#allocation2 + $0x20] sm:$0xff] (!%p1900_p3), %v2564_v32  ;;  %764 = vst [vmem:[#allocation2 + $0x28] sm:$0xff] (!%p1900_p3), %v2564_v32 }
  0x83   : > { %765 = vst [vmem:[#allocation2 + $0x30] sm:$0xff] (!%p1900_p3), %v2564_v32  ;;  %766 = vst [vmem:[#allocation2 + $0x38] sm:$0xff] (!%p1900_p3), %v2564_v32 }
  0x84   : > { %767 = vst [vmem:[#allocation2 + $0x40] sm:$0xff] (!%p1900_p3), %v2564_v32  ;;  %768 = vst [vmem:[#allocation2 + $0x48] sm:$0xff] (!%p1900_p3), %v2564_v32 }
  0x85   : > { %769 = vst [vmem:[#allocation2 + $0x50] sm:$0xff] %v2564_v32  ;;  %770 = vst [vmem:[#allocation2 + $0x58] sm:$0xff] %v2564_v32 }
  0x86   : > { %771 = vst [vmem:[#allocation2 + $0x60] sm:$0xff] %v2564_v32  ;;  %772 = vst [vmem:[#allocation2 + $0x68] sm:$0xff] %v2564_v32 }
  0x87   : > { %773 = vst [vmem:[#allocation2 + $0x70] sm:$0xff] %v2564_v32  ;;  %774 = vst [vmem:[#allocation2 + $0x78] sm:$0xff] %v2564_v32 }
  0x88   : > { %775 = vst [vmem:[#allocation2 + $0x80] sm:$0xff] %v2564_v32  ;;  %776 = vst [vmem:[#allocation2 + $0x88] sm:$0xff] %v2564_v32 }
  0x89   : > { %777 = vst [vmem:[#allocation2 + $0x90] sm:$0xff] %v2564_v32  ;;  %778 = vst [vmem:[#allocation2 + $0x98] sm:$0xff] %v2564_v32 }
  0x8a   : > { %779 = vst [vmem:[#allocation2 + $0xa0] sm:$0xff] %v2564_v32  ;;  %780 = vst [vmem:[#allocation2 + $0xa8] sm:$0xff] %v2564_v32 }
  0x8b   : > { %781 = vst [vmem:[#allocation2 + $0xb0] sm:$0xff] %v2564_v32  ;;  %782 = vst [vmem:[#allocation2 + $0xb8] sm:$0xff] %v2564_v32 }
  0x8c   : > { %783 = vst [vmem:[#allocation2 + $0xc0] sm:$0xff] %v2564_v32  ;;  %784 = vst [vmem:[#allocation2 + $0xc8] sm:$0xff] %v2564_v32 }
  0x8d   : > { %785 = vst [vmem:[#allocation2 + $0xd0] sm:$0xff] %v2564_v32  ;;  %786 = vst [vmem:[#allocation2 + $0xd8] sm:$0xff] %v2564_v32 }
  0x8e   : > { %787 = vst [vmem:[#allocation2 + $0xe0] sm:$0xff] %v2564_v32  ;;  %788 = vst [vmem:[#allocation2 + $0xe8] sm:$0xff] %v2564_v32 }
  0x8f   : > { %789 = vst [vmem:[#allocation2 + $0xf0] sm:$0xff] %v2564_v32  ;;  %790 = vst [vmem:[#allocation2 + $0xf8] sm:$0xff] %v2564_v32 }
  0x90 PF: > { %v2412_v33 = vld [vmem:[%s2933_s0 + $0x40] sm:$0xff]   ;;  %v2414_v35 = vld [vmem:[%s2933_s0 + $0x48] sm:$0xff]   ;;  %v2416_v37 = vld [vmem:[%s2933_s0 + $0x50] sm:$0xff]   ;;  %p1949_p4 = scmp.ne.s32.totalorder %s2546_s21, 1 }
  0x91   : > { %v2413_v34 = vld [vmem:[%s2933_s0] sm:$0xff]   ;;  %2195 = vmatprep.subr.bf16.mxu0 %v2412_v33  ;;  %2307 = vmatprep.subr.bf16.mxu1 %v2412_v33  ;;  %v2415_v36 = vld [vmem:[%s2933_s0 + $0x8] sm:$0xff]   ;;  %v2417_v38 = vld [vmem:[%s2933_s0 + $0x10] sm:$0xff]  }
  0x92   : > { %2196 = vmatpush3.bf16.msra.mxu0 %v2413_v34  ;;  %2315 = vmatpush3.bf16.msra.mxu1 %v2413_v34  ;;  %v2418_v39 = vld [vmem:[%s2933_s0 + $0x58] sm:$0xff]   ;;  %v2420_v41 = vld [vmem:[%s2933_s0 + $0x60] sm:$0xff]   ;;  %v2422_v43 = vld [vmem:[%s2933_s0 + $0x68] sm:$0xff]  }
  0x93   : > { %2197 = vmatprep.subr.bf16.mxu0 %v2414_v35  ;;  %2308 = vmatprep.subr.bf16.mxu1 %v2414_v35  ;;  %v2419_v40 = vld [vmem:[%s2933_s0 + $0x18] sm:$0xff]   ;;  %v2421_v42 = vld [vmem:[%s2933_s0 + $0x20] sm:$0xff]   ;;  %v2423_v46 = vld [vmem:[%s2933_s0 + $0x28] sm:$0xff]  }
  0x94   : > { %v2430_v44 = vld [vmem:[%s2931_s13 + $0x4] ss:$8 sps:$4 sm:$0xff]   ;;  %v2424_v47 = vld [vmem:[%s2933_s0 + $0x70] sm:$0xff]   ;;  %v2426_v49 = vld [vmem:[%s2933_s0 + $0x78] sm:$0xff]  }
  0x95   : > { %v2433_v45 = vld [vmem:[%s2931_s13 + $0x84] ss:$8 sps:$4 sm:$0xff]   ;;  %1175 = vmatprep.mubr.bf16.mxu0 %v2430_v44  ;;  %v2425_v48 = vld [vmem:[%s2933_s0 + $0x30] sm:$0xff]   ;;  %v2427_v50 = vld [vmem:[%s2933_s0 + $0x38] sm:$0xff]  }
  0x96   : > { %2198 = vmatpush3.bf16.msra.mxu0 %v2415_v36  ;;  %2316 = vmatpush3.bf16.msra.mxu1 %v2415_v36  ;;  %v2428_v51 = vld [vmem:[%s2931_s13] ss:$8 sps:$4 sm:$0xff]   ;;  %v2434_v53 = vld [vmem:[%s2931_s13 + $0x14] ss:$8 sps:$4 sm:$0xff]   ;;  %v2438_v55 = vld [vmem:[%s2931_s13 + $0x10] ss:$8 sps:$4 sm:$0xff]  }
  0x97   : > { %2199 = vmatprep.subr.bf16.mxu0 %v2416_v37  ;;  %2309 = vmatprep.subr.bf16.mxu1 %v2416_v37  ;;  %v2431_v52 = vld [vmem:[%s2931_s13 + $0x80] ss:$8 sps:$4 sm:$0xff]   ;;  %v2436_v54 = vld [vmem:[%s2931_s13 + $0x94] ss:$8 sps:$4 sm:$0xff]   ;;  %v2439_v56 = vld [vmem:[%s2931_s13 + $0x90] ss:$8 sps:$4 sm:$0xff]  }
  0x98   : > { %1239 = vmatprep.mubr.bf16.mxu1 %v2433_v45  ;;  %v2440_v57 = vld [vmem:[%s2931_s13 + $0x24] ss:$8 sps:$4 sm:$0xff]   ;;  %v2444_v59 = vld [vmem:[%s2931_s13 + $0x20] ss:$8 sps:$4 sm:$0xff]   ;;  %v2446_v61 = vld [vmem:[%s2931_s13 + $0x34] ss:$8 sps:$4 sm:$0xff]  }
  0x99   : > { %v2442_v58 = vld [vmem:[%s2931_s13 + $0xa4] ss:$8 sps:$4 sm:$0xff]   ;;  %v2445_v60 = vld [vmem:[%s2931_s13 + $0xa0] ss:$8 sps:$4 sm:$0xff]   ;;  %v2448_v62 = vld [vmem:[%s2931_s13 + $0xb4] ss:$8 sps:$4 sm:$0xff]  }
  0x9a   : > { %2200 = vmatpush3.bf16.msra.mxu0 %v2417_v38  ;;  %2317 = vmatpush3.bf16.msra.mxu1 %v2417_v38  ;;  %v2450_v63 = vld [vmem:[%s2931_s13 + $0x30] ss:$8 sps:$4 sm:$0xff]   ;;  %v2452_v1 = vld [vmem:[%s2931_s13 + $0x44] ss:$8 sps:$4 sm:$0xff]   ;;  %v2456_v3 = vld [vmem:[%s2931_s13 + $0x40] ss:$8 sps:$4 sm:$0xff]  }
  0x9b   : > { %2201 = vmatprep.subr.bf16.mxu0 %v2418_v39  ;;  %2310 = vmatprep.subr.bf16.mxu1 %v2418_v39  ;;  %v2451_v0 = vld [vmem:[%s2931_s13 + $0xb0] ss:$8 sps:$4 sm:$0xff]   ;;  %v2454_v2 = vld [vmem:[%s2931_s13 + $0xc4] ss:$8 sps:$4 sm:$0xff]   ;;  %v2457_v4 = vld [vmem:[%s2931_s13 + $0xc0] ss:$8 sps:$4 sm:$0xff]  }
  0x9c   : > { %v2458_v5 = vld [vmem:[%s2931_s13 + $0x54] ss:$8 sps:$4 sm:$0xff]   ;;  %v2462_v7 = vld [vmem:[%s2931_s13 + $0x50] ss:$8 sps:$4 sm:$0xff]   ;;  %v2464_v9 = vld [vmem:[%s2931_s13 + $0x64] ss:$8 sps:$4 sm:$0xff]  }
  0x9d   : > { %v2460_v6 = vld [vmem:[%s2931_s13 + $0xd4] ss:$8 sps:$4 sm:$0xff]   ;;  %v2463_v8 = vld [vmem:[%s2931_s13 + $0xd0] ss:$8 sps:$4 sm:$0xff]   ;;  %v2466_v10 = vld [vmem:[%s2931_s13 + $0xe4] ss:$8 sps:$4 sm:$0xff]  }
  0x9e   : > { %2202 = vmatpush3.bf16.msra.mxu0 %v2419_v40  ;;  %2318 = vmatpush3.bf16.msra.mxu1 %v2419_v40  ;;  %v2468_v11 = vld [vmem:[%s2931_s13 + $0x60] ss:$8 sps:$4 sm:$0xff]   ;;  %v2470_v13 = vld [vmem:[%s2931_s13 + $0x74] ss:$8 sps:$4 sm:$0xff]   ;;  %v2474_v15 = vld [vmem:[%s2931_s13 + $0x70] ss:$8 sps:$4 sm:$0xff]  }
  0x9f   : > { %2203 = vmatprep.subr.bf16.mxu0 %v2420_v41  ;;  %2311 = vmatprep.subr.bf16.mxu1 %v2420_v41  ;;  %v2469_v12 = vld [vmem:[%s2931_s13 + $0xe0] ss:$8 sps:$4 sm:$0xff]   ;;  %v2472_v14 = vld [vmem:[%s2931_s13 + $0xf4] ss:$8 sps:$4 sm:$0xff]   ;;  %v2475_v16 = vld [vmem:[%s2931_s13 + $0xf0] ss:$8 sps:$4 sm:$0xff]  }
  0xa0   : > { %v791_v19 = vld [vmem:[#allocation2] sm:$0xff]  ;;  %v792_v27 = vld [vmem:[#allocation2 + $0x8] sm:$0xff]  ;;  %v793_v39 = vld [vmem:[#allocation2 + $0x10] sm:$0xff] }
  0xa1   : > { %v807_v21 = vld [vmem:[#allocation2 + $0x80] sm:$0xff]  ;;  %v808_v29 = vld [vmem:[#allocation2 + $0x88] sm:$0xff]  ;;  %v809_v41 = vld [vmem:[#allocation2 + $0x90] sm:$0xff] }
  0xa2   : > { %2204 = vmatpush3.bf16.msra.mxu0 %v2421_v42  ;;  %2319 = vmatpush3.bf16.msra.mxu1 %v2421_v42 }
  0xa3   : > { %2205 = vmatprep.subr.bf16.mxu0 %v2422_v43  ;;  %2312 = vmatprep.subr.bf16.mxu1 %v2422_v43 }
  0xa6   : > { %2206 = vmatpush3.bf16.msra.mxu0 %v2423_v46  ;;  %2320 = vmatpush3.bf16.msra.mxu1 %v2423_v46 }
  0xa7   : > { %2207 = vmatprep.subr.bf16.mxu0 %v2424_v47  ;;  %2313 = vmatprep.subr.bf16.mxu1 %v2424_v47  ;;  %v794_v47 = vld [vmem:[#allocation2 + $0x18] sm:$0xff] }
  0xaa   : > { %2208 = vmatpush3.bf16.msra.mxu0 %v2425_v48  ;;  %2321 = vmatpush3.bf16.msra.mxu1 %v2425_v48 }
  0xab   : > { %2209 = vmatprep.subr.bf16.mxu0 %v2426_v49  ;;  %2314 = vmatprep.subr.bf16.mxu1 %v2426_v49  ;;  %v810_v49 = vld [vmem:[#allocation2 + $0x98] sm:$0xff] }
  0xae   : > { %2210 = vmatpush3.bf16.msra.mxu0 %v2427_v50  ;;  %2322 = vmatpush3.bf16.msra.mxu1 %v2427_v50 }
  0xb1   : > { %1176 = vmatmul.mubr.bf16.vlgmr.msra.gmra.mrb[0].mxu0 %v2428_v51  ;;  %1240 = vmatmul.mubr.bf16.vlgmr.msra.gmra.mrb[0].mxu1 %v2431_v52 }
  0xb2   : > { %1183 = vmatprep.mubr.bf16.mxu0 %v2434_v53  ;;  %1247 = vmatprep.mubr.bf16.mxu1 %v2436_v54 }
  0xb9   : > { %1184 = vmatmul.mubr.bf16.gmra.mrb[4].mxu0 %v2438_v55  ;;  %1248 = vmatmul.mubr.bf16.gmra.mrb[4].mxu1 %v2439_v56 }
  0xba   : > { %1191 = vmatprep.mubr.bf16.mxu0 %v2440_v57  ;;  %1255 = vmatprep.mubr.bf16.mxu1 %v2442_v58 }
  0xc1   : > { %1192 = vmatmul.mubr.bf16.gmra.mrb[8].mxu0 %v2444_v59  ;;  %1256 = vmatmul.mubr.bf16.gmra.mrb[8].mxu1 %v2445_v60  ;;  %v795_v59 = vld [vmem:[#allocation2 + $0x20] sm:$0xff] }
  0xc2   : > { %1199 = vmatprep.mubr.bf16.mxu0 %v2446_v61  ;;  %1263 = vmatprep.mubr.bf16.mxu1 %v2448_v62  ;;  %v811_v61 = vld [vmem:[#allocation2 + $0xa0] sm:$0xff] }
  0xc9   : > { %1200 = vmatmul.mubr.bf16.gmra.mrb[12].mxu0 %v2450_v63  ;;  %1264 = vmatmul.mubr.bf16.gmra.mrb[12].mxu1 %v2451_v0 }
  0xca   : > { %1207 = vmatprep.mubr.bf16.mxu0 %v2452_v1  ;;  %1271 = vmatprep.mubr.bf16.mxu1 %v2454_v2 }
  0xd1   : > { %1208 = vmatmul.mubr.bf16.gmra.mrb[16].mxu0 %v2456_v3  ;;  %1272 = vmatmul.mubr.bf16.gmra.mrb[16].mxu1 %v2457_v4  ;;  %v796_v3 = vld [vmem:[#allocation2 + $0x28] sm:$0xff] }
  0xd2   : > { %1215 = vmatprep.mubr.bf16.mxu0 %v2458_v5  ;;  %1279 = vmatprep.mubr.bf16.mxu1 %v2460_v6  ;;  %v812_v5 = vld [vmem:[#allocation2 + $0xa8] sm:$0xff] }
  0xd9   : > { %1216 = vmatmul.mubr.bf16.gmra.mrb[20].mxu0 %v2462_v7  ;;  %1280 = vmatmul.mubr.bf16.gmra.mrb[20].mxu1 %v2463_v8 }
  0xda   : > { %1223 = vmatprep.mubr.bf16.mxu0 %v2464_v9  ;;  %1287 = vmatprep.mubr.bf16.mxu1 %v2466_v10 }
  0xe1   : > { %1224 = vmatmul.mubr.bf16.gmra.mrb[24].mxu0 %v2468_v11  ;;  %1288 = vmatmul.mubr.bf16.gmra.mrb[24].mxu1 %v2469_v12 }
  0xe2   : > { %1231 = vmatprep.mubr.bf16.mxu0 %v2470_v13  ;;  %1295 = vmatprep.mubr.bf16.mxu1 %v2472_v14 }
  0xe9   : > { %1232 = vmatmul.mubr.bf16.gmra.mrb[28].mxu0 %v2474_v15  ;;  %1296 = vmatmul.mubr.bf16.gmra.mrb[28].mxu1 %v2475_v16  ;;  %v797_v15 = vld [vmem:[#allocation2 + $0x30] sm:$0xff] }
 0x184   : > { %v2211_v17 = vpop.f32.mrb[0].mxu0  ;;  %v2259_v18 = vpop.f32.mrb[0].mxu1 }
 0x185   : > { %v2212_v20 = vpop.f32.mrb[1].mxu0  ;;  %v2260_v22 = vpop.f32.mrb[1].mxu1 }
 0x186   : > { %v2213_v23 = vadd.f32 %v2212_v20, %v2211_v17  ;;  %v2261_v24 = vadd.f32 %v2260_v22, %v2259_v18  ;;  %v2214_v25 = vpop.f32.mrb[2].mxu0  ;;  %v2262_v26 = vpop.f32.mrb[2].mxu1  ;;  %v813_v17 = vld [vmem:[#allocation2 + $0xb0] sm:$0xff] }
 0x187   : > { %v2215_v28 = vpop.f32.mrb[3].mxu0  ;;  %v2263_v30 = vpop.f32.mrb[3].mxu1 }
 0x188   : > { %v1304_v31 = vadd.f32 %v2213_v23, %v791_v19  ;;  %v1320_v32 = vadd.f32 %v2261_v24, %v807_v21  ;;  %v2216_v33 = vadd.f32 %v2215_v28, %v2214_v25  ;;  %v2264_v34 = vadd.f32 %v2263_v30, %v2262_v26  ;;  %v798_v23 = vld [vmem:[#allocation2 + $0x38] sm:$0xff] }
 0x189   : > { %v814_v25 = vld [vmem:[#allocation2 + $0xb8] sm:$0xff] }
 0x18a   : > { %1336 = vst [vmem:[#allocation2] sm:$0xff] %v1304_v31  ;;  %1352 = vst [vmem:[#allocation2 + $0x80] sm:$0xff] %v1320_v32  ;;  %v1305_v35 = vadd.f32 %v2216_v33, %v792_v27  ;;  %v1321_v36 = vadd.f32 %v2264_v34, %v808_v29 }
 0x18c   : > { %1337 = vst [vmem:[#allocation2 + $0x8] sm:$0xff] %v1305_v35  ;;  %1353 = vst [vmem:[#allocation2 + $0x88] sm:$0xff] %v1321_v36  ;;  %v2217_v37 = vpop.f32.mrb[4].mxu0  ;;  %v2265_v38 = vpop.f32.mrb[4].mxu1  ;;  %v799_v35 = vld [vmem:[#allocation2 + $0x40] sm:$0xff] }
 0x18d   : > { %v2218_v40 = vpop.f32.mrb[5].mxu0  ;;  %v2266_v42 = vpop.f32.mrb[5].mxu1 }
 0x18e   : > { %v2219_v43 = vadd.f32 %v2218_v40, %v2217_v37  ;;  %v2267_v44 = vadd.f32 %v2266_v42, %v2265_v38  ;;  %v2220_v45 = vpop.f32.mrb[6].mxu0  ;;  %v2268_v46 = vpop.f32.mrb[6].mxu1  ;;  %v815_v37 = vld [vmem:[#allocation2 + $0xc0] sm:$0xff] }
 0x18f   : > { %v2221_v48 = vpop.f32.mrb[7].mxu0  ;;  %v2269_v50 = vpop.f32.mrb[7].mxu1 }
 0x190   : > { %v1306_v51 = vadd.f32 %v2219_v43, %v793_v39  ;;  %v1322_v52 = vadd.f32 %v2267_v44, %v809_v41  ;;  %v2222_v53 = vadd.f32 %v2221_v48, %v2220_v45  ;;  %v2270_v54 = vadd.f32 %v2269_v50, %v2268_v46  ;;  %v800_v43 = vld [vmem:[#allocation2 + $0x48] sm:$0xff] }
 0x191   : > { %v816_v45 = vld [vmem:[#allocation2 + $0xc8] sm:$0xff] }
 0x192   : > { %1338 = vst [vmem:[#allocation2 + $0x10] sm:$0xff] %v1306_v51  ;;  %1354 = vst [vmem:[#allocation2 + $0x90] sm:$0xff] %v1322_v52  ;;  %v1307_v55 = vadd.f32 %v2222_v53, %v794_v47  ;;  %v1323_v56 = vadd.f32 %v2270_v54, %v810_v49 }
 0x194   : > { %1339 = vst [vmem:[#allocation2 + $0x18] sm:$0xff] %v1307_v55  ;;  %1355 = vst [vmem:[#allocation2 + $0x98] sm:$0xff] %v1323_v56  ;;  %v2223_v57 = vpop.f32.mrb[8].mxu0  ;;  %v2271_v58 = vpop.f32.mrb[8].mxu1  ;;  %v801_v55 = vld [vmem:[#allocation2 + $0x50] sm:$0xff] }
 0x195   : > { %v2224_v60 = vpop.f32.mrb[9].mxu0  ;;  %v2272_v62 = vpop.f32.mrb[9].mxu1 }
 0x196   : > { %v2225_v63 = vadd.f32 %v2224_v60, %v2223_v57  ;;  %v2273_v0 = vadd.f32 %v2272_v62, %v2271_v58  ;;  %v2226_v1 = vpop.f32.mrb[10].mxu0  ;;  %v2274_v2 = vpop.f32.mrb[10].mxu1  ;;  %v817_v57 = vld [vmem:[#allocation2 + $0xd0] sm:$0xff] }
 0x197   : > { %v2227_v4 = vpop.f32.mrb[11].mxu0  ;;  %v2275_v6 = vpop.f32.mrb[11].mxu1 }
 0x198   : > { %v1308_v7 = vadd.f32 %v2225_v63, %v795_v59  ;;  %v1324_v8 = vadd.f32 %v2273_v0, %v811_v61  ;;  %v2228_v9 = vadd.f32 %v2227_v4, %v2226_v1  ;;  %v2276_v10 = vadd.f32 %v2275_v6, %v2274_v2  ;;  %v802_v63 = vld [vmem:[#allocation2 + $0x58] sm:$0xff] }
 0x199   : > { %v818_v1 = vld [vmem:[#allocation2 + $0xd8] sm:$0xff] }
 0x19a   : > { %1340 = vst [vmem:[#allocation2 + $0x20] sm:$0xff] %v1308_v7  ;;  %1356 = vst [vmem:[#allocation2 + $0xa0] sm:$0xff] %v1324_v8  ;;  %v1309_v11 = vadd.f32 %v2228_v9, %v796_v3  ;;  %v1325_v12 = vadd.f32 %v2276_v10, %v812_v5 }
 0x19c   : > { %1341 = vst [vmem:[#allocation2 + $0x28] sm:$0xff] %v1309_v11  ;;  %1357 = vst [vmem:[#allocation2 + $0xa8] sm:$0xff] %v1325_v12  ;;  %v2229_v13 = vpop.f32.mrb[12].mxu0  ;;  %v2277_v14 = vpop.f32.mrb[12].mxu1  ;;  %v803_v11 = vld [vmem:[#allocation2 + $0x60] sm:$0xff] }
 0x19d   : > { %v2230_v16 = vpop.f32.mrb[13].mxu0  ;;  %v2278_v18 = vpop.f32.mrb[13].mxu1 }
 0x19e   : > { %v2231_v19 = vadd.f32 %v2230_v16, %v2229_v13  ;;  %v2279_v20 = vadd.f32 %v2278_v18, %v2277_v14  ;;  %v2232_v21 = vpop.f32.mrb[14].mxu0  ;;  %v2280_v22 = vpop.f32.mrb[14].mxu1  ;;  %v819_v13 = vld [vmem:[#allocation2 + $0xe0] sm:$0xff] }
 0x19f   : > { %v2233_v24 = vpop.f32.mrb[15].mxu0  ;;  %v2281_v26 = vpop.f32.mrb[15].mxu1 }
 0x1a0   : > { %v1310_v27 = vadd.f32 %v2231_v19, %v797_v15  ;;  %v1326_v28 = vadd.f32 %v2279_v20, %v813_v17  ;;  %v2234_v29 = vadd.f32 %v2233_v24, %v2232_v21  ;;  %v2282_v30 = vadd.f32 %v2281_v26, %v2280_v22  ;;  %v804_v19 = vld [vmem:[#allocation2 + $0x68] sm:$0xff] }
 0x1a1   : > { %v820_v21 = vld [vmem:[#allocation2 + $0xe8] sm:$0xff] }
 0x1a2   : > { %1342 = vst [vmem:[#allocation2 + $0x30] sm:$0xff] %v1310_v27  ;;  %1358 = vst [vmem:[#allocation2 + $0xb0] sm:$0xff] %v1326_v28  ;;  %v1311_v31 = vadd.f32 %v2234_v29, %v798_v23  ;;  %v1327_v32 = vadd.f32 %v2282_v30, %v814_v25 }
 0x1a4   : > { %1343 = vst [vmem:[#allocation2 + $0x38] sm:$0xff] %v1311_v31  ;;  %1359 = vst [vmem:[#allocation2 + $0xb8] sm:$0xff] %v1327_v32  ;;  %v2235_v33 = vpop.f32.mrb[16].mxu0  ;;  %v2283_v34 = vpop.f32.mrb[16].mxu1  ;;  %v805_v31 = vld [vmem:[#allocation2 + $0x70] sm:$0xff] }
 0x1a5   : > { %v2236_v36 = vpop.f32.mrb[17].mxu0  ;;  %v2284_v38 = vpop.f32.mrb[17].mxu1 }
 0x1a6   : > { %v2237_v39 = vadd.f32 %v2236_v36, %v2235_v33  ;;  %v2285_v40 = vadd.f32 %v2284_v38, %v2283_v34  ;;  %v2238_v41 = vpop.f32.mrb[18].mxu0  ;;  %v2286_v42 = vpop.f32.mrb[18].mxu1  ;;  %v821_v33 = vld [vmem:[#allocation2 + $0xf0] sm:$0xff] }
 0x1a7   : > { %v2239_v44 = vpop.f32.mrb[19].mxu0  ;;  %v2287_v46 = vpop.f32.mrb[19].mxu1 }
 0x1a8   : > { %v1312_v47 = vadd.f32 %v2237_v39, %v799_v35  ;;  %v1328_v48 = vadd.f32 %v2285_v40, %v815_v37  ;;  %v2240_v49 = vadd.f32 %v2239_v44, %v2238_v41  ;;  %v2288_v50 = vadd.f32 %v2287_v46, %v2286_v42  ;;  %v806_v39 = vld [vmem:[#allocation2 + $0x78] sm:$0xff] }
 0x1a9   : > { %v822_v41 = vld [vmem:[#allocation2 + $0xf8] sm:$0xff] }
 0x1aa   : > { %1344 = vst [vmem:[#allocation2 + $0x40] sm:$0xff] %v1312_v47  ;;  %1360 = vst [vmem:[#allocation2 + $0xc0] sm:$0xff] %v1328_v48  ;;  %v1313_v51 = vadd.f32 %v2240_v49, %v800_v43  ;;  %v1329_v52 = vadd.f32 %v2288_v50, %v816_v45  ;;  %v1372_v49 = vld [vmem:[#allocation2] sm:$0xff] (!%p1949_p4)  ;;  %v1373_v50 = vld [vmem:[#allocation2 + $0x8] sm:$0xff] (!%p1949_p4) }
 0x1ac   : > { %1345 = vst [vmem:[#allocation2 + $0x48] sm:$0xff] %v1313_v51  ;;  %1361 = vst [vmem:[#allocation2 + $0xc8] sm:$0xff] %v1329_v52  ;;  %v2241_v53 = vpop.f32.mrb[20].mxu0  ;;  %v2289_v54 = vpop.f32.mrb[20].mxu1  ;;  %v2022_v51 = vld [vmem:[%s2935_s1] sm:$0xff] (!%p1949_p4)  }
 0x1ad   : > { %v2242_v56 = vpop.f32.mrb[21].mxu0  ;;  %v2290_v58 = vpop.f32.mrb[21].mxu1  ;;  %v2023_v52 = vunpack.c.l.bf16 (!%p1949_p4), %v2022_v51 }
 0x1ae   : > { %v2243_v59 = vadd.f32 %v2242_v56, %v2241_v53  ;;  %v2291_v60 = vadd.f32 %v2290_v58, %v2289_v54  ;;  %v2244_v61 = vpop.f32.mrb[22].mxu0  ;;  %v2292_v62 = vpop.f32.mrb[22].mxu1  ;;  %v2024_v53 = vunpack.c.h.bf16 (!%p1949_p4), %v2022_v51  ;;  %v2991_v54 = vld [vmem:[%s3092_s3] ss:$0 sm:$0xff] (!%p1949_p4)  ;;  %v1375_v56 = vld [vmem:[#allocation2 + $0x18] sm:$0xff] (!%p1949_p4) }
 0x1af   : > { %v2245_v0 = vpop.f32.mrb[23].mxu0  ;;  %v2293_v2 = vpop.f32.mrb[23].mxu1  ;;  %v1468_v58 = vadd.f32 (!%p1949_p4), %v2023_v52, %v1372_v49 }
 0x1b0   : > { %v1314_v3 = vadd.f32 %v2243_v59, %v801_v55  ;;  %v1330_v4 = vadd.f32 %v2291_v60, %v817_v57  ;;  %v2246_v5 = vadd.f32 %v2245_v0, %v2244_v61  ;;  %v2294_v6 = vadd.f32 %v2293_v2, %v2292_v62  ;;  %v1374_v55 = vld [vmem:[#allocation2 + $0x10] sm:$0xff] (!%p1949_p4)  ;;  %v2165_v57 = vld [vmem:[%s2935_s1 + $0x8] sm:$0xff] (!%p1949_p4)   ;;  %v1376_v62 = vld [vmem:[#allocation2 + $0x20] sm:$0xff] (!%p1949_p4) }
 0x1b1   : > { %v1469_v59 = vadd.f32 (!%p1949_p4), %v2024_v53, %v1373_v50  ;;  %v2027_v60 = vunpack.c.l.bf16 (!%p1949_p4), %v2165_v57  ;;  %v2028_v61 = vunpack.c.h.bf16 (!%p1949_p4), %v2165_v57  ;;  %v2166_v0 = vld [vmem:[%s2935_s1 + $0x10] sm:$0xff] (!%p1949_p4)  }
 0x1b2   : > { %1346 = vst [vmem:[#allocation2 + $0x50] sm:$0xff] %v1314_v3  ;;  %1362 = vst [vmem:[#allocation2 + $0xd0] sm:$0xff] %v1330_v4  ;;  %v1315_v7 = vadd.f32 %v2246_v5, %v802_v63  ;;  %v1331_v8 = vadd.f32 %v2294_v6, %v818_v1  ;;  %v1377_v63 = vld [vmem:[#allocation2 + $0x28] sm:$0xff] (!%p1949_p4)  ;;  %v2031_v1 = vunpack.c.l.bf16 (!%p1949_p4), %v2166_v0  ;;  %v2032_v2 = vunpack.c.h.bf16 (!%p1949_p4), %v2166_v0  ;;  %v2167_v3 = vld [vmem:[%s2935_s1 + $0x18] sm:$0xff] (!%p1949_p4)  }
 0x1b3   : > { %v1507_v4 = vadd.f32 (!%p1949_p4), %v2991_v54, %v1468_v58  ;;  %v1508_v5 = vadd.f32 (!%p1949_p4), %v2991_v54, %v1469_v59  ;;  %v1470_v6 = vadd.f32 (!%p1949_p4), %v2027_v60, %v1374_v55  ;;  %v2172_v58 = vld [vmem:[%s2935_s1 + $0x40] sm:$0xff] (!%p1949_p4)  }
 0x1b4   : > { %1347 = vst [vmem:[#allocation2 + $0x58] sm:$0xff] %v1315_v7  ;;  %1363 = vst [vmem:[#allocation2 + $0xd8] sm:$0xff] %v1331_v8  ;;  %v2247_v9 = vpop.f32.mrb[24].mxu0  ;;  %v2295_v10 = vpop.f32.mrb[24].mxu1  ;;  %v1471_v7 = vadd.f32 (!%p1949_p4), %v2028_v61, %v1375_v56  ;;  %v1378_v8 = vld [vmem:[#allocation2 + $0x30] sm:$0xff] (!%p1949_p4) }
 0x1b5   : > { %v2248_v12 = vpop.f32.mrb[25].mxu0  ;;  %v2296_v14 = vpop.f32.mrb[25].mxu1 }
 0x1b6   : > { %v2249_v15 = vadd.f32 %v2248_v12, %v2247_v9  ;;  %v2297_v16 = vadd.f32 %v2296_v14, %v2295_v10  ;;  %v2250_v17 = vpop.f32.mrb[26].mxu0  ;;  %v2298_v18 = vpop.f32.mrb[26].mxu1  ;;  %v1379_v9 = vld [vmem:[#allocation2 + $0x38] sm:$0xff] (!%p1949_p4)  ;;  %v1472_v10 = vadd.f32 (!%p1949_p4), %v2031_v1, %v1376_v62  ;;  %v2035_v12 = vunpack.c.l.bf16 (!%p1949_p4), %v2167_v3  ;;  %v2168_v14 = vld [vmem:[%s2935_s1 + $0x20] sm:$0xff] (!%p1949_p4)  }
 0x1b7   : > { %v2251_v20 = vpop.f32.mrb[27].mxu0  ;;  %v2299_v22 = vpop.f32.mrb[27].mxu1 }
 0x1b8   : > { %v1316_v23 = vadd.f32 %v2249_v15, %v803_v11  ;;  %v1332_v24 = vadd.f32 %v2297_v16, %v819_v13  ;;  %v2252_v25 = vadd.f32 %v2251_v20, %v2250_v17  ;;  %v2300_v26 = vadd.f32 %v2299_v22, %v2298_v18 }
 0x1b9   : > { %v1473_v11 = vadd.f32 (!%p1949_p4), %v2032_v2, %v1377_v63  ;;  %v2036_v13 = vunpack.c.h.bf16 (!%p1949_p4), %v2167_v3  ;;  %v1539_v15 = vmax.f32 (!%p1949_p4), %v1507_v4, 0.0  ;;  %v1540_v16 = vmax.f32 (!%p1949_p4), %v1508_v5, 0.0  ;;  %v1388_v4 = vld [vmem:[#allocation2 + $0x80] sm:$0xff] (!%p1949_p4) }
 0x1ba   : > { %1348 = vst [vmem:[#allocation2 + $0x60] sm:$0xff] %v1316_v23  ;;  %1364 = vst [vmem:[#allocation2 + $0xe0] sm:$0xff] %v1332_v24  ;;  %v1317_v27 = vadd.f32 %v2252_v25, %v804_v19  ;;  %v1333_v28 = vadd.f32 %v2300_v26, %v820_v21  ;;  %v1509_v17 = vadd.f32 (!%p1949_p4), %v2991_v54, %v1470_v6  ;;  %v1380_v23 = vld [vmem:[#allocation2 + $0x40] sm:$0xff] (!%p1949_p4)  ;;  %v2169_v24 = vld [vmem:[%s2935_s1 + $0x28] sm:$0xff] (!%p1949_p4)  }
 0x1bb   : > { %v1510_v18 = vadd.f32 (!%p1949_p4), %v2991_v54, %v1471_v7  ;;  %v1511_v19 = vadd.f32 (!%p1949_p4), %v2991_v54, %v1472_v10  ;;  %v1512_v20 = vadd.f32 (!%p1949_p4), %v2991_v54, %v1473_v11  ;;  %v1474_v21 = vadd.f32 (!%p1949_p4), %v2035_v12, %v1378_v8 }
 0x1bc   : > { %1349 = vst [vmem:[#allocation2 + $0x68] sm:$0xff] %v1317_v27  ;;  %1365 = vst [vmem:[#allocation2 + $0xe8] sm:$0xff] %v1333_v28  ;;  %v2253_v29 = vpop.f32.mrb[28].mxu0  ;;  %v2301_v30 = vpop.f32.mrb[28].mxu1  ;;  %v1475_v22 = vadd.f32 (!%p1949_p4), %v2036_v13, %v1379_v9  ;;  %v2088_v25 = vpack.c.bf16 (!%p1949_p4), %v1540_v16, %v1539_v15  ;;  %v1541_v26 = vmax.f32 (!%p1949_p4), %v1509_v17, 0.0  ;;  %v2039_v28 = vunpack.c.l.bf16 (!%p1949_p4), %v2168_v14  ;;  %v1389_v13 = vld [vmem:[#allocation2 + $0x88] sm:$0xff] (!%p1949_p4) }
 0x1bd   : > { %v2254_v32 = vpop.f32.mrb[29].mxu0  ;;  %v2302_v34 = vpop.f32.mrb[29].mxu1  ;;  %v1542_v27 = vmax.f32 (!%p1949_p4), %v1510_v18, 0.0  ;;  %v2055_v8 = vunpack.c.l.bf16 (!%p1949_p4), %v2172_v58  ;;  %v2056_v17 = vunpack.c.h.bf16 (!%p1949_p4), %v2172_v58  ;;  %v2177_v58 = vld [vmem:[%s2935_s1 + $0x68] sm:$0xff] (!%p1949_p4)  }
 0x1be   : > { %v2255_v35 = vadd.f32 %v2254_v32, %v2253_v29  ;;  %v2303_v36 = vadd.f32 %v2302_v34, %v2301_v30  ;;  %v2256_v37 = vpop.f32.mrb[30].mxu0  ;;  %v2304_v38 = vpop.f32.mrb[30].mxu1  ;;  %1371 = sbr.rel (%p1949_p4) target bundleno = 483 (0x1e3), region = 164  ;;  %v1543_v29 = vmax.f32 (!%p1949_p4), %v1511_v19, 0.0  ;;  %v1544_v30 = vmax.f32 (!%p1949_p4), %v1512_v20, 0.0  ;;  %v1382_v34 = vld [vmem:[#allocation2 + $0x50] sm:$0xff] (!%p1949_p4)  ;;  %2089 = vst [vmem:[%s2929_s14] sm:$0xff] (!%p1949_p4), %v2088_v25  }
 0x1bf   : > { %v2257_v40 = vpop.f32.mrb[31].mxu0  ;;  %v2305_v42 = vpop.f32.mrb[31].mxu1  ;;  %v1514_v32 = vadd.f32 (!%p1949_p4), %v2991_v54, %v1475_v22  ;;  %v1484_v18 = vadd.f32 (!%p1949_p4), %v2055_v8, %v1388_v4  ;;  %v2174_v19 = vld [vmem:[%s2935_s1 + $0x50] sm:$0xff] (!%p1949_p4)   ;;  %v1391_v25 = vld [vmem:[#allocation2 + $0x98] sm:$0xff] (!%p1949_p4) }
 0x1c0   : > { %v1318_v43 = vadd.f32 %v2255_v35, %v805_v31  ;;  %v1334_v44 = vadd.f32 %v2303_v36, %v821_v33  ;;  %v2258_v45 = vadd.f32 %v2257_v40, %v2256_v37  ;;  %v2306_v46 = vadd.f32 %v2305_v42, %v2304_v38  ;;  %v1381_v33 = vld [vmem:[#allocation2 + $0x48] sm:$0xff] (!%p1949_p4)  ;;  %v2170_v35 = vld [vmem:[%s2935_s1 + $0x30] sm:$0xff] (!%p1949_p4)  }
 0x1c1   : > { %v1513_v31 = vadd.f32 (!%p1949_p4), %v2991_v54, %v1474_v21  ;;  %v2093_v36 = vpack.c.bf16 (!%p1949_p4), %v1542_v27, %v1541_v26  ;;  %v2040_v37 = vunpack.c.h.bf16 (!%p1949_p4), %v2168_v14  ;;  %v1476_v38 = vadd.f32 (!%p1949_p4), %v2039_v28, %v1380_v23  ;;  %v2173_v14 = vld [vmem:[%s2935_s1 + $0x48] sm:$0xff] (!%p1949_p4)   ;;  %v1398_v4 = vld [vmem:[#allocation2 + $0xd0] sm:$0xff] (!%p1949_p4) }
 0x1c2   : > { %1350 = vst [vmem:[#allocation2 + $0x70] sm:$0xff] %v1318_v43  ;;  %1366 = vst [vmem:[#allocation2 + $0xf0] sm:$0xff] %v1334_v44  ;;  %v1319_v47 = vadd.f32 %v2258_v45, %v806_v39  ;;  %v1335_v48 = vadd.f32 %v2306_v46, %v822_v41  ;;  %v1383_v39 = vld [vmem:[#allocation2 + $0x58] sm:$0xff] (!%p1949_p4)  ;;  %v2043_v40 = vunpack.c.l.bf16 (!%p1949_p4), %v2169_v24  ;;  %v2098_v42 = vpack.c.bf16 (!%p1949_p4), %v1544_v30, %v1543_v29  ;;  %v1384_v46 = vld [vmem:[#allocation2 + $0x60] sm:$0xff] (!%p1949_p4) }
 0x1c3   : > { %v2171_v41 = vld [vmem:[%s2935_s1 + $0x38] sm:$0xff] (!%p1949_p4)   ;;  %v1545_v43 = vmax.f32 (!%p1949_p4), %v1513_v31, 0.0  ;;  %v1546_v44 = vmax.f32 (!%p1949_p4), %v1514_v32, 0.0  ;;  %v2044_v45 = vunpack.c.h.bf16 (!%p1949_p4), %v2169_v24  ;;  %2180 = vst [vmem:[%s2929_s14 + $0x8] sm:$0xff] (!%p1949_p4), %v2093_v36   ;;  %v1385_v50 = vld [vmem:[#allocation2 + $0x68] sm:$0xff] (!%p1949_p4)  ;;  %v2047_v51 = vunpack.c.l.bf16 (!%p1949_p4), %v2170_v35  ;;  %v1390_v24 = vld [vmem:[#allocation2 + $0x90] sm:$0xff] (!%p1949_p4) }
 0x1c4   : > { %1351 = vst [vmem:[#allocation2 + $0x78] sm:$0xff] %v1319_v47  ;;  %1367 = vst [vmem:[#allocation2 + $0xf8] sm:$0xff] %v1335_v48  ;;  %v1477_v47 = vadd.f32 (!%p1949_p4), %v2040_v37, %v1381_v33  ;;  %v1515_v48 = vadd.f32 (!%p1949_p4), %v2991_v54, %v1476_v38  ;;  %v1478_v49 = vadd.f32 (!%p1949_p4), %v2043_v40, %v1382_v34  ;;  %v2048_v56 = vunpack.c.h.bf16 (!%p1949_p4), %v2170_v35  ;;  %v1392_v30 = vld [vmem:[#allocation2 + $0xa0] sm:$0xff] (!%p1949_p4)  ;;  %v1393_v31 = vld [vmem:[#allocation2 + $0xa8] sm:$0xff] (!%p1949_p4) }
 0x1c5   : > { %2181 = vst [vmem:[%s2929_s14 + $0x10] sm:$0xff] %v2098_v42   ;;  %v2103_v53 = vpack.c.bf16 %v1546_v44, %v1545_v43  ;;  %v1479_v55 = vadd.f32 %v2044_v45, %v1383_v39  ;;  %v2051_v57 = vunpack.c.l.bf16 %v2171_v41  ;;  %v1480_v62 = vadd.f32 %v2047_v51, %v1384_v46  ;;  %v2175_v32 = vld [vmem:[%s2935_s1 + $0x58] sm:$0xff]   ;;  %v2176_v42 = vld [vmem:[%s2935_s1 + $0x60] sm:$0xff]  }
 0x1c6   : > { %v1516_v59 = vadd.f32 %v2991_v54, %v1477_v47  ;;  %v1547_v60 = vmax.f32 %v1515_v48, 0.0  ;;  %v1517_v61 = vadd.f32 %v2991_v54, %v1478_v49  ;;  %v1481_v1 = vadd.f32 %v2048_v56, %v1385_v50  ;;  %v1395_v46 = vld [vmem:[#allocation2 + $0xb8] sm:$0xff]  ;;  %v1396_v56 = vld [vmem:[#allocation2 + $0xc0] sm:$0xff] }
 0x1c7   : > { %2182 = vst [vmem:[%s2929_s14 + $0x18] sm:$0xff] %v2103_v53   ;;  %v1518_v0 = vadd.f32 %v2991_v54, %v1479_v55  ;;  %v2052_v2 = vunpack.c.h.bf16 %v2171_v41  ;;  %v1519_v7 = vadd.f32 %v2991_v54, %v1480_v62  ;;  %v1485_v26 = vadd.f32 %v2056_v17, %v1389_v13  ;;  %v1394_v41 = vld [vmem:[#allocation2 + $0xb0] sm:$0xff] }
 0x1c8   : > { %v1548_v5 = vmax.f32 %v1516_v59, 0.0  ;;  %v1549_v6 = vmax.f32 %v1517_v61, 0.0  ;;  %v1520_v10 = vadd.f32 %v2991_v54, %v1481_v1  ;;  %v1523_v27 = vadd.f32 %v2991_v54, %v1484_v18 }
 0x1c9   : > { %v1386_v52 = vld [vmem:[#allocation2 + $0x70] sm:$0xff]  ;;  %v1550_v9 = vmax.f32 %v1518_v0, 0.0  ;;  %v1551_v16 = vmax.f32 %v1519_v7, 0.0  ;;  %v2059_v28 = vunpack.c.l.bf16 %v2173_v14  ;;  %v2060_v29 = vunpack.c.h.bf16 %v2173_v14 }
 0x1ca   : > { %v1482_v3 = vadd.f32 %v2051_v57, %v1386_v52  ;;  %v2108_v15 = vpack.c.bf16 %v1548_v5, %v1547_v60  ;;  %v1552_v21 = vmax.f32 %v1520_v10, 0.0  ;;  %v2063_v35 = vunpack.c.l.bf16 %v2174_v19  ;;  %v2178_v5 = vld [vmem:[%s2935_s1 + $0x70] sm:$0xff]  }
 0x1cb   : > { %v1387_v63 = vld [vmem:[#allocation2 + $0x78] sm:$0xff]  ;;  %v2113_v20 = vpack.c.bf16 %v1550_v9, %v1549_v6  ;;  %v2064_v36 = vunpack.c.h.bf16 %v2174_v19  ;;  %v1524_v37 = vadd.f32 %v2991_v54, %v1485_v26  ;;  %v1555_v38 = vmax.f32 %v1523_v27, 0.0 }
 0x1cc   : > { %v1483_v11 = vadd.f32 %v2052_v2, %v1387_v63  ;;  %v1521_v12 = vadd.f32 %v2991_v54, %v1482_v3  ;;  %2183 = vst [vmem:[%s2929_s14 + $0x20] sm:$0xff] %v2108_v15   ;;  %v2118_v33 = vpack.c.bf16 %v1552_v21, %v1551_v16  ;;  %v1486_v39 = vadd.f32 %v2059_v28, %v1390_v24  ;;  %v1397_v63 = vld [vmem:[#allocation2 + $0xc8] sm:$0xff]  ;;  %v1399_v9 = vld [vmem:[#allocation2 + $0xd8] sm:$0xff]  ;;  %v1400_v16 = vld [vmem:[#allocation2 + $0xe0] sm:$0xff] }
 0x1cd   : > { %2184 = vst [vmem:[%s2929_s14 + $0x28] sm:$0xff] %v2113_v20   ;;  %v1487_v40 = vadd.f32 %v2060_v29, %v1391_v25  ;;  %v1488_v44 = vadd.f32 %v2063_v35, %v1392_v30  ;;  %v1489_v45 = vadd.f32 %v2064_v36, %v1393_v31  ;;  %v2067_v47 = vunpack.c.l.bf16 %v2175_v32  ;;  %v1401_v20 = vld [vmem:[#allocation2 + $0xe8] sm:$0xff]  ;;  %v1402_v25 = vld [vmem:[#allocation2 + $0xf0] sm:$0xff]  ;;  %v1403_v31 = vld [vmem:[#allocation2 + $0xf8] sm:$0xff] }
 0x1ce   : > { %v1522_v22 = vadd.f32 %v2991_v54, %v1483_v11  ;;  %v1553_v23 = vmax.f32 %v1521_v12, 0.0  ;;  %2185 = vst [vmem:[%s2929_s14 + $0x30] sm:$0xff] %v2118_v33   ;;  %v1556_v48 = vmax.f32 %v1524_v37, 0.0  ;;  %v1525_v49 = vadd.f32 %v2991_v54, %v1486_v39  ;;  %v2179_v11 = vld [vmem:[%s2935_s1 + $0x78] sm:$0xff]  }
 0x1cf   : > { %v1526_v50 = vadd.f32 %v2991_v54, %v1487_v40  ;;  %v2068_v51 = vunpack.c.h.bf16 %v2175_v32  ;;  %v1527_v52 = vadd.f32 %v2991_v54, %v1488_v44  ;;  %v1528_v53 = vadd.f32 %v2991_v54, %v1489_v45 }
 0x1d0   : > { %v1554_v34 = vmax.f32 %v1522_v22, 0.0  ;;  %v1490_v55 = vadd.f32 %v2067_v47, %v1394_v41  ;;  %v2071_v57 = vunpack.c.l.bf16 %v2176_v42  ;;  %v2128_v59 = vpack.c.bf16 %v1556_v48, %v1555_v38 }
 0x1d1   : > { %v1557_v60 = vmax.f32 %v1525_v49, 0.0  ;;  %v1558_v61 = vmax.f32 %v1526_v50, 0.0  ;;  %v1491_v62 = vadd.f32 %v2068_v51, %v1395_v46  ;;  %v1559_v0 = vmax.f32 %v1527_v52, 0.0 }
 0x1d2   : > { %v2123_v43 = vpack.c.bf16 %v1554_v34, %v1553_v23  ;;  %v1560_v1 = vmax.f32 %v1528_v53, 0.0  ;;  %v1529_v2 = vadd.f32 %v2991_v54, %v1490_v55  ;;  %v2072_v3 = vunpack.c.h.bf16 %v2176_v42  ;;  %2187 = vst [vmem:[%s2929_s14 + $0x40] sm:$0xff] %v2128_v59  }
 0x1d3   : > { %v2133_v6 = vpack.c.bf16 %v1558_v61, %v1557_v60  ;;  %v1530_v7 = vadd.f32 %v2991_v54, %v1491_v62  ;;  %v1492_v8 = vadd.f32 %v2071_v57, %v1396_v56  ;;  %v2075_v10 = vunpack.c.l.bf16 %v2177_v58 }
 0x1d4   : > { %2186 = vst [vmem:[%s2929_s14 + $0x38] sm:$0xff] %v2123_v43   ;;  %v2138_v12 = vpack.c.bf16 %v1560_v1, %v1559_v0  ;;  %v1561_v13 = vmax.f32 %v1529_v2, 0.0  ;;  %v1493_v14 = vadd.f32 %v2072_v3, %v1397_v63  ;;  %v2076_v15 = vunpack.c.h.bf16 %v2177_v58 }
 0x1d5   : > { %2188 = vst [vmem:[%s2929_s14 + $0x48] sm:$0xff] %v2133_v6   ;;  %v1562_v17 = vmax.f32 %v1530_v7, 0.0  ;;  %v1531_v18 = vadd.f32 %v2991_v54, %v1492_v8  ;;  %v1494_v19 = vadd.f32 %v2075_v10, %v1398_v4  ;;  %v2079_v21 = vunpack.c.l.bf16 %v2178_v5 }
 0x1d6   : > { %2189 = vst [vmem:[%s2929_s14 + $0x50] sm:$0xff] %v2138_v12   ;;  %v1532_v22 = vadd.f32 %v2991_v54, %v1493_v14  ;;  %v1495_v23 = vadd.f32 %v2076_v15, %v1399_v9  ;;  %v2080_v24 = vunpack.c.h.bf16 %v2178_v5  ;;  %v2083_v26 = vunpack.c.l.bf16 %v2179_v11 }
 0x1d7   : > { %v2143_v27 = vpack.c.bf16 %v1562_v17, %v1561_v13  ;;  %v1563_v28 = vmax.f32 %v1531_v18, 0.0  ;;  %v1533_v29 = vadd.f32 %v2991_v54, %v1494_v19  ;;  %v1496_v30 = vadd.f32 %v2079_v21, %v1400_v16 }
 0x1d8   : > { %v1564_v32 = vmax.f32 %v1532_v22, 0.0  ;;  %v1534_v33 = vadd.f32 %v2991_v54, %v1495_v23  ;;  %v1497_v34 = vadd.f32 %v2080_v24, %v1401_v20  ;;  %v2084_v35 = vunpack.c.h.bf16 %v2179_v11 }
 0x1d9   : > { %2190 = vst [vmem:[%s2929_s14 + $0x58] sm:$0xff] %v2143_v27   ;;  %v1565_v36 = vmax.f32 %v1533_v29, 0.0  ;;  %v1535_v37 = vadd.f32 %v2991_v54, %v1496_v30  ;;  %v1498_v38 = vadd.f32 %v2083_v26, %v1402_v25 }
 0x1da   : > { %v2148_v39 = vpack.c.bf16 %v1564_v32, %v1563_v28  ;;  %v1566_v40 = vmax.f32 %v1534_v33, 0.0  ;;  %v1536_v41 = vadd.f32 %v2991_v54, %v1497_v34  ;;  %v1499_v42 = vadd.f32 %v2084_v35, %v1403_v31 }
 0x1db   : > { %v1567_v43 = vmax.f32 %v1535_v37, 0.0  ;;  %v1537_v44 = vadd.f32 %v2991_v54, %v1498_v38 }
 0x1dc   : > { %2191 = vst [vmem:[%s2929_s14 + $0x60] sm:$0xff] %v2148_v39   ;;  %v2153_v45 = vpack.c.bf16 %v1566_v40, %v1565_v36  ;;  %v1568_v46 = vmax.f32 %v1536_v41, 0.0  ;;  %v1538_v47 = vadd.f32 %v2991_v54, %v1499_v42 }
 0x1dd   : > { %v1569_v48 = vmax.f32 %v1537_v44, 0.0 }
 0x1de   : > { %2192 = vst [vmem:[%s2929_s14 + $0x68] sm:$0xff] %v2153_v45   ;;  %v2158_v49 = vpack.c.bf16 %v1568_v46, %v1567_v43  ;;  %v1570_v50 = vmax.f32 %v1538_v47, 0.0 }
 0x1e0   : > { %2193 = vst [vmem:[%s2929_s14 + $0x70] sm:$0xff] %v2158_v49   ;;  %v2163_v51 = vpack.c.bf16 %v1570_v50, %v1569_v48 }
 0x1e2   : > { %2194 = vst [vmem:[%s2929_s14 + $0x78] sm:$0xff] %v2163_v51  }
 0x1e3 PF: > { %s14_s25 = sadd.s32 1, %s2562_s25   ;;  %s3105_s1 = sld [smem:[#allocation6_spill]] }
 0x1e4   : > { %p11_p5 = scmp.ge.s32.totalorder %s14_s25, 6   ;;  %s3106_s29 = sld [smem:[#allocation7_spill]] }
 0x1e5   : > { %s3107_s15 = smov %s2526_s16  ;;  %s3108_s16 = smov %s2680_s11 }
 0x1e6   : > { %s3109_s17 = smov %s2534_s18  ;;  %s3110_s18 = smov %s2668_s6 }
 0x1e7   : > { %s3111_s19 = smov %s2542_s20  ;;  %s3112_s20 = smov %s2683_s12 }
 0x1e8   : > { %s3113_s21 = smov %s2554_s23  ;;  %s3114_s22 = smov %s2558_s24 }
 0x1e9   : > { %s3115_s23 = smov %s3105_s1  ;;  %13 = sbr.rel (!%p11_p5) target bundleno = 9 (0x9), region = 215 }
 0x1ea   : > { %s3116_s24 = smov %s3106_s29 }

// kernel: net_forward.9
= control target key start
LH: loop header
LB: loop body
LE: loop exit
PB: predicated region body
PF: predicated region fallthrough
CT: control target
= control target key end

     0   :  { %s1542_s9 = smov 0   ;;  %s1544_s10 = smov 0   ;;  %s1695_s0 = inlined_call_operand.vmem [shape: bf16[512,128], index: 0, kind: input, shape index: {}]   ;;  %s1696_s1 = inlined_call_operand.vmem [shape: bf16[128,256], index: 1, kind: input, shape index: {}]   ;;  %s1697_s2 = inlined_call_operand.vmem [shape: bf16[512,256], index: 2, kind: output, shape index: {}]  }
   0x1   :  { %s1546_s11 = smov 0  }
   0x2 LB: > { %s31_s12 = sadd.s32 1, %s1520_s10  ;;  %p1316_p0 = scmp.ge.s32.totalorder %s1524_s11, 1  ;;  %s1524_s11 = sphi %s1546_s11, %s12_s11   ;;  %s1520_s10 = sphi %s1544_s10, %s1699_s10   ;;  %s1516_s9 = sphi %s1542_s9, %s1698_s9  }
   0x3   : > { %p33_p1 = scmp.ge.s32.totalorder %s31_s12, 2  ;;  %p158_p2 = scmp.lt.s32.totalorder %s1524_s11, 3 }
   0x5   : > { %s1701_s12 = smov (%p33_p1, %s31_s12), 0  ;;  %p159_p3 = pnand %p1316_p0, %p158_p2 }
   0x6   : > { %v1462_v0 = vld [vmem:[%s1696_s1 + $0x4] ss:$8 sps:$4 sm:$0xff] (!%p159_p3)   ;;  %s1317_s15 = sshll.u32 (!%p159_p3), %s1516_s9, 5  ;;  %v1464_v1 = vld [vmem:[%s1696_s1] ss:$8 sps:$4 sm:$0xff] (!%p159_p3)   ;;  %v1526_v2 = vmov (!%p159_p3), 0  }
   0x7   : > { %162 = sbr.rel (%p159_p3) target bundleno = 314 (0x13a), region = 28  ;;  %620 = vmatprep.mubr.bf16.mxu0 (!%p159_p3), %v1526_v2  ;;  %700 = vmatprep.mubr.bf16.mxu1 (!%p159_p3), %v1526_v2  ;;  %p199_p4 = scmp.lt.s32.totalorder (!%p159_p3), %s1317_s15, 63  ;;  %v1465_v3 = vld [vmem:[%s1696_s1 + $0x14] ss:$8 sps:$4 sm:$0xff] (!%p159_p3)   ;;  %v1467_v4 = vld [vmem:[%s1696_s1 + $0x10] ss:$8 sps:$4 sm:$0xff] (!%p159_p3)  }
   0x8   : > { %588 = vmatprep.subr.bf16.mxu0 (!%p159_p3), %v1462_v0  ;;  %1421 = vmatprep.subr.bf16.mxu1 (!%p159_p3), %v1462_v0  ;;  %v1468_v5 = vld [vmem:[%s1696_s1 + $0x24] ss:$8 sps:$4 sm:$0xff] (!%p159_p3)   ;;  %v1470_v6 = vld [vmem:[%s1696_s1 + $0x20] ss:$8 sps:$4 sm:$0xff] (!%p159_p3)   ;;  %v1471_v7 = vld [vmem:[%s1696_s1 + $0x34] ss:$8 sps:$4 sm:$0xff] (!%p159_p3)  }
   0x9   : > { %589 = vmatpush1.bf16.msra.mxu0 (!%p159_p3), %v1464_v1  ;;  %1429 = vmatpush1.bf16.msra.mxu1 (!%p159_p3), %v1464_v1  ;;  %v1473_v8 = vld [vmem:[%s1696_s1 + $0x30] ss:$8 sps:$4 sm:$0xff] (!%p159_p3)   ;;  %v1474_v9 = vld [vmem:[%s1696_s1 + $0x44] ss:$8 sps:$4 sm:$0xff] (!%p159_p3)   ;;  %v1476_v10 = vld [vmem:[%s1696_s1 + $0x40] ss:$8 sps:$4 sm:$0xff] (!%p159_p3)  }
   0xa   : > { %590 = vmatprep.subr.bf16.mxu0 (!%p159_p3), %v1465_v3  ;;  %1422 = vmatprep.subr.bf16.mxu1 (!%p159_p3), %v1465_v3  ;;  %v1477_v11 = vld [vmem:[%s1696_s1 + $0x54] ss:$8 sps:$4 sm:$0xff] (!%p159_p3)   ;;  %v1479_v12 = vld [vmem:[%s1696_s1 + $0x50] ss:$8 sps:$4 sm:$0xff] (!%p159_p3)   ;;  %v1480_v13 = vld [vmem:[%s1696_s1 + $0x64] ss:$8 sps:$4 sm:$0xff] (!%p159_p3)  }
   0xb   : > { %v1482_v14 = vld [vmem:[%s1696_s1 + $0x60] ss:$8 sps:$4 sm:$0xff] (!%p159_p3)   ;;  %v1483_v15 = vld [vmem:[%s1696_s1 + $0x74] ss:$8 sps:$4 sm:$0xff] (!%p159_p3)   ;;  %v1485_v16 = vld [vmem:[%s1696_s1 + $0x70] ss:$8 sps:$4 sm:$0xff] (!%p159_p3)  }
   0xd   : > { %591 = vmatpush1.bf16.msra.mxu0 (!%p159_p3), %v1467_v4  ;;  %1430 = vmatpush1.bf16.msra.mxu1 (!%p159_p3), %v1467_v4 }
   0xe   : > { %s1703_s15 = smov (!%p199_p4, %s1317_s15), 63  ;;  %592 = vmatprep.subr.bf16.mxu0 %v1468_v5  ;;  %1423 = vmatprep.subr.bf16.mxu1 %v1468_v5 }
   0xf   : > { %s1318_s24 = sshll.u32 %s1703_s15, 2  ;;  %s1388_s26 = sshll.u32 %s1703_s15, 3 }
  0x10   : > { %s1589_s3 = scalar_lea.vmem %s1695_s0, %s1318_s24  ;;  %s1652_s29 = scalar_lea.vmem %s1697_s2, %s1388_s26 }
  0x11   : > { %593 = vmatpush1.bf16.msra.mxu0 %v1470_v6  ;;  %1431 = vmatpush1.bf16.msra.mxu1 %v1470_v6  ;;  %v1486_v17 = vld [vmem:[%s1589_s3] sm:$0xff]   ;;  %v1488_v19 = vld [vmem:[%s1589_s3 + $0x8] sm:$0xff]   ;;  %v1490_v21 = vld [vmem:[%s1589_s3 + $0x10] sm:$0xff]  }
  0x12   : > { %594 = vmatprep.subr.bf16.mxu0 %v1471_v7  ;;  %1424 = vmatprep.subr.bf16.mxu1 %v1471_v7  ;;  %v1487_v18 = vld [vmem:[%s1589_s3 + $0x40] sm:$0xff]   ;;  %v1489_v20 = vld [vmem:[%s1589_s3 + $0x48] sm:$0xff]   ;;  %v1491_v22 = vld [vmem:[%s1589_s3 + $0x50] sm:$0xff]  }
  0x13   : > { %v1492_v23 = vld [vmem:[%s1589_s3 + $0x18] sm:$0xff]   ;;  %v1494_v25 = vld [vmem:[%s1589_s3 + $0x20] sm:$0xff]   ;;  %v1496_v27 = vld [vmem:[%s1589_s3 + $0x28] sm:$0xff]  }
  0x14   : > { %v1493_v24 = vld [vmem:[%s1589_s3 + $0x58] sm:$0xff]   ;;  %v1495_v26 = vld [vmem:[%s1589_s3 + $0x60] sm:$0xff]   ;;  %v1497_v28 = vld [vmem:[%s1589_s3 + $0x68] sm:$0xff]  }
  0x15   : > { %595 = vmatpush1.bf16.msra.mxu0 %v1473_v8  ;;  %1432 = vmatpush1.bf16.msra.mxu1 %v1473_v8  ;;  %v1498_v29 = vld [vmem:[%s1589_s3 + $0x30] sm:$0xff]   ;;  %v1500_v31 = vld [vmem:[%s1589_s3 + $0x38] sm:$0xff]  }
  0x16   : > { %596 = vmatprep.subr.bf16.mxu0 %v1474_v9  ;;  %1425 = vmatprep.subr.bf16.mxu1 %v1474_v9  ;;  %v1499_v30 = vld [vmem:[%s1589_s3 + $0x70] sm:$0xff]   ;;  %v1501_v32 = vld [vmem:[%s1589_s3 + $0x78] sm:$0xff]  }
  0x19   : > { %597 = vmatpush1.bf16.msra.mxu0 %v1476_v10  ;;  %1433 = vmatpush1.bf16.msra.mxu1 %v1476_v10 }
  0x1a   : > { %598 = vmatprep.subr.bf16.mxu0 %v1477_v11  ;;  %1426 = vmatprep.subr.bf16.mxu1 %v1477_v11 }
  0x1d   : > { %599 = vmatpush1.bf16.msra.mxu0 %v1479_v12  ;;  %1434 = vmatpush1.bf16.msra.mxu1 %v1479_v12 }
  0x1e   : > { %600 = vmatprep.subr.bf16.mxu0 %v1480_v13  ;;  %1427 = vmatprep.subr.bf16.mxu1 %v1480_v13 }
  0x21   : > { %601 = vmatpush1.bf16.msra.mxu0 %v1482_v14  ;;  %1435 = vmatpush1.bf16.msra.mxu1 %v1482_v14 }
  0x22   : > { %602 = vmatprep.subr.bf16.mxu0 %v1483_v15  ;;  %1428 = vmatprep.subr.bf16.mxu1 %v1483_v15 }
  0x25   : > { %603 = vmatpush1.bf16.msra.mxu0 %v1485_v16  ;;  %1436 = vmatpush1.bf16.msra.mxu1 %v1485_v16 }
  0x28   : > { %621 = vmatmul.mubr.bf16.vlgmr.msra.gmra.mrb[0].mxu0 %v1486_v17  ;;  %701 = vmatmul.mubr.bf16.vlgmr.msra.gmra.mrb[0].mxu1 %v1487_v18 }
  0x29   : > { %630 = vmatprep.mubr.bf16.mxu0 %v1526_v2  ;;  %710 = vmatprep.mubr.bf16.mxu1 %v1526_v2 }
  0x30   : > { %631 = vmatmul.mubr.bf16.gmra.mrb[4].mxu0 %v1488_v19  ;;  %711 = vmatmul.mubr.bf16.gmra.mrb[4].mxu1 %v1489_v20 }
  0x31   : > { %640 = vmatprep.mubr.bf16.mxu0 %v1526_v2  ;;  %720 = vmatprep.mubr.bf16.mxu1 %v1526_v2 }
  0x38   : > { %641 = vmatmul.mubr.bf16.gmra.mrb[8].mxu0 %v1490_v21  ;;  %721 = vmatmul.mubr.bf16.gmra.mrb[8].mxu1 %v1491_v22 }
  0x39   : > { %650 = vmatprep.mubr.bf16.mxu0 %v1526_v2  ;;  %730 = vmatprep.mubr.bf16.mxu1 %v1526_v2 }
  0x40   : > { %651 = vmatmul.mubr.bf16.gmra.mrb[12].mxu0 %v1492_v23  ;;  %731 = vmatmul.mubr.bf16.gmra.mrb[12].mxu1 %v1493_v24 }
  0x41   : > { %660 = vmatprep.mubr.bf16.mxu0 %v1526_v2  ;;  %740 = vmatprep.mubr.bf16.mxu1 %v1526_v2 }
  0x48   : > { %661 = vmatmul.mubr.bf16.gmra.mrb[16].mxu0 %v1494_v25  ;;  %741 = vmatmul.mubr.bf16.gmra.mrb[16].mxu1 %v1495_v26 }
  0x49   : > { %670 = vmatprep.mubr.bf16.mxu0 %v1526_v2  ;;  %750 = vmatprep.mubr.bf16.mxu1 %v1526_v2 }
  0x50   : > { %671 = vmatmul.mubr.bf16.gmra.mrb[20].mxu0 %v1496_v27  ;;  %751 = vmatmul.mubr.bf16.gmra.mrb[20].mxu1 %v1497_v28 }
  0x51   : > { %680 = vmatprep.mubr.bf16.mxu0 %v1526_v2  ;;  %760 = vmatprep.mubr.bf16.mxu1 %v1526_v2 }
  0x58   : > { %681 = vmatmul.mubr.bf16.gmra.mrb[24].mxu0 %v1498_v29  ;;  %761 = vmatmul.mubr.bf16.gmra.mrb[24].mxu1 %v1499_v30 }
  0x59   : > { %690 = vmatprep.mubr.bf16.mxu0 %v1526_v2  ;;  %770 = vmatprep.mubr.bf16.mxu1 %v1526_v2 }
  0x60   : > { %691 = vmatmul.mubr.bf16.gmra.mrb[28].mxu0 %v1500_v31  ;;  %771 = vmatmul.mubr.bf16.gmra.mrb[28].mxu1 %v1501_v32 }
  0xfb   : > { %v622_v33 = vpop.f32.mrb[0].mxu0  ;;  %v702_v34 = vpop.f32.mrb[0].mxu1 }
  0xfc   : > { %v624_v35 = vpop.f32.mrb[1].mxu0  ;;  %v704_v36 = vpop.f32.mrb[1].mxu1 }
  0xfd   : > { %v1389_v37 = vpack.c.bf16 %v624_v35, %v622_v33  ;;  %v1405_v38 = vpack.c.bf16 %v704_v36, %v702_v34  ;;  %v626_v39 = vpop.f32.mrb[2].mxu0  ;;  %v706_v40 = vpop.f32.mrb[2].mxu1 }
  0xfe   : > { %v628_v41 = vpop.f32.mrb[3].mxu0  ;;  %v708_v42 = vpop.f32.mrb[3].mxu1 }
  0xff   : > { %1168 = vst [vmem:[%s1652_s29] sm:$0xff] %v1389_v37  ;;  %1184 = vst [vmem:[%s1652_s29 + $0x80] sm:$0xff] %v1405_v38  ;;  %v1390_v43 = vpack.c.bf16 %v628_v41, %v626_v39  ;;  %v1406_v44 = vpack.c.bf16 %v708_v42, %v706_v40 }
 0x101   : > { %1169 = vst [vmem:[%s1652_s29 + $0x8] sm:$0xff] %v1390_v43  ;;  %1185 = vst [vmem:[%s1652_s29 + $0x88] sm:$0xff] %v1406_v44 }
 0x103   : > { %v632_v45 = vpop.f32.mrb[4].mxu0  ;;  %v712_v46 = vpop.f32.mrb[4].mxu1 }
 0x104   : > { %v634_v47 = vpop.f32.mrb[5].mxu0  ;;  %v714_v48 = vpop.f32.mrb[5].mxu1 }
 0x105   : > { %v1391_v49 = vpack.c.bf16 %v634_v47, %v632_v45  ;;  %v1407_v50 = vpack.c.bf16 %v714_v48, %v712_v46  ;;  %v636_v51 = vpop.f32.mrb[6].mxu0  ;;  %v716_v52 = vpop.f32.mrb[6].mxu1 }
 0x106   : > { %v638_v53 = vpop.f32.mrb[7].mxu0  ;;  %v718_v54 = vpop.f32.mrb[7].mxu1 }
 0x107   : > { %1170 = vst [vmem:[%s1652_s29 + $0x10] sm:$0xff] %v1391_v49  ;;  %1186 = vst [vmem:[%s1652_s29 + $0x90] sm:$0xff] %v1407_v50  ;;  %v1392_v55 = vpack.c.bf16 %v638_v53, %v636_v51  ;;  %v1408_v56 = vpack.c.bf16 %v718_v54, %v716_v52 }
 0x109   : > { %1171 = vst [vmem:[%s1652_s29 + $0x18] sm:$0xff] %v1392_v55  ;;  %1187 = vst [vmem:[%s1652_s29 + $0x98] sm:$0xff] %v1408_v56 }
 0x10b   : > { %v642_v57 = vpop.f32.mrb[8].mxu0  ;;  %v722_v58 = vpop.f32.mrb[8].mxu1 }
 0x10c   : > { %v644_v59 = vpop.f32.mrb[9].mxu0  ;;  %v724_v60 = vpop.f32.mrb[9].mxu1 }
 0x10d   : > { %v1393_v61 = vpack.c.bf16 %v644_v59, %v642_v57  ;;  %v1409_v62 = vpack.c.bf16 %v724_v60, %v722_v58  ;;  %v646_v63 = vpop.f32.mrb[10].mxu0  ;;  %v726_v0 = vpop.f32.mrb[10].mxu1 }
 0x10e   : > { %v648_v1 = vpop.f32.mrb[11].mxu0  ;;  %v728_v2 = vpop.f32.mrb[11].mxu1 }
 0x10f   : > { %1172 = vst [vmem:[%s1652_s29 + $0x20] sm:$0xff] %v1393_v61  ;;  %1188 = vst [vmem:[%s1652_s29 + $0xa0] sm:$0xff] %v1409_v62  ;;  %v1394_v3 = vpack.c.bf16 %v648_v1, %v646_v63  ;;  %v1410_v4 = vpack.c.bf16 %v728_v2, %v726_v0 }
 0x111   : > { %1173 = vst [vmem:[%s1652_s29 + $0x28] sm:$0xff] %v1394_v3  ;;  %1189 = vst [vmem:[%s1652_s29 + $0xa8] sm:$0xff] %v1410_v4 }
 0x113   : > { %v652_v5 = vpop.f32.mrb[12].mxu0  ;;  %v732_v6 = vpop.f32.mrb[12].mxu1 }
 0x114   : > { %v654_v7 = vpop.f32.mrb[13].mxu0  ;;  %v734_v8 = vpop.f32.mrb[13].mxu1 }
 0x115   : > { %v1395_v9 = vpack.c.bf16 %v654_v7, %v652_v5  ;;  %v1411_v10 = vpack.c.bf16 %v734_v8, %v732_v6  ;;  %v656_v11 = vpop.f32.mrb[14].mxu0  ;;  %v736_v12 = vpop.f32.mrb[14].mxu1 }
 0x116   : > { %v658_v13 = vpop.f32.mrb[15].mxu0  ;;  %v738_v14 = vpop.f32.mrb[15].mxu1 }
 0x117   : > { %1174 = vst [vmem:[%s1652_s29 + $0x30] sm:$0xff] %v1395_v9  ;;  %1190 = vst [vmem:[%s1652_s29 + $0xb0] sm:$0xff] %v1411_v10  ;;  %v1396_v15 = vpack.c.bf16 %v658_v13, %v656_v11  ;;  %v1412_v16 = vpack.c.bf16 %v738_v14, %v736_v12 }
 0x119   : > { %1175 = vst [vmem:[%s1652_s29 + $0x38] sm:$0xff] %v1396_v15  ;;  %1191 = vst [vmem:[%s1652_s29 + $0xb8] sm:$0xff] %v1412_v16 }
 0x11b   : > { %v662_v17 = vpop.f32.mrb[16].mxu0  ;;  %v742_v18 = vpop.f32.mrb[16].mxu1 }
 0x11c   : > { %v664_v19 = vpop.f32.mrb[17].mxu0  ;;  %v744_v20 = vpop.f32.mrb[17].mxu1 }
 0x11d   : > { %v1397_v21 = vpack.c.bf16 %v664_v19, %v662_v17  ;;  %v1413_v22 = vpack.c.bf16 %v744_v20, %v742_v18  ;;  %v666_v23 = vpop.f32.mrb[18].mxu0  ;;  %v746_v24 = vpop.f32.mrb[18].mxu1 }
 0x11e   : > { %v668_v25 = vpop.f32.mrb[19].mxu0  ;;  %v748_v26 = vpop.f32.mrb[19].mxu1 }
 0x11f   : > { %1176 = vst [vmem:[%s1652_s29 + $0x40] sm:$0xff] %v1397_v21  ;;  %1192 = vst [vmem:[%s1652_s29 + $0xc0] sm:$0xff] %v1413_v22  ;;  %v1398_v27 = vpack.c.bf16 %v668_v25, %v666_v23  ;;  %v1414_v28 = vpack.c.bf16 %v748_v26, %v746_v24 }
 0x121   : > { %1177 = vst [vmem:[%s1652_s29 + $0x48] sm:$0xff] %v1398_v27  ;;  %1193 = vst [vmem:[%s1652_s29 + $0xc8] sm:$0xff] %v1414_v28 }
 0x123   : > { %v672_v29 = vpop.f32.mrb[20].mxu0  ;;  %v752_v30 = vpop.f32.mrb[20].mxu1 }
 0x124   : > { %v674_v31 = vpop.f32.mrb[21].mxu0  ;;  %v754_v32 = vpop.f32.mrb[21].mxu1 }
 0x125   : > { %v1399_v33 = vpack.c.bf16 %v674_v31, %v672_v29  ;;  %v1415_v34 = vpack.c.bf16 %v754_v32, %v752_v30  ;;  %v676_v35 = vpop.f32.mrb[22].mxu0  ;;  %v756_v36 = vpop.f32.mrb[22].mxu1 }
 0x126   : > { %v678_v37 = vpop.f32.mrb[23].mxu0  ;;  %v758_v38 = vpop.f32.mrb[23].mxu1 }
 0x127   : > { %1178 = vst [vmem:[%s1652_s29 + $0x50] sm:$0xff] %v1399_v33  ;;  %1194 = vst [vmem:[%s1652_s29 + $0xd0] sm:$0xff] %v1415_v34  ;;  %v1400_v39 = vpack.c.bf16 %v678_v37, %v676_v35  ;;  %v1416_v40 = vpack.c.bf16 %v758_v38, %v756_v36 }
 0x129   : > { %1179 = vst [vmem:[%s1652_s29 + $0x58] sm:$0xff] %v1400_v39  ;;  %1195 = vst [vmem:[%s1652_s29 + $0xd8] sm:$0xff] %v1416_v40 }
 0x12b   : > { %v682_v41 = vpop.f32.mrb[24].mxu0  ;;  %v762_v42 = vpop.f32.mrb[24].mxu1 }
 0x12c   : > { %v684_v43 = vpop.f32.mrb[25].mxu0  ;;  %v764_v44 = vpop.f32.mrb[25].mxu1 }
 0x12d   : > { %v1401_v45 = vpack.c.bf16 %v684_v43, %v682_v41  ;;  %v1417_v46 = vpack.c.bf16 %v764_v44, %v762_v42  ;;  %v686_v47 = vpop.f32.mrb[26].mxu0  ;;  %v766_v48 = vpop.f32.mrb[26].mxu1 }
 0x12e   : > { %v688_v49 = vpop.f32.mrb[27].mxu0  ;;  %v768_v50 = vpop.f32.mrb[27].mxu1 }
 0x12f   : > { %1180 = vst [vmem:[%s1652_s29 + $0x60] sm:$0xff] %v1401_v45  ;;  %1196 = vst [vmem:[%s1652_s29 + $0xe0] sm:$0xff] %v1417_v46  ;;  %v1402_v51 = vpack.c.bf16 %v688_v49, %v686_v47  ;;  %v1418_v52 = vpack.c.bf16 %v768_v50, %v766_v48 }
 0x131   : > { %1181 = vst [vmem:[%s1652_s29 + $0x68] sm:$0xff] %v1402_v51  ;;  %1197 = vst [vmem:[%s1652_s29 + $0xe8] sm:$0xff] %v1418_v52 }
 0x133   : > { %v692_v53 = vpop.f32.mrb[28].mxu0  ;;  %v772_v54 = vpop.f32.mrb[28].mxu1 }
 0x134   : > { %v694_v55 = vpop.f32.mrb[29].mxu0  ;;  %v774_v56 = vpop.f32.mrb[29].mxu1 }
 0x135   : > { %v1403_v57 = vpack.c.bf16 %v694_v55, %v692_v53  ;;  %v1419_v58 = vpack.c.bf16 %v774_v56, %v772_v54  ;;  %v696_v59 = vpop.f32.mrb[30].mxu0  ;;  %v776_v60 = vpop.f32.mrb[30].mxu1 }
 0x136   : > { %v698_v61 = vpop.f32.mrb[31].mxu0  ;;  %v778_v62 = vpop.f32.mrb[31].mxu1 }
 0x137   : > { %1182 = vst [vmem:[%s1652_s29 + $0x70] sm:$0xff] %v1403_v57  ;;  %1198 = vst [vmem:[%s1652_s29 + $0xf0] sm:$0xff] %v1419_v58  ;;  %v1404_v63 = vpack.c.bf16 %v698_v61, %v696_v59  ;;  %v1420_v0 = vpack.c.bf16 %v778_v62, %v776_v60 }
 0x139   : > { %1183 = vst [vmem:[%s1652_s29 + $0x78] sm:$0xff] %v1404_v63  ;;  %1199 = vst [vmem:[%s1652_s29 + $0xf8] sm:$0xff] %v1420_v0 }
 0x13a PF: > { %s12_s11 = sadd.s32 1, %s1524_s11   ;;  %s1698_s9 = smov %s1520_s10 }
 0x13b   : > { %p9_p5 = scmp.ge.s32.totalorder %s12_s11, 4   ;;  %s1699_s10 = smov %s1701_s12 }
 0x13d   :  { %11 = sbr.rel (!%p9_p5) target bundleno = 2 (0x2), region = 69 }

// kernel: net_forward.13
= control target key start
LH: loop header
LB: loop body
LE: loop exit
PB: predicated region body
PF: predicated region fallthrough
CT: control target
= control target key end

     0   :  { %s2587_s24 = smov 0   ;;  %s3120_s0 = inlined_call_operand.vmem [shape: bf16[512,128], index: 0, kind: input, shape index: {}]   ;;  %s3121_s1 = inlined_call_operand.vmem [shape: bf16[512,128], index: 1, kind: input, shape index: {}]   ;;  %s3122_s2 = inlined_call_operand.vmem [shape: bf16[512,128], index: 2, kind: input, shape index: {}]   ;;  %s3123_s3 = inlined_call_operand.vmem [shape: bf16[384,128], index: 3, kind: input, shape index: {}, may-alias: {3,4,5}]   ;;  %s3124_s4 = inlined_call_operand.vmem [shape: bf16[384,128], index: 4, kind: input, shape index: {}, may-alias: {3,4,5}]   ;;  %s3125_s5 = inlined_call_operand.vmem [shape: bf16[384,128], index: 5, kind: input, shape index: {}, may-alias: {3,4,5}]   ;;  %s3126_s6 = inlined_call_operand.vmem [shape: f32[1,128], index: 6, kind: input, shape index: {}]   ;;  %s3127_s7 = inlined_call_operand.vmem [shape: f32[512,128], index: 7, kind: output, shape index: {}]  }
   0x1 LB: > { %s1913_s25 = sadd.s32 4294967295, %s2545_s24   ;;  %p1919_p0 = scmp.ge.s32.totalorder %s2545_s24, 1  ;;  %s2545_s24 = sphi %s2587_s24, %s17_s24  }
   0x2   : > { %p262_p1 = scmp.lt.s32.totalorder %s2545_s24, 3 }
   0x4   : > { %p263_p2 = pnand %p1919_p0, %p262_p1 }
   0x5   : > { %v2339_v0 = vld [vmem:[%s3124_s4 + $0x40] sm:$0xff] (!%p263_p2)   ;;  %s1920_s28 = sshll.u32 (!%p263_p2), %s1913_s25, 5  ;;  %v2341_v2 = vld [vmem:[%s3124_s4 + $0x48] sm:$0xff] (!%p263_p2)   ;;  %v2343_v4 = vld [vmem:[%s3124_s4 + $0x50] sm:$0xff] (!%p263_p2)  }
   0x6   : > { %266 = sbr.rel (%p263_p2) target bundleno = 666 (0x29a), region = 48  ;;  %v2601_v1 = vld [vmem:[%s3123_s3] sm:$0xff] (!%p263_p2)   ;;  %2107 = vmatprep.subr.bf16.mxu1 (!%p263_p2), %v2339_v0  ;;  %p307_p3 = scmp.lt.s32.totalorder (!%p263_p2), %s1920_s28, 63  ;;  %v2610_v3 = vld [vmem:[%s3123_s3 + $0x8] sm:$0xff] (!%p263_p2)   ;;  %v2620_v5 = vld [vmem:[%s3123_s3 + $0x10] sm:$0xff] (!%p263_p2)  }
   0x7   : > { %2155 = vmatprep.subr.bf16.mxu0 (!%p263_p2), %v2601_v1  ;;  %2108 = vmatpush3.bf16.msra.mxu1 (!%p263_p2), %v2339_v0  ;;  %v2345_v6 = vld [vmem:[%s3124_s4 + $0x58] sm:$0xff] (!%p263_p2)   ;;  %v2347_v8 = vld [vmem:[%s3124_s4 + $0x60] sm:$0xff] (!%p263_p2)   ;;  %v2349_v10 = vld [vmem:[%s3124_s4 + $0x68] sm:$0xff] (!%p263_p2)  }
   0x8   : > { %2156 = vmatpush3.bf16.msra.mxu0 (!%p263_p2), %v2601_v1  ;;  %2109 = vmatprep.subr.bf16.mxu1 (!%p263_p2), %v2341_v2  ;;  %v2632_v7 = vld [vmem:[%s3123_s3 + $0x18] sm:$0xff] (!%p263_p2)   ;;  %v2645_v9 = vld [vmem:[%s3123_s3 + $0x20] sm:$0xff] (!%p263_p2)   ;;  %v2665_v11 = vld [vmem:[%s3123_s3 + $0x28] sm:$0xff] (!%p263_p2)  }
   0x9   : > { %2157 = vmatprep.subr.bf16.mxu0 (!%p263_p2), %v2610_v3  ;;  %v2351_v14 = vld [vmem:[%s3124_s4 + $0x70] sm:$0xff] (!%p263_p2)   ;;  %v2353_v16 = vld [vmem:[%s3124_s4 + $0x78] sm:$0xff] (!%p263_p2)   ;;  %v2359_v19 = vld [vmem:[%s3125_s5 + $0x80] sm:$0xff] (!%p263_p2)  }
   0xa   : > { %v2679_v15 = vld [vmem:[%s3123_s3 + $0x30] sm:$0xff] (!%p263_p2)   ;;  %v2689_v17 = vld [vmem:[%s3123_s3 + $0x38] sm:$0xff] (!%p263_p2)   ;;  %v2360_v21 = vld [vmem:[%s3125_s5 + $0x88] sm:$0xff] (!%p263_p2)  }
   0xb   : > { %2110 = vmatpush3.bf16.msra.mxu1 (!%p263_p2), %v2341_v2  ;;  %v2365_v25 = vld [vmem:[%s3125_s5 + $0x90] sm:$0xff] (!%p263_p2)   ;;  %v2366_v29 = vld [vmem:[%s3125_s5 + $0x98] sm:$0xff] (!%p263_p2)   ;;  %v2371_v31 = vld [vmem:[%s3125_s5 + $0xa0] sm:$0xff] (!%p263_p2)  }
   0xc   : > { %2158 = vmatpush3.bf16.msra.mxu0 (!%p263_p2), %v2610_v3  ;;  %2111 = vmatprep.subr.bf16.mxu1 (!%p263_p2), %v2343_v4  ;;  %v2372_v35 = vld [vmem:[%s3125_s5 + $0xa8] sm:$0xff] (!%p263_p2)   ;;  %v2377_v37 = vld [vmem:[%s3125_s5 + $0xb0] sm:$0xff] (!%p263_p2)   ;;  %v2378_v41 = vld [vmem:[%s3125_s5 + $0xb8] sm:$0xff] (!%p263_p2)  }
   0xd   : > { %s3129_s28 = smov (!%p307_p3, %s1920_s28), 63  ;;  %2159 = vmatprep.subr.bf16.mxu0 %v2620_v5 }
   0xe   : > { %s2635_s20 = sshll.u32 %s3129_s28, 2  ;;  %s1927_s23 = sshll.u32 %s3129_s28, 3 }
   0xf   : > { %2112 = vmatpush3.bf16.msra.mxu1 %v2343_v4  ;;  %s2651_s29 = scalar_lea.vmem %s3121_s1, %s2635_s20  ;;  %s2660_s11 = scalar_lea.vmem %s3120_s0, %s2635_s20 }
  0x10   : > { %2160 = vmatpush3.bf16.msra.mxu0 %v2620_v5  ;;  %2113 = vmatprep.subr.bf16.mxu1 %v2345_v6  ;;  %v2355_v12 = vld [vmem:[%s2651_s29] sm:$0xff]   ;;  %v2357_v18 = vld [vmem:[%s2651_s29 + $0x8] sm:$0xff]   ;;  %v2361_v22 = vld [vmem:[%s2651_s29 + $0x10] sm:$0xff]   ;;  %s2720_s12 = scalar_lea.vmem %s3122_s2, %s2635_s20  ;;  %s3051_s27 = scalar_lea.vmem %s3127_s7, %s1927_s23 }
  0x11   : > { %2161 = vmatprep.subr.bf16.mxu0 %v2632_v7  ;;  %v2356_v13 = vld [vmem:[%s2660_s11] sm:$0xff]   ;;  %2123 = vmatprep.mubr.bf16.mxu1 %v2355_v12  ;;  %v2358_v20 = vld [vmem:[%s2660_s11 + $0x8] sm:$0xff]   ;;  %v2362_v23 = vld [vmem:[%s2660_s11 + $0x10] sm:$0xff]  }
  0x12   : > { %2171 = vmatprep.mubr.bf16.mxu0 %v2356_v13  ;;  %v2363_v24 = vld [vmem:[%s2651_s29 + $0x18] sm:$0xff]   ;;  %v2367_v27 = vld [vmem:[%s2651_s29 + $0x20] sm:$0xff]   ;;  %v2369_v30 = vld [vmem:[%s2651_s29 + $0x28] sm:$0xff]  }
  0x13   : > { %2114 = vmatpush3.bf16.msra.mxu1 %v2345_v6  ;;  %v2364_v26 = vld [vmem:[%s2660_s11 + $0x18] sm:$0xff]   ;;  %v2368_v28 = vld [vmem:[%s2660_s11 + $0x20] sm:$0xff]   ;;  %v2370_v32 = vld [vmem:[%s2660_s11 + $0x28] sm:$0xff]  }
  0x14   : > { %2162 = vmatpush3.bf16.msra.mxu0 %v2632_v7  ;;  %2115 = vmatprep.subr.bf16.mxu1 %v2347_v8  ;;  %v2373_v33 = vld [vmem:[%s2651_s29 + $0x30] sm:$0xff]   ;;  %v2375_v36 = vld [vmem:[%s2651_s29 + $0x38] sm:$0xff]   ;;  %v2379_v39 = vld [vmem:[%s2651_s29 + $0x40] sm:$0xff]  }
  0x15   : > { %2163 = vmatprep.subr.bf16.mxu0 %v2645_v9  ;;  %v2374_v34 = vld [vmem:[%s2660_s11 + $0x30] sm:$0xff]   ;;  %v2376_v38 = vld [vmem:[%s2660_s11 + $0x38] sm:$0xff]   ;;  %v2380_v40 = vld [vmem:[%s2720_s12] sm:$0xff]  }
  0x16   : > { %v2381_v42 = vld [vmem:[%s2651_s29 + $0x48] sm:$0xff]   ;;  %v2383_v44 = vld [vmem:[%s2651_s29 + $0x50] sm:$0xff]   ;;  %v2385_v46 = vld [vmem:[%s2651_s29 + $0x58] sm:$0xff]  }
  0x17   : > { %2116 = vmatpush3.bf16.msra.mxu1 %v2347_v8  ;;  %v2382_v43 = vld [vmem:[%s2720_s12 + $0x8] sm:$0xff]   ;;  %v2384_v45 = vld [vmem:[%s2720_s12 + $0x10] sm:$0xff]   ;;  %v2386_v47 = vld [vmem:[%s2720_s12 + $0x18] sm:$0xff]  }
  0x18   : > { %2164 = vmatpush3.bf16.msra.mxu0 %v2645_v9  ;;  %2117 = vmatprep.subr.bf16.mxu1 %v2349_v10  ;;  %v2387_v48 = vld [vmem:[%s2651_s29 + $0x60] sm:$0xff]   ;;  %v2389_v50 = vld [vmem:[%s2651_s29 + $0x68] sm:$0xff]   ;;  %v2391_v52 = vld [vmem:[%s2651_s29 + $0x70] sm:$0xff]  }
  0x19   : > { %2165 = vmatprep.subr.bf16.mxu0 %v2665_v11  ;;  %v2388_v49 = vld [vmem:[%s2720_s12 + $0x20] sm:$0xff]   ;;  %v2390_v51 = vld [vmem:[%s2720_s12 + $0x28] sm:$0xff]   ;;  %v2392_v53 = vld [vmem:[%s2720_s12 + $0x30] sm:$0xff]  }
  0x1a   : > { %v2393_v54 = vld [vmem:[%s2651_s29 + $0x78] sm:$0xff]   ;;  %v2395_v56 = vld [vmem:[%s2660_s11 + $0x40] sm:$0xff]   ;;  %v2397_v58 = vld [vmem:[%s2660_s11 + $0x48] sm:$0xff]  }
  0x1b   : > { %2118 = vmatpush3.bf16.msra.mxu1 %v2349_v10  ;;  %v2394_v55 = vld [vmem:[%s2720_s12 + $0x38] sm:$0xff]   ;;  %v2396_v57 = vld [vmem:[%s2720_s12 + $0x40] sm:$0xff]   ;;  %v2398_v59 = vld [vmem:[%s2720_s12 + $0x48] sm:$0xff]  }
  0x1c   : > { %2166 = vmatpush3.bf16.msra.mxu0 %v2665_v11  ;;  %2119 = vmatprep.subr.bf16.mxu1 %v2351_v14  ;;  %v2399_v60 = vld [vmem:[%s2660_s11 + $0x50] sm:$0xff]   ;;  %v2401_v62 = vld [vmem:[%s2660_s11 + $0x58] sm:$0xff]   ;;  %v2403_v0 = vld [vmem:[%s2660_s11 + $0x60] sm:$0xff]  }
  0x1d   : > { %2167 = vmatprep.subr.bf16.mxu0 %v2679_v15  ;;  %v2400_v61 = vld [vmem:[%s2720_s12 + $0x50] sm:$0xff]   ;;  %v2402_v63 = vld [vmem:[%s2720_s12 + $0x58] sm:$0xff]   ;;  %v2405_v2 = vld [vmem:[%s2660_s11 + $0x68] sm:$0xff]  }
  0x1e   : > { %v2407_v4 = vld [vmem:[%s2660_s11 + $0x70] sm:$0xff]   ;;  %v2409_v6 = vld [vmem:[%s2660_s11 + $0x78] sm:$0xff]  }
  0x1f   : > { %2120 = vmatpush3.bf16.msra.mxu1 %v2351_v14 }
  0x20   : > { %2168 = vmatpush3.bf16.msra.mxu0 %v2679_v15  ;;  %2121 = vmatprep.subr.bf16.mxu1 %v2353_v16 }
  0x21   : > { %2169 = vmatprep.subr.bf16.mxu0 %v2689_v17 }
  0x23   : > { %2122 = vmatpush3.bf16.msra.mxu1 %v2353_v16 }
  0x24   : > { %2170 = vmatpush3.bf16.msra.mxu0 %v2689_v17  ;;  %2251 = vmatprep.subr.bf16.mxu1 %v2601_v1 }
  0x25   : > { %2203 = vmatprep.subr.bf16.mxu0 %v2359_v19 }
  0x26   : > { %2124 = vmatmul.mubr.bf16.vlgmr.msra.gmra.mrb[0].mxu1 %v2357_v18 }
  0x27   : > { %2172 = vmatmul.mubr.bf16.vlgmr.msra.gmra.mrb[0].mxu0 %v2358_v20  ;;  %2259 = vmatpush3.bf16.msra.mxu1 %v2601_v1  ;;  %v2404_v1 = vld [vmem:[%s2720_s12 + $0x60] sm:$0xff]  }
  0x28   : > { %2204 = vmatpush3.bf16.msra.mxu0 %v2359_v19  ;;  %2127 = vmatprep.mubr.bf16.mxu1 %v2361_v22 }
  0x29   : > { %2205 = vmatprep.subr.bf16.mxu0 %v2360_v21  ;;  %2175 = vmatprep.mubr.bf16.mxu0 %v2362_v23 }
  0x2a   : > { %2252 = vmatprep.subr.bf16.mxu1 %v2610_v3 }
  0x2b   : > { %2260 = vmatpush3.bf16.msra.mxu1 %v2610_v3  ;;  %v2406_v3 = vld [vmem:[%s2720_s12 + $0x68] sm:$0xff]  }
  0x2c   : > { %2206 = vmatpush3.bf16.msra.mxu0 %v2360_v21  ;;  %2253 = vmatprep.subr.bf16.mxu1 %v2620_v5 }
  0x2d   : > { %2207 = vmatprep.subr.bf16.mxu0 %v2365_v25 }
  0x2e   : > { %2128 = vmatmul.mubr.bf16.gmra.mrb[4].mxu1 %v2363_v24 }
  0x2f   : > { %2176 = vmatmul.mubr.bf16.gmra.mrb[4].mxu0 %v2364_v26  ;;  %2131 = vmatprep.mubr.bf16.mxu1 %v2367_v27 }
  0x30   : > { %2208 = vmatpush3.bf16.msra.mxu0 %v2365_v25  ;;  %2179 = vmatprep.mubr.bf16.mxu0 %v2368_v28  ;;  %v2789_v25 = vld [vmem:[%s3126_s6] ss:$0 sm:$0xff] }
  0x31   : > { %2209 = vmatprep.subr.bf16.mxu0 %v2366_v29  ;;  %2261 = vmatpush3.bf16.msra.mxu1 %v2620_v5  ;;  %v2408_v5 = vld [vmem:[%s2720_s12 + $0x70] sm:$0xff]  }
  0x32   : > { %2254 = vmatprep.subr.bf16.mxu1 %v2632_v7 }
  0x34   : > { %2210 = vmatpush3.bf16.msra.mxu0 %v2366_v29 }
  0x35   : > { %2211 = vmatprep.subr.bf16.mxu0 %v2371_v31  ;;  %2262 = vmatpush3.bf16.msra.mxu1 %v2632_v7  ;;  %v2410_v7 = vld [vmem:[%s2720_s12 + $0x78] sm:$0xff]  }
  0x36   : > { %2132 = vmatmul.mubr.bf16.gmra.mrb[8].mxu1 %v2369_v30  ;;  %2255 = vmatprep.subr.bf16.mxu1 %v2645_v9 }
  0x37   : > { %2180 = vmatmul.mubr.bf16.gmra.mrb[8].mxu0 %v2370_v32  ;;  %2135 = vmatprep.mubr.bf16.mxu1 %v2373_v33 }
  0x38   : > { %2212 = vmatpush3.bf16.msra.mxu0 %v2371_v31  ;;  %2183 = vmatprep.mubr.bf16.mxu0 %v2374_v34 }
  0x39   : > { %2213 = vmatprep.subr.bf16.mxu0 %v2372_v35  ;;  %2263 = vmatpush3.bf16.msra.mxu1 %v2645_v9 }
  0x3a   : > { %2256 = vmatprep.subr.bf16.mxu1 %v2665_v11 }
  0x3c   : > { %2214 = vmatpush3.bf16.msra.mxu0 %v2372_v35 }
  0x3d   : > { %2215 = vmatprep.subr.bf16.mxu0 %v2377_v37  ;;  %2264 = vmatpush3.bf16.msra.mxu1 %v2665_v11 }
  0x3e   : > { %2136 = vmatmul.mubr.bf16.gmra.mrb[12].mxu1 %v2375_v36  ;;  %2257 = vmatprep.subr.bf16.mxu1 %v2679_v15 }
  0x3f   : > { %2184 = vmatmul.mubr.bf16.gmra.mrb[12].mxu0 %v2376_v38  ;;  %2139 = vmatprep.mubr.bf16.mxu1 %v2379_v39 }
  0x40   : > { %2216 = vmatpush3.bf16.msra.mxu0 %v2377_v37  ;;  %2219 = vmatprep.mubr.bf16.mxu0 %v2380_v40 }
  0x41   : > { %2217 = vmatprep.subr.bf16.mxu0 %v2378_v41  ;;  %2265 = vmatpush3.bf16.msra.mxu1 %v2679_v15 }
  0x42   : > { %2258 = vmatprep.subr.bf16.mxu1 %v2689_v17 }
  0x44   : > { %2218 = vmatpush3.bf16.msra.mxu0 %v2378_v41 }
  0x45   : > { %2266 = vmatpush3.bf16.msra.mxu1 %v2689_v17 }
  0x46   : > { %2140 = vmatmul.mubr.bf16.gmra.mrb[16].mxu1 %v2381_v42 }
  0x47   : > { %2220 = vmatmul.mubr.bf16.vlgmr.msra.gmra.mrb[0].mxu0 %v2382_v43  ;;  %2143 = vmatprep.mubr.bf16.mxu1 %v2383_v44 }
  0x48   : > { %2223 = vmatprep.mubr.bf16.mxu0 %v2384_v45 }
  0x4e   : > { %2144 = vmatmul.mubr.bf16.gmra.mrb[20].mxu1 %v2385_v46 }
  0x4f   : > { %2224 = vmatmul.mubr.bf16.gmra.mrb[4].mxu0 %v2386_v47  ;;  %2147 = vmatprep.mubr.bf16.mxu1 %v2387_v48 }
  0x50   : > { %2227 = vmatprep.mubr.bf16.mxu0 %v2388_v49 }
  0x56   : > { %2148 = vmatmul.mubr.bf16.gmra.mrb[24].mxu1 %v2389_v50 }
  0x57   : > { %2228 = vmatmul.mubr.bf16.gmra.mrb[8].mxu0 %v2390_v51  ;;  %2151 = vmatprep.mubr.bf16.mxu1 %v2391_v52 }
  0x58   : > { %2231 = vmatprep.mubr.bf16.mxu0 %v2392_v53 }
  0x5e   : > { %2152 = vmatmul.mubr.bf16.gmra.mrb[28].mxu1 %v2393_v54 }
  0x5f   : > { %2232 = vmatmul.mubr.bf16.gmra.mrb[12].mxu0 %v2394_v55  ;;  %2187 = vmatprep.mubr.bf16.mxu1 %v2395_v56 }
  0x60   : > { %2235 = vmatprep.mubr.bf16.mxu0 %v2396_v57 }
  0x66   : > { %2188 = vmatmul.mubr.bf16.vlgmr.msra.gmra.mrb[16].mxu1 %v2397_v58 }
  0x67   : > { %2236 = vmatmul.mubr.bf16.gmra.mrb[16].mxu0 %v2398_v59  ;;  %2191 = vmatprep.mubr.bf16.mxu1 %v2399_v60 }
  0x68   : > { %2239 = vmatprep.mubr.bf16.mxu0 %v2400_v61 }
  0x6e   : > { %2192 = vmatmul.mubr.bf16.gmra.mrb[20].mxu1 %v2401_v62 }
  0x6f   : > { %2240 = vmatmul.mubr.bf16.gmra.mrb[20].mxu0 %v2402_v63  ;;  %2195 = vmatprep.mubr.bf16.mxu1 %v2403_v0 }
  0x70   : > { %2243 = vmatprep.mubr.bf16.mxu0 %v2404_v1 }
  0x76   : > { %2196 = vmatmul.mubr.bf16.gmra.mrb[24].mxu1 %v2405_v2 }
  0x77   : > { %2244 = vmatmul.mubr.bf16.gmra.mrb[24].mxu0 %v2406_v3  ;;  %2199 = vmatprep.mubr.bf16.mxu1 %v2407_v4 }
  0x78   : > { %2247 = vmatprep.mubr.bf16.mxu0 %v2408_v5 }
  0x7e   : > { %2200 = vmatmul.mubr.bf16.gmra.mrb[28].mxu1 %v2409_v6 }
  0x7f   : > { %2248 = vmatmul.mubr.bf16.gmra.mrb[28].mxu0 %v2410_v7 }
  0xf9   : > { %v2125_v8 = vpop.f32.mrb[0].mxu1 }
  0xfa   : > { %v607_v9 = vpop.f32.mrb[1].mxu1 }
  0xfb   : > { %v2126_v10 = vpop.f32.mrb[2].mxu1 }
  0xfc   : > { %v610_v11 = vpop.f32.mrb[3].mxu1 }
 0x101   : > { %v2129_v12 = vpop.f32.mrb[4].mxu1 }
 0x102   : > { %v623_v13 = vpop.f32.mrb[5].mxu1 }
 0x103   : > { %v2130_v14 = vpop.f32.mrb[6].mxu1 }
 0x104   : > { %v626_v15 = vpop.f32.mrb[7].mxu1 }
 0x109   : > { %v2133_v16 = vpop.f32.mrb[8].mxu1 }
 0x10a   : > { %v639_v17 = vpop.f32.mrb[9].mxu1 }
 0x10b   : > { %v2134_v18 = vpop.f32.mrb[10].mxu1 }
 0x10c   : > { %v642_v19 = vpop.f32.mrb[11].mxu1 }
 0x111   : > { %v2137_v20 = vpop.f32.mrb[12].mxu1 }
 0x112   : > { %v655_v21 = vpop.f32.mrb[13].mxu1 }
 0x113   : > { %v2138_v22 = vpop.f32.mrb[14].mxu1 }
 0x114   : > { %v658_v23 = vpop.f32.mrb[15].mxu1 }
 0x11a   : > { %v2221_v24 = vpop.f32.mrb[0].mxu0 }
 0x11b   : > { %v2267_v26 = vadd.f32 %v2221_v24, %v2125_v8  ;;  %v1265_v27 = vpop.f32.mrb[1].mxu0 }
 0x11c   : > { %v2268_v28 = vadd.f32 %v1265_v27, %v607_v9  ;;  %v2222_v29 = vpop.f32.mrb[2].mxu0 }
 0x11d   : > { %v2269_v30 = vadd.f32 %v2222_v29, %v2126_v10  ;;  %v1268_v31 = vpop.f32.mrb[3].mxu0  ;;  %v2792_v32 = vadd.f32 %v2267_v26, %v2789_v25 }
 0x11e   : > { %v2270_v33 = vadd.f32 %v1268_v31, %v610_v11  ;;  %v2795_v34 = vadd.f32 %v2268_v28, %v2789_v25 }
 0x11f   : > { %1467 = vmax.xlane.f32.xlu1 %v2792_v32  ;;  %v2800_v35 = vadd.f32 %v2269_v30, %v2789_v25 }
 0x120   : > { %1463 = vmax.xlane.f32.xlu0 %v2795_v34  ;;  %v2803_v37 = vadd.f32 %v2270_v33, %v2789_v25 }
 0x122   : > { %v2225_v36 = vpop.f32.mrb[4].mxu0 }
 0x123   : > { %v2271_v38 = vadd.f32 %v2225_v36, %v2129_v12  ;;  %1469 = vmax.xlane.f32.xlu1 %v2800_v35  ;;  %v1281_v39 = vpop.f32.mrb[5].mxu0 }
 0x124   : > { %v2272_v40 = vadd.f32 %v1281_v39, %v623_v13  ;;  %1465 = vmax.xlane.f32.xlu0 %v2803_v37  ;;  %v2226_v41 = vpop.f32.mrb[6].mxu0 }
 0x125   : > { %v2273_v42 = vadd.f32 %v2226_v41, %v2130_v14  ;;  %v1284_v43 = vpop.f32.mrb[7].mxu0  ;;  %v2808_v44 = vadd.f32 %v2271_v38, %v2789_v25 }
 0x126   : > { %v2274_v45 = vadd.f32 %v1284_v43, %v626_v15  ;;  %v2816_v48 = vadd.f32 %v2272_v40, %v2789_v25 }
 0x127   : > { %v2811_v46 = vadd.f32 %v2273_v42, %v2789_v25 }
 0x128   : > { %1475 = vmax.xlane.f32.xlu0 %v2808_v44  ;;  %v2819_v51 = vadd.f32 %v2274_v45, %v2789_v25 }
 0x129   : > { %1477 = vmax.xlane.f32.xlu1 %v2811_v46 }
 0x12a   : > { %v2229_v47 = vpop.f32.mrb[8].mxu0 }
 0x12b   : > { %v2275_v49 = vadd.f32 %v2229_v47, %v2133_v16  ;;  %v1297_v50 = vpop.f32.mrb[9].mxu0 }
 0x12c   : > { %v2276_v52 = vadd.f32 %v1297_v50, %v639_v17  ;;  %1471 = vmax.xlane.f32.xlu0 %v2816_v48  ;;  %v2230_v53 = vpop.f32.mrb[10].mxu0 }
 0x12d   : > { %v2277_v54 = vadd.f32 %v2230_v53, %v2134_v18  ;;  %1473 = vmax.xlane.f32.xlu1 %v2819_v51  ;;  %v1300_v55 = vpop.f32.mrb[11].mxu0  ;;  %v2824_v56 = vadd.f32 %v2275_v49, %v2789_v25 }
 0x12e   : > { %v2278_v57 = vadd.f32 %v1300_v55, %v642_v19  ;;  %v2832_v60 = vadd.f32 %v2276_v52, %v2789_v25 }
 0x12f   : > { %v2827_v58 = vadd.f32 %v2277_v54, %v2789_v25 }
 0x130   : > { %1483 = vmax.xlane.f32.xlu0 %v2824_v56  ;;  %v2835_v63 = vadd.f32 %v2278_v57, %v2789_v25 }
 0x131   : > { %1485 = vmax.xlane.f32.xlu1 %v2827_v58 }
 0x132   : > { %v2233_v59 = vpop.f32.mrb[12].mxu0 }
 0x133   : > { %v2279_v61 = vadd.f32 %v2233_v59, %v2137_v20  ;;  %v1313_v62 = vpop.f32.mrb[13].mxu0 }
 0x134   : > { %v2280_v0 = vadd.f32 %v1313_v62, %v655_v21  ;;  %1479 = vmax.xlane.f32.xlu0 %v2832_v60  ;;  %v2234_v1 = vpop.f32.mrb[14].mxu0 }
 0x135   : > { %v2281_v2 = vadd.f32 %v2234_v1, %v2138_v22  ;;  %1481 = vmax.xlane.f32.xlu1 %v2835_v63  ;;  %v1316_v3 = vpop.f32.mrb[15].mxu0  ;;  %v2840_v4 = vadd.f32 %v2279_v61, %v2789_v25 }
 0x136   : > { %v2282_v5 = vadd.f32 %v1316_v3, %v658_v23  ;;  %v2848_v10 = vadd.f32 %v2280_v0, %v2789_v25 }
 0x137   : > { %v2843_v6 = vadd.f32 %v2281_v2, %v2789_v25 }
 0x138   : > { %1491 = vmax.xlane.f32.xlu0 %v2840_v4  ;;  %v2851_v14 = vadd.f32 %v2282_v5, %v2789_v25 }
 0x139   : > { %1493 = vmax.xlane.f32.xlu1 %v2843_v6  ;;  %v2189_v7 = vpop.f32.mrb[16].mxu1 }
 0x13a   : > { %v2237_v8 = vpop.f32.mrb[16].mxu0  ;;  %v976_v9 = vpop.f32.mrb[17].mxu1 }
 0x13b   : > { %v2283_v11 = vadd.f32 %v2237_v8, %v2189_v7  ;;  %v1329_v12 = vpop.f32.mrb[17].mxu0  ;;  %v2190_v13 = vpop.f32.mrb[18].mxu1 }
 0x13c   : > { %v2284_v15 = vadd.f32 %v1329_v12, %v976_v9  ;;  %1487 = vmax.xlane.f32.xlu0 %v2848_v10  ;;  %v2238_v16 = vpop.f32.mrb[18].mxu0  ;;  %v979_v17 = vpop.f32.mrb[19].mxu1 }
 0x13d   : > { %v2285_v18 = vadd.f32 %v2238_v16, %v2190_v13  ;;  %1489 = vmax.xlane.f32.xlu1 %v2851_v14  ;;  %v1332_v19 = vpop.f32.mrb[19].mxu0  ;;  %v2856_v20 = vadd.f32 %v2283_v11, %v2789_v25 }
 0x13e   : > { %v2286_v21 = vadd.f32 %v1332_v19, %v979_v17  ;;  %v2864_v27 = vadd.f32 %v2284_v15, %v2789_v25 }
 0x13f   : > { %v2859_v22 = vadd.f32 %v2285_v18, %v2789_v25 }
 0x140   : > { %1499 = vmax.xlane.f32.xlu0 %v2856_v20  ;;  %v2867_v31 = vadd.f32 %v2286_v21, %v2789_v25 }
 0x141   : > { %1501 = vmax.xlane.f32.xlu1 %v2859_v22  ;;  %v2193_v23 = vpop.f32.mrb[20].mxu1 }
 0x142   : > { %v2241_v24 = vpop.f32.mrb[20].mxu0  ;;  %v992_v26 = vpop.f32.mrb[21].mxu1 }
 0x143   : > { %v2287_v28 = vadd.f32 %v2241_v24, %v2193_v23  ;;  %v1345_v29 = vpop.f32.mrb[21].mxu0  ;;  %v2194_v30 = vpop.f32.mrb[22].mxu1 }
 0x144   : > { %v2288_v33 = vadd.f32 %v1345_v29, %v992_v26  ;;  %1495 = vmax.xlane.f32.xlu0 %v2864_v27  ;;  %v2242_v36 = vpop.f32.mrb[22].mxu0  ;;  %v995_v38 = vpop.f32.mrb[23].mxu1 }
 0x145   : > { %v2289_v39 = vadd.f32 %v2242_v36, %v2194_v30  ;;  %1497 = vmax.xlane.f32.xlu1 %v2867_v31  ;;  %v1348_v40 = vpop.f32.mrb[23].mxu0  ;;  %v2872_v41 = vadd.f32 %v2287_v28, %v2789_v25 }
 0x146   : > { %v2290_v42 = vadd.f32 %v1348_v40, %v995_v38  ;;  %v2880_v50 = vadd.f32 %v2288_v33, %v2789_v25 }
 0x147   : > { %v2875_v43 = vadd.f32 %v2289_v39, %v2789_v25 }
 0x148   : > { %1507 = vmax.xlane.f32.xlu0 %v2872_v41  ;;  %v2883_v55 = vadd.f32 %v2290_v42, %v2789_v25 }
 0x149   : > { %1509 = vmax.xlane.f32.xlu1 %v2875_v43  ;;  %v2197_v45 = vpop.f32.mrb[24].mxu1 }
 0x14a   : > { %v2245_v47 = vpop.f32.mrb[24].mxu0  ;;  %v1008_v49 = vpop.f32.mrb[25].mxu1 }
 0x14b   : > { %v2291_v52 = vadd.f32 %v2245_v47, %v2197_v45  ;;  %v1361_v53 = vpop.f32.mrb[25].mxu0  ;;  %v2198_v54 = vpop.f32.mrb[26].mxu1 }
 0x14c   : > { %v2292_v57 = vadd.f32 %v1361_v53, %v1008_v49  ;;  %1503 = vmax.xlane.f32.xlu0 %v2880_v50  ;;  %v2246_v59 = vpop.f32.mrb[26].mxu0  ;;  %v1011_v61 = vpop.f32.mrb[27].mxu1 }
 0x14d   : > { %v2293_v62 = vadd.f32 %v2246_v59, %v2198_v54  ;;  %1505 = vmax.xlane.f32.xlu1 %v2883_v55  ;;  %v1364_v0 = vpop.f32.mrb[27].mxu0  ;;  %v2888_v1 = vadd.f32 %v2291_v52, %v2789_v25 }
 0x14e   : > { %v2294_v2 = vadd.f32 %v1364_v0, %v1011_v61  ;;  %v2896_v9 = vadd.f32 %v2292_v57, %v2789_v25 }
 0x14f   : > { %v2891_v3 = vadd.f32 %v2293_v62, %v2789_v25 }
 0x150   : > { %1515 = vmax.xlane.f32.xlu0 %v2888_v1  ;;  %v2899_v15 = vadd.f32 %v2294_v2, %v2789_v25 }
 0x151   : > { %1517 = vmax.xlane.f32.xlu1 %v2891_v3  ;;  %v2201_v5 = vpop.f32.mrb[28].mxu1 }
 0x152   : > { %v2249_v7 = vpop.f32.mrb[28].mxu0  ;;  %v1024_v8 = vpop.f32.mrb[29].mxu1 }
 0x153   : > { %v2295_v11 = vadd.f32 %v2249_v7, %v2201_v5  ;;  %v1377_v12 = vpop.f32.mrb[29].mxu0  ;;  %v2202_v13 = vpop.f32.mrb[30].mxu1 }
 0x154   : > { %v2296_v16 = vadd.f32 %v1377_v12, %v1024_v8  ;;  %1511 = vmax.xlane.f32.xlu0 %v2896_v9  ;;  %v2250_v17 = vpop.f32.mrb[30].mxu0  ;;  %v1027_v18 = vpop.f32.mrb[31].mxu1 }
 0x155   : > { %v2297_v19 = vadd.f32 %v2250_v17, %v2202_v13  ;;  %1513 = vmax.xlane.f32.xlu1 %v2899_v15  ;;  %v1380_v21 = vpop.f32.mrb[31].mxu0  ;;  %v2912_v28 = vadd.f32 %v2295_v11, %v2789_v25 }
 0x156   : > { %v2298_v23 = vadd.f32 %v1380_v21, %v1027_v18  ;;  %v2904_v24 = vadd.f32 %v2296_v16, %v2789_v25 }
 0x157   : > { %v2916_v29 = vadd.f32 %v2297_v19, %v2789_v25 }
 0x158   : > { %1519 = vmax.xlane.f32.xlu0 %v2904_v24  ;;  %v2908_v26 = vadd.f32 %v2298_v23, %v2789_v25 }
 0x15a   : > { %1521 = vmax.xlane.f32.xlu1 %v2908_v26 }
 0x15c   : > { %1523 = vmax.xlane.f32.xlu0 %v2912_v28 }
 0x15e   : > { %1525 = vmax.xlane.f32.xlu1 %v2916_v29 }
 0x1ac   : > { %v1468_v30 = vpop.xlane.xlu1 %1467 }
 0x1ad   : > { %v2920_v33 = vsub.f32 %v2792_v32, %v1468_v30  ;;  %v1464_v36 = vpop.xlane.xlu0 %1463 }
 0x1ae   : > { %v2923_v38 = vsub.f32 %v2795_v34, %v1464_v36 }
 0x1af   : > { %v1563_v39 = vmul.f32 1.442695, %v2920_v33 }
 0x1b0   : > { %v1559_v40 = vmul.f32 1.442695, %v2923_v38  ;;  %v1470_v42 = vpop.xlane.xlu1 %1469 }
 0x1b1   : > { %2411 = vpow2.f32 %v1563_v39  ;;  %v2928_v45 = vsub.f32 %v2800_v35, %v1470_v42  ;;  %v1466_v25 = vpop.xlane.xlu0 %1465 }
 0x1b2   : > { %v2931_v47 = vsub.f32 %v2803_v37, %v1466_v25  ;;  %2413 = vpow2.f32 %v1559_v40 }
 0x1b3   : > { %v1565_v32 = vmul.f32 1.442695, %v2928_v45 }
 0x1b4   : > { %v1561_v34 = vmul.f32 1.442695, %v2931_v47 }
 0x1b5   : > { %2415 = vpow2.f32 %v1565_v32  ;;  %v1476_v49 = vpop.xlane.xlu0 %1475 }
 0x1b6   : > { %v2936_v52 = vsub.f32 %v2808_v44, %v1476_v49  ;;  %v1478_v53 = vpop.xlane.xlu1 %1477  ;;  %2417 = vpow2.f32 %v1561_v34 }
 0x1b7   : > { %v2939_v54 = vsub.f32 %v2811_v46, %v1478_v53 }
 0x1b8   : > { %v1571_v35 = vmul.f32 1.442695, %v2936_v52 }
 0x1b9   : > { %v1573_v37 = vmul.f32 1.442695, %v2939_v54  ;;  %v1472_v57 = vpop.xlane.xlu0 %1471 }
 0x1ba   : > { %2419 = vpow2.f32 %v1571_v35  ;;  %v2944_v59 = vsub.f32 %v2816_v48, %v1472_v57  ;;  %v1474_v61 = vpop.xlane.xlu1 %1473 }
 0x1bb   : > { %v2412_v62 = vpop.eup %2411  ;;  %v2947_v0 = vsub.f32 %v2819_v51, %v1474_v61  ;;  %2421 = vpow2.f32 %v1573_v37 }
 0x1bc   : > { %v1567_v44 = vmul.f32 1.442695, %v2944_v59  ;;  %1627 = vadd.xlane.f32.xlu0 %v2412_v62  ;;  %v2414_v5 = vpop.eup %2413 }
 0x1bd   : > { %v1569_v46 = vmul.f32 1.442695, %v2947_v0  ;;  %v1484_v2 = vpop.xlane.xlu0 %1483 }
 0x1be   : > { %2423 = vpow2.f32 %v1567_v44  ;;  %v2952_v7 = vsub.f32 %v2824_v56, %v1484_v2  ;;  %v1486_v8 = vpop.xlane.xlu1 %1485 }
 0x1bf   : > { %v2416_v48 = vpop.eup %2415  ;;  %v2955_v11 = vsub.f32 %v2827_v58, %v1486_v8  ;;  %2425 = vpow2.f32 %v1569_v46 }
 0x1c0   : > { %v1579_v51 = vmul.f32 1.442695, %v2952_v7  ;;  %1623 = vadd.xlane.f32.xlu0 %v2414_v5  ;;  %1629 = vadd.xlane.f32.xlu1 %v2416_v48  ;;  %v2418_v56 = vpop.eup %2417 }
 0x1c1   : > { %v1581_v12 = vmul.f32 1.442695, %v2955_v11  ;;  %v1480_v13 = vpop.xlane.xlu0 %1479 }
 0x1c2   : > { %2427 = vpow2.f32 %v1579_v51  ;;  %v2960_v16 = vsub.f32 %v2832_v60, %v1480_v13  ;;  %v1482_v17 = vpop.xlane.xlu1 %1481 }
 0x1c3   : > { %v2963_v18 = vsub.f32 %v2835_v63, %v1482_v17  ;;  %2429 = vpow2.f32 %v1581_v12 }
 0x1c4   : > { %v2420_v19 = vpop.eup %2419  ;;  %v1575_v58 = vmul.f32 1.442695, %v2960_v16  ;;  %1625 = vadd.xlane.f32.xlu1 %v2418_v56 }
 0x1c5   : > { %v1577_v21 = vmul.f32 1.442695, %v2963_v18  ;;  %v1492_v23 = vpop.xlane.xlu0 %1491  ;;  %1635 = vadd.xlane.f32.xlu0 %v2420_v19  ;;  %v2422_v36 = vpop.eup %2421 }
 0x1c6   : > { %2431 = vpow2.f32 %v1575_v58  ;;  %v2968_v30 = vsub.f32 %v2840_v4, %v1492_v23  ;;  %v1494_v60 = vpop.xlane.xlu1 %1493 }
 0x1c7   : > { %v2971_v39 = vsub.f32 %v2843_v6, %v1494_v60  ;;  %2433 = vpow2.f32 %v1577_v21 }
 0x1c8   : > { %v2424_v63 = vpop.eup %2423  ;;  %v1587_v40 = vmul.f32 1.442695, %v2968_v30  ;;  %1637 = vadd.xlane.f32.xlu1 %v2422_v36 }
 0x1c9   : > { %v1589_v42 = vmul.f32 1.442695, %v2971_v39  ;;  %v1488_v25 = vpop.xlane.xlu0 %1487  ;;  %1631 = vadd.xlane.f32.xlu0 %v2424_v63  ;;  %v2426_v34 = vpop.eup %2425 }
 0x1ca   : > { %2435 = vpow2.f32 %v1587_v40  ;;  %v2976_v32 = vsub.f32 %v2848_v10, %v1488_v25  ;;  %v1490_v4 = vpop.xlane.xlu1 %1489 }
 0x1cb   : > { %v2979_v49 = vsub.f32 %v2851_v14, %v1490_v4  ;;  %2437 = vpow2.f32 %v1589_v42 }
 0x1cc   : > { %v2428_v6 = vpop.eup %2427  ;;  %v1583_v53 = vmul.f32 1.442695, %v2976_v32  ;;  %1633 = vadd.xlane.f32.xlu1 %v2426_v34 }
 0x1cd   : > { %v1585_v35 = vmul.f32 1.442695, %v2979_v49  ;;  %v1500_v37 = vpop.xlane.xlu0 %1499  ;;  %1643 = vadd.xlane.f32.xlu0 %v2428_v6  ;;  %v2430_v61 = vpop.eup %2429 }
 0x1ce   : > { %2439 = vpow2.f32 %v1583_v53  ;;  %v2984_v57 = vsub.f32 %v2856_v20, %v1500_v37  ;;  %v1502_v10 = vpop.xlane.xlu1 %1501 }
 0x1cf   : > { %v2987_v62 = vsub.f32 %v2859_v22, %v1502_v10  ;;  %2441 = vpow2.f32 %v1585_v35 }
 0x1d0   : > { %v2432_v14 = vpop.eup %2431  ;;  %v1595_v44 = vmul.f32 1.442695, %v2984_v57  ;;  %1645 = vadd.xlane.f32.xlu1 %v2430_v61 }
 0x1d1   : > { %v1597_v46 = vmul.f32 1.442695, %v2987_v62  ;;  %v1496_v2 = vpop.xlane.xlu0 %1495  ;;  %1639 = vadd.xlane.f32.xlu0 %v2432_v14  ;;  %v2434_v8 = vpop.eup %2433 }
 0x1d2   : > { %2443 = vpow2.f32 %v1595_v44  ;;  %v2992_v5 = vsub.f32 %v2864_v27, %v1496_v2  ;;  %v1498_v20 = vpop.xlane.xlu1 %1497 }
 0x1d3   : > { %v2995_v48 = vsub.f32 %v2867_v31, %v1498_v20  ;;  %2445 = vpow2.f32 %v1597_v46 }
 0x1d4   : > { %v2436_v22 = vpop.eup %2435  ;;  %v1591_v51 = vmul.f32 1.442695, %v2992_v5  ;;  %1641 = vadd.xlane.f32.xlu1 %v2434_v8 }
 0x1d5   : > { %v1593_v12 = vmul.f32 1.442695, %v2995_v48  ;;  %v1508_v13 = vpop.xlane.xlu0 %1507  ;;  %1651 = vadd.xlane.f32.xlu0 %v2436_v22  ;;  %v2438_v56 = vpop.eup %2437 }
 0x1d6   : > { %2447 = vpow2.f32 %v1591_v51  ;;  %v3000_v17 = vsub.f32 %v2872_v41, %v1508_v13  ;;  %v1510_v27 = vpop.xlane.xlu1 %1509 }
 0x1d7   : > { %v3003_v19 = vsub.f32 %v2875_v43, %v1510_v27  ;;  %2449 = vpow2.f32 %v1593_v12 }
 0x1d8   : > { %v2440_v31 = vpop.eup %2439  ;;  %v1603_v58 = vmul.f32 1.442695, %v3000_v17  ;;  %1653 = vadd.xlane.f32.xlu1 %v2438_v56 }
 0x1d9   : > { %v1605_v21 = vmul.f32 1.442695, %v3003_v19  ;;  %v1504_v23 = vpop.xlane.xlu0 %1503  ;;  %1647 = vadd.xlane.f32.xlu0 %v2440_v31  ;;  %v2442_v36 = vpop.eup %2441 }
 0x1da   : > { %2451 = vpow2.f32 %v1603_v58  ;;  %v3008_v60 = vsub.f32 %v2880_v50, %v1504_v23  ;;  %v1506_v41 = vpop.xlane.xlu1 %1505 }
 0x1db   : > { %v3011_v63 = vsub.f32 %v2883_v55, %v1506_v41  ;;  %2453 = vpow2.f32 %v1605_v21 }
 0x1dc   : > { %v2444_v43 = vpop.eup %2443  ;;  %v1599_v40 = vmul.f32 1.442695, %v3008_v60  ;;  %1649 = vadd.xlane.f32.xlu1 %v2442_v36 }
 0x1dd   : > { %v1601_v42 = vmul.f32 1.442695, %v3011_v63  ;;  %v1516_v25 = vpop.xlane.xlu0 %1515  ;;  %1659 = vadd.xlane.f32.xlu0 %v2444_v43  ;;  %v2446_v34 = vpop.eup %2445 }
 0x1de   : > { %2455 = vpow2.f32 %v1599_v40  ;;  %v3016_v4 = vsub.f32 %v2888_v1, %v1516_v25  ;;  %v1518_v50 = vpop.xlane.xlu1 %1517 }
 0x1df   : > { %v3019_v6 = vsub.f32 %v2891_v3, %v1518_v50  ;;  %2457 = vpow2.f32 %v1601_v42 }
 0x1e0   : > { %v2448_v55 = vpop.eup %2447  ;;  %v1611_v53 = vmul.f32 1.442695, %v3016_v4  ;;  %1661 = vadd.xlane.f32.xlu1 %v2446_v34 }
 0x1e1   : > { %v1613_v35 = vmul.f32 1.442695, %v3019_v6  ;;  %v1512_v37 = vpop.xlane.xlu0 %1511  ;;  %1655 = vadd.xlane.f32.xlu0 %v2448_v55  ;;  %v2450_v61 = vpop.eup %2449 }
 0x1e2   : > { %2459 = vpow2.f32 %v1611_v53  ;;  %v3024_v10 = vsub.f32 %v2896_v9, %v1512_v37  ;;  %v1514_v1 = vpop.xlane.xlu1 %1513 }
 0x1e3   : > { %v3027_v14 = vsub.f32 %v2899_v15, %v1514_v1  ;;  %2461 = vpow2.f32 %v1613_v35 }
 0x1e4   : > { %v2452_v3 = vpop.eup %2451  ;;  %v1607_v44 = vmul.f32 1.442695, %v3024_v10  ;;  %1657 = vadd.xlane.f32.xlu1 %v2450_v61 }
 0x1e5   : > { %v1609_v46 = vmul.f32 1.442695, %v3027_v14  ;;  %1667 = vadd.xlane.f32.xlu0 %v2452_v3  ;;  %v1520_v2 = vpop.xlane.xlu0 %1519  ;;  %v2454_v9 = vpop.eup %2453 }
 0x1e6   : > { %2463 = vpow2.f32 %v1607_v44  ;;  %v3032_v20 = vsub.f32 %v2904_v24, %v1520_v2 }
 0x1e7   : > { %v1522_v8 = vpop.xlane.xlu1 %1521  ;;  %2465 = vpow2.f32 %v1609_v46 }
 0x1e8   : > { %v2456_v22 = vpop.eup %2455  ;;  %v1615_v51 = vmul.f32 1.442695, %v3032_v20  ;;  %v3036_v15 = vsub.f32 %v2908_v26, %v1522_v8  ;;  %1669 = vadd.xlane.f32.xlu1 %v2454_v9 }
 0x1e9   : > { %1663 = vadd.xlane.f32.xlu0 %v2456_v22  ;;  %v1524_v12 = vpop.xlane.xlu0 %1523  ;;  %v2458_v24 = vpop.eup %2457 }
 0x1ea   : > { %2467 = vpow2.f32 %v1615_v51  ;;  %v1617_v13 = vmul.f32 1.442695, %v3036_v15  ;;  %v3040_v27 = vsub.f32 %v2912_v28, %v1524_v12 }
 0x1eb   : > { %v1526_v56 = vpop.xlane.xlu1 %1525 }
 0x1ec   : > { %v2460_v31 = vpop.eup %2459  ;;  %2469 = vpow2.f32 %v1617_v13  ;;  %v1619_v58 = vmul.f32 1.442695, %v3040_v27  ;;  %v3044_v21 = vsub.f32 %v2916_v29, %v1526_v56  ;;  %1665 = vadd.xlane.f32.xlu1 %v2458_v24 }
 0x1ed   : > { %1675 = vadd.xlane.f32.xlu0 %v2460_v31  ;;  %v2462_v23 = vpop.eup %2461 }
 0x1ee   : > { %2471 = vpow2.f32 %v1619_v58  ;;  %v1621_v26 = vmul.f32 1.442695, %v3044_v21 }
 0x1f0   : > { %v2464_v41 = vpop.eup %2463  ;;  %2473 = vpow2.f32 %v1621_v26  ;;  %1677 = vadd.xlane.f32.xlu1 %v2462_v23 }
 0x1f1   : > { %1671 = vadd.xlane.f32.xlu0 %v2464_v41  ;;  %v2466_v28 = vpop.eup %2465 }
 0x1f4   : > { %v2468_v36 = vpop.eup %2467  ;;  %1673 = vadd.xlane.f32.xlu1 %v2466_v28 }
 0x1f5   : > { %1679 = vadd.xlane.f32.xlu0 %v2468_v36 }
 0x1f6   : > { %v2470_v43 = vpop.eup %2469 }
 0x1f8   : > { %v2472_v40 = vpop.eup %2471  ;;  %1681 = vadd.xlane.f32.xlu1 %v2470_v43 }
 0x1f9   : > { %1683 = vadd.xlane.f32.xlu0 %v2472_v40 }
 0x1fa   : > { %v2474_v29 = vpop.eup %2473 }
 0x1fc   : > { %1685 = vadd.xlane.f32.xlu1 %v2474_v29 }
 0x249   : > { %v1628_v42 = vpop.xlane.xlu0 %1627 }
 0x24a   : > { %2475 = vlog2.f32 %v1628_v42 }
 0x24d   : > { %v1624_v25 = vpop.xlane.xlu0 %1623  ;;  %v1630_v50 = vpop.xlane.xlu1 %1629 }
 0x24e   : > { %2477 = vlog2.f32 %v1624_v25 }
 0x24f   : > { %2479 = vlog2.f32 %v1630_v50 }
 0x251   : > { %v1626_v34 = vpop.xlane.xlu1 %1625 }
 0x252   : > { %2481 = vlog2.f32 %v1626_v34  ;;  %v1636_v55 = vpop.xlane.xlu0 %1635 }
 0x253   : > { %2483 = vlog2.f32 %v1636_v55 }
 0x254   : > { %v2476_v53 = vpop.eup %2475 }
 0x255   : > { %v1692_v35 = vmul.f32 0.6931472, %v2476_v53  ;;  %v1638_v37 = vpop.xlane.xlu1 %1637 }
 0x256   : > { %2485 = vlog2.f32 %v1638_v37  ;;  %v1632_v1 = vpop.xlane.xlu0 %1631 }
 0x257   : > { %v1753_v61 = vsub.f32 %v2920_v33, %v1692_v35  ;;  %2487 = vlog2.f32 %v1632_v1 }
 0x258   : > { %v2478_v3 = vpop.eup %2477 }
 0x259   : > { %v2480_v44 = vpop.eup %2479  ;;  %1785 = vst [vmem:[%s3051_s27 + $0x10] sm:$0xff] %v1753_v61  ;;  %v1688_v46 = vmul.f32 0.6931472, %v2478_v3  ;;  %v1634_v2 = vpop.xlane.xlu1 %1633 }
 0x25a   : > { %v1694_v9 = vmul.f32 0.6931472, %v2480_v44  ;;  %2489 = vlog2.f32 %v1634_v2  ;;  %v1644_v8 = vpop.xlane.xlu0 %1643 }
 0x25b   : > { %v1751_v22 = vsub.f32 %v2923_v38, %v1688_v46  ;;  %2491 = vlog2.f32 %v1644_v8 }
 0x25c   : > { %v2482_v51 = vpop.eup %2481  ;;  %v1754_v12 = vsub.f32 %v2928_v45, %v1694_v9 }
 0x25d   : > { %v2484_v13 = vpop.eup %2483  ;;  %1783 = vst [vmem:[%s3051_s27] sm:$0xff] %v1751_v22  ;;  %v1690_v33 = vmul.f32 0.6931472, %v2482_v51  ;;  %v1646_v24 = vpop.xlane.xlu1 %1645 }
 0x25e   : > { %1786 = vst [vmem:[%s3051_s27 + $0x18] sm:$0xff] %v1754_v12  ;;  %v1700_v56 = vmul.f32 0.6931472, %v2484_v13  ;;  %2493 = vlog2.f32 %v1646_v24  ;;  %v1640_v31 = vpop.xlane.xlu0 %1639 }
 0x25f   : > { %v1752_v58 = vsub.f32 %v2931_v47, %v1690_v33  ;;  %2495 = vlog2.f32 %v1640_v31 }
 0x260   : > { %v2486_v26 = vpop.eup %2485  ;;  %v1757_v38 = vsub.f32 %v2936_v52, %v1700_v56 }
 0x261   : > { %v2488_v23 = vpop.eup %2487  ;;  %1784 = vst [vmem:[%s3051_s27 + $0x8] sm:$0xff] %v1752_v58  ;;  %v1702_v45 = vmul.f32 0.6931472, %v2486_v26  ;;  %v1642_v41 = vpop.xlane.xlu1 %1641 }
 0x262   : > { %1789 = vst [vmem:[%s3051_s27 + $0x30] sm:$0xff] %v1757_v38  ;;  %v1696_v28 = vmul.f32 0.6931472, %v2488_v23  ;;  %2497 = vlog2.f32 %v1642_v41  ;;  %v1652_v36 = vpop.xlane.xlu0 %1651 }
 0x263   : > { %v1758_v43 = vsub.f32 %v2939_v54, %v1702_v45  ;;  %2499 = vlog2.f32 %v1652_v36 }
 0x264   : > { %v2490_v40 = vpop.eup %2489  ;;  %v1755_v47 = vsub.f32 %v2944_v59, %v1696_v28 }
 0x265   : > { %v2492_v29 = vpop.eup %2491  ;;  %1790 = vst [vmem:[%s3051_s27 + $0x38] sm:$0xff] %v1758_v43  ;;  %v1698_v52 = vmul.f32 0.6931472, %v2490_v40  ;;  %v1654_v42 = vpop.xlane.xlu1 %1653 }
 0x266   : > { %1787 = vst [vmem:[%s3051_s27 + $0x20] sm:$0xff] %v1755_v47  ;;  %v1708_v25 = vmul.f32 0.6931472, %v2492_v29  ;;  %2501 = vlog2.f32 %v1654_v42  ;;  %v1648_v50 = vpop.xlane.xlu0 %1647 }
 0x267   : > { %v1756_v34 = vsub.f32 %v2947_v0, %v1698_v52  ;;  %2503 = vlog2.f32 %v1648_v50 }
 0x268   : > { %v2494_v55 = vpop.eup %2493  ;;  %v1761_v54 = vsub.f32 %v2952_v7, %v1708_v25 }
 0x269   : > { %v2496_v53 = vpop.eup %2495  ;;  %1788 = vst [vmem:[%s3051_s27 + $0x28] sm:$0xff] %v1756_v34  ;;  %v1710_v59 = vmul.f32 0.6931472, %v2494_v55  ;;  %v1650_v35 = vpop.xlane.xlu1 %1649 }
 0x26a   : > { %1793 = vst [vmem:[%s3051_s27 + $0x50] sm:$0xff] %v1761_v54  ;;  %v1704_v37 = vmul.f32 0.6931472, %v2496_v53  ;;  %2505 = vlog2.f32 %v1650_v35  ;;  %v1660_v1 = vpop.xlane.xlu0 %1659 }
 0x26b   : > { %v1762_v61 = vsub.f32 %v2955_v11, %v1710_v59  ;;  %2507 = vlog2.f32 %v1660_v1 }
 0x26c   : > { %v2498_v3 = vpop.eup %2497  ;;  %v1759_v0 = vsub.f32 %v2960_v16, %v1704_v37 }
 0x26d   : > { %v2500_v44 = vpop.eup %2499  ;;  %1794 = vst [vmem:[%s3051_s27 + $0x58] sm:$0xff] %v1762_v61  ;;  %v1706_v7 = vmul.f32 0.6931472, %v2498_v3  ;;  %v1662_v46 = vpop.xlane.xlu1 %1661 }
 0x26e   : > { %1791 = vst [vmem:[%s3051_s27 + $0x40] sm:$0xff] %v1759_v0  ;;  %v1716_v2 = vmul.f32 0.6931472, %v2500_v44  ;;  %2509 = vlog2.f32 %v1662_v46  ;;  %v1656_v9 = vpop.xlane.xlu0 %1655 }
 0x26f   : > { %v1760_v8 = vsub.f32 %v2963_v18, %v1706_v7  ;;  %2511 = vlog2.f32 %v1656_v9 }
 0x270   : > { %v2502_v22 = vpop.eup %2501  ;;  %v1765_v11 = vsub.f32 %v2968_v30, %v1716_v2 }
 0x271   : > { %v2504_v51 = vpop.eup %2503  ;;  %1792 = vst [vmem:[%s3051_s27 + $0x48] sm:$0xff] %v1760_v8  ;;  %v1718_v16 = vmul.f32 0.6931472, %v2502_v22  ;;  %v1658_v12 = vpop.xlane.xlu1 %1657 }
 0x272   : > { %1797 = vst [vmem:[%s3051_s27 + $0x70] sm:$0xff] %v1765_v11  ;;  %v1712_v13 = vmul.f32 0.6931472, %v2504_v51  ;;  %2513 = vlog2.f32 %v1658_v12  ;;  %v1668_v33 = vpop.xlane.xlu0 %1667 }
 0x273   : > { %v1766_v24 = vsub.f32 %v2971_v39, %v1718_v16  ;;  %2515 = vlog2.f32 %v1668_v33 }
 0x274   : > { %v2506_v56 = vpop.eup %2505  ;;  %v1763_v18 = vsub.f32 %v2976_v32, %v1712_v13 }
 0x275   : > { %v2508_v31 = vpop.eup %2507  ;;  %1798 = vst [vmem:[%s3051_s27 + $0x78] sm:$0xff] %v1766_v24  ;;  %v1714_v30 = vmul.f32 0.6931472, %v2506_v56  ;;  %v1670_v58 = vpop.xlane.xlu1 %1669 }
 0x276   : > { %1795 = vst [vmem:[%s3051_s27 + $0x60] sm:$0xff] %v1763_v18  ;;  %v1724_v26 = vmul.f32 0.6931472, %v2508_v31  ;;  %2517 = vlog2.f32 %v1670_v58  ;;  %v1664_v38 = vpop.xlane.xlu0 %1663 }
 0x277   : > { %v1764_v23 = vsub.f32 %v2979_v49, %v1714_v30  ;;  %2519 = vlog2.f32 %v1664_v38 }
 0x278   : > { %v2510_v45 = vpop.eup %2509  ;;  %v1769_v39 = vsub.f32 %v2984_v57, %v1724_v26 }
 0x279   : > { %v2512_v41 = vpop.eup %2511  ;;  %1796 = vst [vmem:[%s3051_s27 + $0x68] sm:$0xff] %v1764_v23  ;;  %v1726_v32 = vmul.f32 0.6931472, %v2510_v45  ;;  %v1666_v28 = vpop.xlane.xlu1 %1665 }
 0x27a   : > { %1801 = vst [vmem:[%s3051_s27 + $0x90] sm:$0xff] %v1769_v39  ;;  %v1720_v36 = vmul.f32 0.6931472, %v2512_v41  ;;  %2521 = vlog2.f32 %v1666_v28  ;;  %v1676_v43 = vpop.xlane.xlu0 %1675 }
 0x27b   : > { %v1770_v40 = vsub.f32 %v2987_v62, %v1726_v32  ;;  %2523 = vlog2.f32 %v1676_v43 }
 0x27c   : > { %v2514_v47 = vpop.eup %2513  ;;  %v1767_v49 = vsub.f32 %v2992_v5, %v1720_v36 }
 0x27d   : > { %v2516_v29 = vpop.eup %2515  ;;  %1802 = vst [vmem:[%s3051_s27 + $0x98] sm:$0xff] %v1770_v40  ;;  %v1722_v57 = vmul.f32 0.6931472, %v2514_v47  ;;  %v1678_v52 = vpop.xlane.xlu1 %1677 }
 0x27e   : > { %1799 = vst [vmem:[%s3051_s27 + $0x80] sm:$0xff] %v1767_v49  ;;  %v1732_v42 = vmul.f32 0.6931472, %v2516_v29  ;;  %2525 = vlog2.f32 %v1678_v52  ;;  %v1672_v25 = vpop.xlane.xlu0 %1671 }
 0x27f   : > { %v1768_v50 = vsub.f32 %v2995_v48, %v1722_v57  ;;  %2527 = vlog2.f32 %v1672_v25 }
 0x280   : > { %v2518_v34 = vpop.eup %2517  ;;  %v1773_v62 = vsub.f32 %v3000_v17, %v1732_v42 }
 0x281   : > { %v2520_v55 = vpop.eup %2519  ;;  %1800 = vst [vmem:[%s3051_s27 + $0x88] sm:$0xff] %v1768_v50  ;;  %v1734_v5 = vmul.f32 0.6931472, %v2518_v34  ;;  %v1674_v54 = vpop.xlane.xlu1 %1673 }
 0x282   : > { %1805 = vst [vmem:[%s3051_s27 + $0xb0] sm:$0xff] %v1773_v62  ;;  %v1728_v53 = vmul.f32 0.6931472, %v2520_v55  ;;  %2529 = vlog2.f32 %v1674_v54  ;;  %v1680_v59 = vpop.xlane.xlu0 %1679 }
 0x283   : > { %v1774_v35 = vsub.f32 %v3003_v19, %v1734_v5  ;;  %2531 = vlog2.f32 %v1680_v59 }
 0x284   : > { %v2522_v37 = vpop.eup %2521  ;;  %v1771_v48 = vsub.f32 %v3008_v60, %v1728_v53 }
 0x285   : > { %v2524_v1 = vpop.eup %2523  ;;  %1806 = vst [vmem:[%s3051_s27 + $0xb8] sm:$0xff] %v1774_v35  ;;  %v1730_v17 = vmul.f32 0.6931472, %v2522_v37  ;;  %v1682_v61 = vpop.xlane.xlu1 %1681 }
 0x286   : > { %1803 = vst [vmem:[%s3051_s27 + $0xa0] sm:$0xff] %v1771_v48  ;;  %v1740_v3 = vmul.f32 0.6931472, %v2524_v1  ;;  %2533 = vlog2.f32 %v1682_v61  ;;  %v1684_v0 = vpop.xlane.xlu0 %1683 }
 0x287   : > { %v1772_v44 = vsub.f32 %v3011_v63, %v1730_v17  ;;  %2535 = vlog2.f32 %v1684_v0 }
 0x288   : > { %v2526_v19 = vpop.eup %2525  ;;  %v1777_v7 = vsub.f32 %v3016_v4, %v1740_v3 }
 0x289   : > { %v2528_v46 = vpop.eup %2527  ;;  %1804 = vst [vmem:[%s3051_s27 + $0xa8] sm:$0xff] %v1772_v44  ;;  %v1742_v60 = vmul.f32 0.6931472, %v2526_v19  ;;  %v1686_v2 = vpop.xlane.xlu1 %1685 }
 0x28a   : > { %1809 = vst [vmem:[%s3051_s27 + $0xd0] sm:$0xff] %v1777_v7  ;;  %v1736_v9 = vmul.f32 0.6931472, %v2528_v46  ;;  %2537 = vlog2.f32 %v1686_v2 }
 0x28b   : > { %v1778_v8 = vsub.f32 %v3019_v6, %v1742_v60 }
 0x28c   : > { %v2530_v22 = vpop.eup %2529  ;;  %v1775_v11 = vsub.f32 %v3024_v10, %v1736_v9 }
 0x28d   : > { %v2532_v63 = vpop.eup %2531  ;;  %1810 = vst [vmem:[%s3051_s27 + $0xd8] sm:$0xff] %v1778_v8  ;;  %v1738_v51 = vmul.f32 0.6931472, %v2530_v22 }
 0x28e   : > { %1807 = vst [vmem:[%s3051_s27 + $0xc0] sm:$0xff] %v1775_v11  ;;  %v1744_v4 = vmul.f32 0.6931472, %v2532_v63 }
 0x28f   : > { %v1776_v16 = vsub.f32 %v3027_v14, %v1738_v51 }
 0x290   : > { %v2534_v12 = vpop.eup %2533  ;;  %v1779_v13 = vsub.f32 %v3032_v20, %v1744_v4 }
 0x291   : > { %v2536_v33 = vpop.eup %2535  ;;  %1808 = vst [vmem:[%s3051_s27 + $0xc8] sm:$0xff] %v1776_v16  ;;  %v1746_v24 = vmul.f32 0.6931472, %v2534_v12 }
 0x292   : > { %1811 = vst [vmem:[%s3051_s27 + $0xe0] sm:$0xff] %v1779_v13  ;;  %v1748_v6 = vmul.f32 0.6931472, %v2536_v33 }
 0x293   : > { %v1780_v10 = vsub.f32 %v3036_v15, %v1746_v24 }
 0x294   : > { %v2538_v56 = vpop.eup %2537  ;;  %v1781_v18 = vsub.f32 %v3040_v27, %v1748_v6 }
 0x295   : > { %1812 = vst [vmem:[%s3051_s27 + $0xe8] sm:$0xff] %v1780_v10  ;;  %v1750_v31 = vmul.f32 0.6931472, %v2538_v56 }
 0x296   : > { %1813 = vst [vmem:[%s3051_s27 + $0xf0] sm:$0xff] %v1781_v18 }
 0x297   : > { %v1782_v30 = vsub.f32 %v3044_v21, %v1750_v31 }
 0x299   : > { %1814 = vst [vmem:[%s3051_s27 + $0xf8] sm:$0xff] %v1782_v30 }
 0x29a PF: > { %s17_s24 = sadd.s32 1, %s2545_s24  }
 0x29b   : > { %p14_p4 = scmp.ge.s32.totalorder %s17_s24, 4  }
 0x29d   :  { %16 = sbr.rel (!%p14_p4) target bundleno = 1 (0x1), region = 90 }

// kernel: net_forward.7
= control target key start
LH: loop header
LB: loop body
LE: loop exit
PB: predicated region body
PF: predicated region fallthrough
CT: control target
= control target key end

     0   :  { %s2585_s9 = smov 0   ;;  %s2587_s10 = smov 0   ;;  %s2917_s0 = inlined_call_operand.vmem [shape: bf16[512,512], index: 0, kind: input, shape index: {}]   ;;  %s2918_s1 = inlined_call_operand.vmem [shape: bf16[512,256], index: 1, kind: input, shape index: {}]   ;;  %s2919_s2 = inlined_call_operand.vmem [shape: bf16[512,256], index: 2, kind: output, shape index: {}]  }
   0x1   :  { %s2589_s11 = smov 0  }
   0x2 LB: > { %s31_s12 = sadd.s32 1, %s2564_s10  ;;  %p2063_p0 = scmp.ge.s32.totalorder %s2568_s11, 1  ;;  %s2568_s11 = sphi %s2589_s11, %s12_s11   ;;  %s2564_s10 = sphi %s2587_s10, %s2921_s10   ;;  %s2560_s9 = sphi %s2585_s9, %s2920_s9  }
   0x3   : > { %p33_p1 = scmp.ge.s32.totalorder %s31_s12, 2  ;;  %p161_p2 = scmp.lt.s32.totalorder %s2568_s11, 3 }
   0x5   : > { %s2923_s12 = smov (%p33_p1, %s31_s12), 0  ;;  %p162_p3 = pnand %p2063_p0, %p161_p2 }
   0x6   : > { %v2354_v0 = vld [vmem:[%s2918_s1 + $0x4] ss:$8 sps:$4 sm:$0xff] (!%p162_p3)   ;;  %v2358_v2 = vld [vmem:[%s2918_s1] ss:$8 sps:$4 sm:$0xff] (!%p162_p3)   ;;  %v2360_v4 = vld [vmem:[%s2918_s1 + $0x14] ss:$8 sps:$4 sm:$0xff] (!%p162_p3)  }
   0x7   : > { %165 = sbr.rel (%p162_p3) target bundleno = 412 (0x19c), region = 28  ;;  %v2356_v1 = vld [vmem:[%s2918_s1 + $0x104] ss:$8 sps:$4 sm:$0xff] (!%p162_p3)   ;;  %1139 = vmatprep.subr.bf16.mxu1 (!%p162_p3), %v2354_v0  ;;  %v2359_v3 = vld [vmem:[%s2918_s1 + $0x100] ss:$8 sps:$4 sm:$0xff] (!%p162_p3)   ;;  %s2064_s25 = sshll.u32 (!%p162_p3), %s2560_s9, 5 }
   0x8   : > { %1332 = vmatprep.subr.bf16.mxu0 (!%p162_p3), %v2356_v1  ;;  %1140 = vmatpush1.bf16.msra.mxu1 (!%p162_p3), %v2358_v2  ;;  %v2362_v5 = vld [vmem:[%s2918_s1 + $0x114] ss:$8 sps:$4 sm:$0xff] (!%p162_p3)   ;;  %v2364_v6 = vld [vmem:[%s2918_s1 + $0x10] ss:$8 sps:$4 sm:$0xff] (!%p162_p3)   ;;  %v2366_v8 = vld [vmem:[%s2918_s1 + $0x24] ss:$8 sps:$4 sm:$0xff] (!%p162_p3)  }
   0x9   : > { %1333 = vmatpush1.bf16.msra.mxu0 (!%p162_p3), %v2359_v3  ;;  %1141 = vmatprep.subr.bf16.mxu1 (!%p162_p3), %v2360_v4  ;;  %v2365_v7 = vld [vmem:[%s2918_s1 + $0x110] ss:$8 sps:$4 sm:$0xff] (!%p162_p3)   ;;  %v2368_v9 = vld [vmem:[%s2918_s1 + $0x124] ss:$8 sps:$4 sm:$0xff] (!%p162_p3)   ;;  %v2370_v10 = vld [vmem:[%s2918_s1 + $0x20] ss:$8 sps:$4 sm:$0xff] (!%p162_p3)  }
   0xa   : > { %1334 = vmatprep.subr.bf16.mxu0 (!%p162_p3), %v2362_v5  ;;  %v2371_v11 = vld [vmem:[%s2918_s1 + $0x120] ss:$8 sps:$4 sm:$0xff] (!%p162_p3)   ;;  %v2372_v12 = vld [vmem:[%s2918_s1 + $0x34] ss:$8 sps:$4 sm:$0xff] (!%p162_p3)   ;;  %v2376_v14 = vld [vmem:[%s2918_s1 + $0x30] ss:$8 sps:$4 sm:$0xff] (!%p162_p3)  }
   0xb   : > { %v2374_v13 = vld [vmem:[%s2918_s1 + $0x134] ss:$8 sps:$4 sm:$0xff] (!%p162_p3)   ;;  %v2377_v15 = vld [vmem:[%s2918_s1 + $0x130] ss:$8 sps:$4 sm:$0xff] (!%p162_p3)   ;;  %v2378_v16 = vld [vmem:[%s2918_s1 + $0x44] ss:$8 sps:$4 sm:$0xff] (!%p162_p3)  }
   0xc   : > { %1142 = vmatpush1.bf16.msra.mxu1 (!%p162_p3), %v2364_v6  ;;  %v2380_v17 = vld [vmem:[%s2918_s1 + $0x144] ss:$8 sps:$4 sm:$0xff] (!%p162_p3)   ;;  %v2382_v18 = vld [vmem:[%s2918_s1 + $0x40] ss:$8 sps:$4 sm:$0xff] (!%p162_p3)   ;;  %v2384_v20 = vld [vmem:[%s2918_s1 + $0x54] ss:$8 sps:$4 sm:$0xff] (!%p162_p3)  }
   0xd   : > { %1335 = vmatpush1.bf16.msra.mxu0 (!%p162_p3), %v2365_v7  ;;  %1143 = vmatprep.subr.bf16.mxu1 (!%p162_p3), %v2366_v8  ;;  %v2383_v19 = vld [vmem:[%s2918_s1 + $0x140] ss:$8 sps:$4 sm:$0xff] (!%p162_p3)   ;;  %v2386_v21 = vld [vmem:[%s2918_s1 + $0x154] ss:$8 sps:$4 sm:$0xff] (!%p162_p3)   ;;  %v2388_v22 = vld [vmem:[%s2918_s1 + $0x50] ss:$8 sps:$4 sm:$0xff] (!%p162_p3)  }
   0xe   : > { %1336 = vmatprep.subr.bf16.mxu0 %v2368_v9  ;;  %v2389_v23 = vld [vmem:[%s2918_s1 + $0x150] ss:$8 sps:$4 sm:$0xff]   ;;  %v2390_v24 = vld [vmem:[%s2918_s1 + $0x64] ss:$8 sps:$4 sm:$0xff]   ;;  %v2394_v26 = vld [vmem:[%s2918_s1 + $0x60] ss:$8 sps:$4 sm:$0xff]  }
   0xf   : > { %v2392_v25 = vld [vmem:[%s2918_s1 + $0x164] ss:$8 sps:$4 sm:$0xff]   ;;  %v2395_v27 = vld [vmem:[%s2918_s1 + $0x160] ss:$8 sps:$4 sm:$0xff]   ;;  %v2396_v28 = vld [vmem:[%s2918_s1 + $0x74] ss:$8 sps:$4 sm:$0xff]  }
  0x10   : > { %1144 = vmatpush1.bf16.msra.mxu1 %v2370_v10  ;;  %v2398_v29 = vld [vmem:[%s2918_s1 + $0x174] ss:$8 sps:$4 sm:$0xff]   ;;  %v2400_v30 = vld [vmem:[%s2918_s1 + $0x70] ss:$8 sps:$4 sm:$0xff]   ;;  %v2402_v32 = vld [vmem:[%s2918_s1 + $0x84] ss:$8 sps:$4 sm:$0xff]  }
  0x11   : > { %1337 = vmatpush1.bf16.msra.mxu0 %v2371_v11  ;;  %1145 = vmatprep.subr.bf16.mxu1 %v2372_v12  ;;  %v2401_v31 = vld [vmem:[%s2918_s1 + $0x170] ss:$8 sps:$4 sm:$0xff]   ;;  %v2404_v33 = vld [vmem:[%s2918_s1 + $0x184] ss:$8 sps:$4 sm:$0xff]   ;;  %p205_p4 = scmp.lt.s32.totalorder %s2064_s25, 63 }
  0x12   : > { %1338 = vmatprep.subr.bf16.mxu0 %v2374_v13  ;;  %v2406_v34 = vld [vmem:[%s2918_s1 + $0x80] ss:$8 sps:$4 sm:$0xff]   ;;  %v2408_v36 = vld [vmem:[%s2918_s1 + $0x94] ss:$8 sps:$4 sm:$0xff]   ;;  %v2412_v38 = vld [vmem:[%s2918_s1 + $0x90] ss:$8 sps:$4 sm:$0xff]  }
  0x13   : > { %v2407_v35 = vld [vmem:[%s2918_s1 + $0x180] ss:$8 sps:$4 sm:$0xff]   ;;  %v2410_v37 = vld [vmem:[%s2918_s1 + $0x194] ss:$8 sps:$4 sm:$0xff]   ;;  %s2925_s25 = smov (!%p205_p4, %s2064_s25), 63 }
  0x14   : > { %1146 = vmatpush1.bf16.msra.mxu1 %v2376_v14  ;;  %v2413_v39 = vld [vmem:[%s2918_s1 + $0x190] ss:$8 sps:$4 sm:$0xff]   ;;  %v2414_v40 = vld [vmem:[%s2918_s1 + $0xa4] ss:$8 sps:$4 sm:$0xff]   ;;  %s2232_s26 = sshll.u32 %s2925_s25, 4  ;;  %s2233_s27 = sshll.u32 %s2925_s25, 3 }
  0x15   : > { %1339 = vmatpush1.bf16.msra.mxu0 %v2377_v15  ;;  %1147 = vmatprep.subr.bf16.mxu1 %v2378_v16  ;;  %v2416_v41 = vld [vmem:[%s2918_s1 + $0x1a4] ss:$8 sps:$4 sm:$0xff]   ;;  %v2418_v42 = vld [vmem:[%s2918_s1 + $0xa0] ss:$8 sps:$4 sm:$0xff]   ;;  %v2420_v44 = vld [vmem:[%s2918_s1 + $0xb4] ss:$8 sps:$4 sm:$0xff]   ;;  %s2747_s6 = scalar_lea.vmem %s2917_s0, %s2232_s26  ;;  %s2874_s30 = scalar_lea.vmem %s2919_s2, %s2233_s27 }
  0x16   : > { %1340 = vmatprep.subr.bf16.mxu0 %v2380_v17  ;;  %v2419_v43 = vld [vmem:[%s2918_s1 + $0x1a0] ss:$8 sps:$4 sm:$0xff]   ;;  %v2422_v45 = vld [vmem:[%s2918_s1 + $0x1b4] ss:$8 sps:$4 sm:$0xff]   ;;  %v2424_v46 = vld [vmem:[%s2918_s1 + $0xb0] ss:$8 sps:$4 sm:$0xff]  }
  0x17   : > { %v2425_v47 = vld [vmem:[%s2918_s1 + $0x1b0] ss:$8 sps:$4 sm:$0xff]   ;;  %v2426_v48 = vld [vmem:[%s2918_s1 + $0xc4] ss:$8 sps:$4 sm:$0xff]   ;;  %v2430_v52 = vld [vmem:[%s2918_s1 + $0xc0] ss:$8 sps:$4 sm:$0xff]  }
  0x18   : > { %1148 = vmatpush1.bf16.msra.mxu1 %v2382_v18  ;;  %v2452_v49 = vld [vmem:[%s2747_s6 + $0x4] ss:$16 sps:$4 sm:$0xff]   ;;  %v2455_v51 = vld [vmem:[%s2747_s6 + $0xc] ss:$16 sps:$4 sm:$0xff]   ;;  %v2431_v53 = vld [vmem:[%s2918_s1 + $0x1c0] ss:$8 sps:$4 sm:$0xff]  }
  0x19   : > { %1341 = vmatpush1.bf16.msra.mxu0 %v2383_v19  ;;  %1149 = vmatprep.subr.bf16.mxu1 %v2384_v20  ;;  %v2428_v50 = vld [vmem:[%s2918_s1 + $0x1c4] ss:$8 sps:$4 sm:$0xff]   ;;  %v2432_v54 = vld [vmem:[%s2918_s1 + $0xd4] ss:$8 sps:$4 sm:$0xff]   ;;  %v2436_v56 = vld [vmem:[%s2918_s1 + $0xd0] ss:$8 sps:$4 sm:$0xff]  }
  0x1a   : > { %1342 = vmatprep.subr.bf16.mxu0 %v2386_v21  ;;  %1171 = vmatprep.mubr.bf16.mxu1 %v2452_v49  ;;  %v2434_v55 = vld [vmem:[%s2918_s1 + $0x1d4] ss:$8 sps:$4 sm:$0xff]   ;;  %v2437_v57 = vld [vmem:[%s2918_s1 + $0x1d0] ss:$8 sps:$4 sm:$0xff]   ;;  %v2438_v58 = vld [vmem:[%s2918_s1 + $0xe4] ss:$8 sps:$4 sm:$0xff]  }
  0x1b   : > { %1364 = vmatprep.mubr.bf16.mxu0 %v2455_v51  ;;  %v2440_v59 = vld [vmem:[%s2918_s1 + $0x1e4] ss:$8 sps:$4 sm:$0xff]   ;;  %v2442_v60 = vld [vmem:[%s2918_s1 + $0xe0] ss:$8 sps:$4 sm:$0xff]   ;;  %v2444_v62 = vld [vmem:[%s2918_s1 + $0xf4] ss:$8 sps:$4 sm:$0xff]  }
  0x1c   : > { %1150 = vmatpush1.bf16.msra.mxu1 %v2388_v22  ;;  %v2443_v61 = vld [vmem:[%s2918_s1 + $0x1e0] ss:$8 sps:$4 sm:$0xff]   ;;  %v2446_v63 = vld [vmem:[%s2918_s1 + $0x1f4] ss:$8 sps:$4 sm:$0xff]   ;;  %v2448_v0 = vld [vmem:[%s2918_s1 + $0xf0] ss:$8 sps:$4 sm:$0xff]  }
  0x1d   : > { %1343 = vmatpush1.bf16.msra.mxu0 %v2389_v23  ;;  %1151 = vmatprep.subr.bf16.mxu1 %v2390_v24  ;;  %v2449_v1 = vld [vmem:[%s2918_s1 + $0x1f0] ss:$8 sps:$4 sm:$0xff]   ;;  %v2456_v4 = vld [vmem:[%s2747_s6 + $0x24] ss:$16 sps:$4 sm:$0xff]   ;;  %v2458_v5 = vld [vmem:[%s2747_s6 + $0x2c] ss:$16 sps:$4 sm:$0xff]  }
  0x1e   : > { %1344 = vmatprep.subr.bf16.mxu0 %v2392_v25  ;;  %v2450_v2 = vld [vmem:[%s2747_s6] ss:$16 sps:$4 sm:$0xff]   ;;  %v2453_v3 = vld [vmem:[%s2747_s6 + $0x8] ss:$16 sps:$4 sm:$0xff]   ;;  %v2462_v8 = vld [vmem:[%s2747_s6 + $0x44] ss:$16 sps:$4 sm:$0xff]  }
  0x1f   : > { %v2460_v6 = vld [vmem:[%s2747_s6 + $0x20] ss:$16 sps:$4 sm:$0xff]   ;;  %v2461_v7 = vld [vmem:[%s2747_s6 + $0x28] ss:$16 sps:$4 sm:$0xff]   ;;  %v2464_v9 = vld [vmem:[%s2747_s6 + $0x4c] ss:$16 sps:$4 sm:$0xff]  }
  0x20   : > { %1152 = vmatpush1.bf16.msra.mxu1 %v2394_v26  ;;  %v2466_v10 = vld [vmem:[%s2747_s6 + $0x40] ss:$16 sps:$4 sm:$0xff]   ;;  %v2467_v11 = vld [vmem:[%s2747_s6 + $0x48] ss:$16 sps:$4 sm:$0xff]   ;;  %v2468_v12 = vld [vmem:[%s2747_s6 + $0x64] ss:$16 sps:$4 sm:$0xff]  }
  0x21   : > { %1345 = vmatpush1.bf16.msra.mxu0 %v2395_v27  ;;  %1153 = vmatprep.subr.bf16.mxu1 %v2396_v28  ;;  %v2470_v13 = vld [vmem:[%s2747_s6 + $0x6c] ss:$16 sps:$4 sm:$0xff]   ;;  %v2472_v14 = vld [vmem:[%s2747_s6 + $0x60] ss:$16 sps:$4 sm:$0xff]   ;;  %v2473_v15 = vld [vmem:[%s2747_s6 + $0x68] ss:$16 sps:$4 sm:$0xff]  }
  0x22   : > { %1346 = vmatprep.subr.bf16.mxu0 %v2398_v29  ;;  %v2474_v16 = vld [vmem:[%s2747_s6 + $0x84] ss:$16 sps:$4 sm:$0xff]   ;;  %v2476_v17 = vld [vmem:[%s2747_s6 + $0x8c] ss:$16 sps:$4 sm:$0xff]   ;;  %v2478_v18 = vld [vmem:[%s2747_s6 + $0x80] ss:$16 sps:$4 sm:$0xff]  }
  0x23   : > { %v2479_v19 = vld [vmem:[%s2747_s6 + $0x88] ss:$16 sps:$4 sm:$0xff]   ;;  %v2480_v20 = vld [vmem:[%s2747_s6 + $0xa4] ss:$16 sps:$4 sm:$0xff]   ;;  %v2482_v21 = vld [vmem:[%s2747_s6 + $0xac] ss:$16 sps:$4 sm:$0xff]  }
  0x24   : > { %1154 = vmatpush1.bf16.msra.mxu1 %v2400_v30  ;;  %v2484_v22 = vld [vmem:[%s2747_s6 + $0xa0] ss:$16 sps:$4 sm:$0xff]   ;;  %v2485_v23 = vld [vmem:[%s2747_s6 + $0xa8] ss:$16 sps:$4 sm:$0xff]   ;;  %v2486_v24 = vld [vmem:[%s2747_s6 + $0xc4] ss:$16 sps:$4 sm:$0xff]  }
  0x25   : > { %1347 = vmatpush1.bf16.msra.mxu0 %v2401_v31  ;;  %1155 = vmatprep.subr.bf16.mxu1 %v2402_v32  ;;  %v2488_v25 = vld [vmem:[%s2747_s6 + $0xcc] ss:$16 sps:$4 sm:$0xff]   ;;  %v2490_v26 = vld [vmem:[%s2747_s6 + $0xc0] ss:$16 sps:$4 sm:$0xff]   ;;  %v2491_v27 = vld [vmem:[%s2747_s6 + $0xc8] ss:$16 sps:$4 sm:$0xff]  }
  0x26   : > { %1348 = vmatprep.subr.bf16.mxu0 %v2404_v33  ;;  %v2492_v28 = vld [vmem:[%s2747_s6 + $0xe4] ss:$16 sps:$4 sm:$0xff]   ;;  %v2494_v29 = vld [vmem:[%s2747_s6 + $0xec] ss:$16 sps:$4 sm:$0xff]   ;;  %v2496_v30 = vld [vmem:[%s2747_s6 + $0xe0] ss:$16 sps:$4 sm:$0xff]  }
  0x27   : > { %v2497_v31 = vld [vmem:[%s2747_s6 + $0xe8] ss:$16 sps:$4 sm:$0xff]   ;;  %v2498_v32 = vld [vmem:[%s2747_s6 + $0x104] ss:$16 sps:$4 sm:$0xff]   ;;  %v2500_v33 = vld [vmem:[%s2747_s6 + $0x10c] ss:$16 sps:$4 sm:$0xff]  }
  0x28   : > { %1156 = vmatpush1.bf16.msra.mxu1 %v2406_v34  ;;  %v2502_v34 = vld [vmem:[%s2747_s6 + $0x100] ss:$16 sps:$4 sm:$0xff]   ;;  %v2524_v49 = vld [vmem:[%s2747_s6 + $0x18c] ss:$16 sps:$4 sm:$0xff]   ;;  %v2527_v51 = vld [vmem:[%s2747_s6 + $0x188] ss:$16 sps:$4 sm:$0xff]  }
  0x29   : > { %1349 = vmatpush1.bf16.msra.mxu0 %v2407_v35  ;;  %1157 = vmatprep.subr.bf16.mxu1 %v2408_v36  ;;  %v2503_v35 = vld [vmem:[%s2747_s6 + $0x108] ss:$16 sps:$4 sm:$0xff]   ;;  %v2504_v36 = vld [vmem:[%s2747_s6 + $0x124] ss:$16 sps:$4 sm:$0xff]  }
  0x2a   : > { %1350 = vmatprep.subr.bf16.mxu0 %v2410_v37  ;;  %v2506_v37 = vld [vmem:[%s2747_s6 + $0x12c] ss:$16 sps:$4 sm:$0xff]  }
  0x2c   : > { %1158 = vmatpush1.bf16.msra.mxu1 %v2412_v38  ;;  %v2508_v38 = vld [vmem:[%s2747_s6 + $0x120] ss:$16 sps:$4 sm:$0xff]  }
  0x2d   : > { %1351 = vmatpush1.bf16.msra.mxu0 %v2413_v39  ;;  %1159 = vmatprep.subr.bf16.mxu1 %v2414_v40  ;;  %v2509_v39 = vld [vmem:[%s2747_s6 + $0x128] ss:$16 sps:$4 sm:$0xff]   ;;  %v2510_v40 = vld [vmem:[%s2747_s6 + $0x144] ss:$16 sps:$4 sm:$0xff]  }
  0x2e   : > { %1352 = vmatprep.subr.bf16.mxu0 %v2416_v41  ;;  %v2512_v41 = vld [vmem:[%s2747_s6 + $0x14c] ss:$16 sps:$4 sm:$0xff]  }
  0x30   : > { %1160 = vmatpush1.bf16.msra.mxu1 %v2418_v42  ;;  %v2514_v42 = vld [vmem:[%s2747_s6 + $0x140] ss:$16 sps:$4 sm:$0xff]  }
  0x31   : > { %1353 = vmatpush1.bf16.msra.mxu0 %v2419_v43  ;;  %1161 = vmatprep.subr.bf16.mxu1 %v2420_v44  ;;  %v2515_v43 = vld [vmem:[%s2747_s6 + $0x148] ss:$16 sps:$4 sm:$0xff]   ;;  %v2516_v44 = vld [vmem:[%s2747_s6 + $0x164] ss:$16 sps:$4 sm:$0xff]  }
  0x32   : > { %1354 = vmatprep.subr.bf16.mxu0 %v2422_v45  ;;  %v2518_v45 = vld [vmem:[%s2747_s6 + $0x16c] ss:$16 sps:$4 sm:$0xff]  }
  0x34   : > { %1162 = vmatpush1.bf16.msra.mxu1 %v2424_v46  ;;  %v2520_v46 = vld [vmem:[%s2747_s6 + $0x160] ss:$16 sps:$4 sm:$0xff]  }
  0x35   : > { %1355 = vmatpush1.bf16.msra.mxu0 %v2425_v47  ;;  %1163 = vmatprep.subr.bf16.mxu1 %v2426_v48  ;;  %v2521_v47 = vld [vmem:[%s2747_s6 + $0x168] ss:$16 sps:$4 sm:$0xff]   ;;  %v2522_v48 = vld [vmem:[%s2747_s6 + $0x184] ss:$16 sps:$4 sm:$0xff]  }
  0x36   : > { %1356 = vmatprep.subr.bf16.mxu0 %v2428_v50  ;;  %v2526_v50 = vld [vmem:[%s2747_s6 + $0x180] ss:$16 sps:$4 sm:$0xff]  }
  0x38   : > { %1164 = vmatpush1.bf16.msra.mxu1 %v2430_v52  ;;  %v2528_v52 = vld [vmem:[%s2747_s6 + $0x1a4] ss:$16 sps:$4 sm:$0xff]  }
  0x39   : > { %1357 = vmatpush1.bf16.msra.mxu0 %v2431_v53  ;;  %1165 = vmatprep.subr.bf16.mxu1 %v2432_v54  ;;  %v2530_v53 = vld [vmem:[%s2747_s6 + $0x1ac] ss:$16 sps:$4 sm:$0xff]   ;;  %v2532_v54 = vld [vmem:[%s2747_s6 + $0x1a0] ss:$16 sps:$4 sm:$0xff]  }
  0x3a   : > { %1358 = vmatprep.subr.bf16.mxu0 %v2434_v55  ;;  %v2533_v55 = vld [vmem:[%s2747_s6 + $0x1a8] ss:$16 sps:$4 sm:$0xff]  }
  0x3c   : > { %1166 = vmatpush1.bf16.msra.mxu1 %v2436_v56  ;;  %v2534_v56 = vld [vmem:[%s2747_s6 + $0x1c4] ss:$16 sps:$4 sm:$0xff]  }
  0x3d   : > { %1359 = vmatpush1.bf16.msra.mxu0 %v2437_v57  ;;  %1167 = vmatprep.subr.bf16.mxu1 %v2438_v58  ;;  %v2536_v57 = vld [vmem:[%s2747_s6 + $0x1cc] ss:$16 sps:$4 sm:$0xff]   ;;  %v2538_v58 = vld [vmem:[%s2747_s6 + $0x1c0] ss:$16 sps:$4 sm:$0xff]  }
  0x3e   : > { %1360 = vmatprep.subr.bf16.mxu0 %v2440_v59  ;;  %v2539_v59 = vld [vmem:[%s2747_s6 + $0x1c8] ss:$16 sps:$4 sm:$0xff]  }
  0x40   : > { %1168 = vmatpush1.bf16.msra.mxu1 %v2442_v60  ;;  %v2540_v60 = vld [vmem:[%s2747_s6 + $0x1e4] ss:$16 sps:$4 sm:$0xff]  }
  0x41   : > { %1361 = vmatpush1.bf16.msra.mxu0 %v2443_v61  ;;  %1169 = vmatprep.subr.bf16.mxu1 %v2444_v62  ;;  %v2542_v61 = vld [vmem:[%s2747_s6 + $0x1ec] ss:$16 sps:$4 sm:$0xff]   ;;  %v2544_v62 = vld [vmem:[%s2747_s6 + $0x1e0] ss:$16 sps:$4 sm:$0xff]  }
  0x42   : > { %1362 = vmatprep.subr.bf16.mxu0 %v2446_v63  ;;  %v2545_v63 = vld [vmem:[%s2747_s6 + $0x1e8] ss:$16 sps:$4 sm:$0xff]  }
  0x44   : > { %1170 = vmatpush1.bf16.msra.mxu1 %v2448_v0 }
  0x45   : > { %1363 = vmatpush1.bf16.msra.mxu0 %v2449_v1 }
  0x47   : > { %1172 = vmatmul.mubr.bf16.vlgmr.msra.gmra.mrb[0].mxu1 %v2450_v2 }
  0x48   : > { %1365 = vmatmul.mubr.bf16.vlgmr.msra.gmra.mrb[0].mxu0 %v2453_v3  ;;  %1181 = vmatprep.mubr.bf16.mxu1 %v2456_v4 }
  0x49   : > { %1374 = vmatprep.mubr.bf16.mxu0 %v2458_v5 }
  0x4f   : > { %1182 = vmatmul.mubr.bf16.gmra.mrb[4].mxu1 %v2460_v6 }
  0x50   : > { %1375 = vmatmul.mubr.bf16.gmra.mrb[4].mxu0 %v2461_v7  ;;  %1191 = vmatprep.mubr.bf16.mxu1 %v2462_v8 }
  0x51   : > { %1384 = vmatprep.mubr.bf16.mxu0 %v2464_v9 }
  0x57   : > { %1192 = vmatmul.mubr.bf16.gmra.mrb[8].mxu1 %v2466_v10 }
  0x58   : > { %1385 = vmatmul.mubr.bf16.gmra.mrb[8].mxu0 %v2467_v11  ;;  %1201 = vmatprep.mubr.bf16.mxu1 %v2468_v12 }
  0x59   : > { %1394 = vmatprep.mubr.bf16.mxu0 %v2470_v13 }
  0x5f   : > { %1202 = vmatmul.mubr.bf16.gmra.mrb[12].mxu1 %v2472_v14 }
  0x60   : > { %1395 = vmatmul.mubr.bf16.gmra.mrb[12].mxu0 %v2473_v15  ;;  %1211 = vmatprep.mubr.bf16.mxu1 %v2474_v16 }
  0x61   : > { %1404 = vmatprep.mubr.bf16.mxu0 %v2476_v17 }
  0x67   : > { %1212 = vmatmul.mubr.bf16.gmra.mrb[16].mxu1 %v2478_v18 }
  0x68   : > { %1405 = vmatmul.mubr.bf16.gmra.mrb[16].mxu0 %v2479_v19  ;;  %1221 = vmatprep.mubr.bf16.mxu1 %v2480_v20 }
  0x69   : > { %1414 = vmatprep.mubr.bf16.mxu0 %v2482_v21 }
  0x6f   : > { %1222 = vmatmul.mubr.bf16.gmra.mrb[20].mxu1 %v2484_v22 }
  0x70   : > { %1415 = vmatmul.mubr.bf16.gmra.mrb[20].mxu0 %v2485_v23  ;;  %1231 = vmatprep.mubr.bf16.mxu1 %v2486_v24 }
  0x71   : > { %1424 = vmatprep.mubr.bf16.mxu0 %v2488_v25 }
  0x77   : > { %1232 = vmatmul.mubr.bf16.gmra.mrb[24].mxu1 %v2490_v26 }
  0x78   : > { %1425 = vmatmul.mubr.bf16.gmra.mrb[24].mxu0 %v2491_v27  ;;  %1241 = vmatprep.mubr.bf16.mxu1 %v2492_v28 }
  0x79   : > { %1434 = vmatprep.mubr.bf16.mxu0 %v2494_v29 }
  0x7f   : > { %1242 = vmatmul.mubr.bf16.gmra.mrb[28].mxu1 %v2496_v30 }
  0x80   : > { %1435 = vmatmul.mubr.bf16.gmra.mrb[28].mxu0 %v2497_v31  ;;  %1251 = vmatprep.mubr.bf16.mxu1 %v2498_v32 }
  0x81   : > { %1444 = vmatprep.mubr.bf16.mxu0 %v2500_v33 }
  0x87   : > { %1252 = vmatmul.mubr.bf16.gmra.mrb[32].mxu1 %v2502_v34 }
  0x88   : > { %1445 = vmatmul.mubr.bf16.gmra.mrb[32].mxu0 %v2503_v35  ;;  %1261 = vmatprep.mubr.bf16.mxu1 %v2504_v36 }
  0x89   : > { %1454 = vmatprep.mubr.bf16.mxu0 %v2506_v37 }
  0x8f   : > { %1262 = vmatmul.mubr.bf16.gmra.mrb[36].mxu1 %v2508_v38 }
  0x90   : > { %1455 = vmatmul.mubr.bf16.gmra.mrb[36].mxu0 %v2509_v39  ;;  %1271 = vmatprep.mubr.bf16.mxu1 %v2510_v40 }
  0x91   : > { %1464 = vmatprep.mubr.bf16.mxu0 %v2512_v41 }
  0x97   : > { %1272 = vmatmul.mubr.bf16.gmra.mrb[40].mxu1 %v2514_v42 }
  0x98   : > { %1465 = vmatmul.mubr.bf16.gmra.mrb[40].mxu0 %v2515_v43  ;;  %1281 = vmatprep.mubr.bf16.mxu1 %v2516_v44 }
  0x99   : > { %1474 = vmatprep.mubr.bf16.mxu0 %v2518_v45 }
  0x9f   : > { %1282 = vmatmul.mubr.bf16.gmra.mrb[44].mxu1 %v2520_v46 }
  0xa0   : > { %1475 = vmatmul.mubr.bf16.gmra.mrb[44].mxu0 %v2521_v47  ;;  %1291 = vmatprep.mubr.bf16.mxu1 %v2522_v48 }
  0xa1   : > { %1484 = vmatprep.mubr.bf16.mxu0 %v2524_v49 }
  0xa7   : > { %1292 = vmatmul.mubr.bf16.gmra.mrb[48].mxu1 %v2526_v50 }
  0xa8   : > { %1485 = vmatmul.mubr.bf16.gmra.mrb[48].mxu0 %v2527_v51  ;;  %1301 = vmatprep.mubr.bf16.mxu1 %v2528_v52 }
  0xa9   : > { %1494 = vmatprep.mubr.bf16.mxu0 %v2530_v53 }
  0xaf   : > { %1302 = vmatmul.mubr.bf16.gmra.mrb[52].mxu1 %v2532_v54 }
  0xb0   : > { %1495 = vmatmul.mubr.bf16.gmra.mrb[52].mxu0 %v2533_v55  ;;  %1311 = vmatprep.mubr.bf16.mxu1 %v2534_v56 }
  0xb1   : > { %1504 = vmatprep.mubr.bf16.mxu0 %v2536_v57 }
  0xb7   : > { %1312 = vmatmul.mubr.bf16.gmra.mrb[56].mxu1 %v2538_v58 }
  0xb8   : > { %1505 = vmatmul.mubr.bf16.gmra.mrb[56].mxu0 %v2539_v59  ;;  %1321 = vmatprep.mubr.bf16.mxu1 %v2540_v60 }
  0xb9   : > { %1514 = vmatprep.mubr.bf16.mxu0 %v2542_v61 }
  0xbf   : > { %1322 = vmatmul.mubr.bf16.gmra.mrb[60].mxu1 %v2544_v62 }
  0xc0   : > { %1515 = vmatmul.mubr.bf16.gmra.mrb[60].mxu0 %v2545_v63 }
 0x11a   : > { %v1173_v0 = vpop.f32.mrb[0].mxu1 }
 0x11b   : > { %v1366_v1 = vpop.f32.mrb[0].mxu0  ;;  %v1175_v3 = vpop.f32.mrb[1].mxu1 }
 0x11c   : > { %v1367_v2 = vadd.f32 %v1366_v1, %v1173_v0  ;;  %v1368_v4 = vpop.f32.mrb[1].mxu0  ;;  %v1177_v6 = vpop.f32.mrb[2].mxu1 }
 0x11d   : > { %v1369_v5 = vadd.f32 %v1368_v4, %v1175_v3  ;;  %v1370_v7 = vpop.f32.mrb[2].mxu0  ;;  %v1179_v9 = vpop.f32.mrb[3].mxu1 }
 0x11e   : > { %v1371_v8 = vadd.f32 %v1370_v7, %v1177_v6  ;;  %v1372_v10 = vpop.f32.mrb[3].mxu0 }
 0x11f   : > { %v2234_v11 = vpack.c.bf16 %v1369_v5, %v1367_v2  ;;  %v1373_v12 = vadd.f32 %v1372_v10, %v1179_v9 }
 0x121   : > { %1912 = vst [vmem:[%s2874_s30] sm:$0xff] %v2234_v11  ;;  %v2235_v13 = vpack.c.bf16 %v1373_v12, %v1371_v8 }
 0x122   : > { %v1183_v14 = vpop.f32.mrb[4].mxu1 }
 0x123   : > { %1913 = vst [vmem:[%s2874_s30 + $0x8] sm:$0xff] %v2235_v13  ;;  %v1376_v15 = vpop.f32.mrb[4].mxu0  ;;  %v1185_v17 = vpop.f32.mrb[5].mxu1 }
 0x124   : > { %v1377_v16 = vadd.f32 %v1376_v15, %v1183_v14  ;;  %v1378_v18 = vpop.f32.mrb[5].mxu0  ;;  %v1187_v20 = vpop.f32.mrb[6].mxu1 }
 0x125   : > { %v1379_v19 = vadd.f32 %v1378_v18, %v1185_v17  ;;  %v1380_v21 = vpop.f32.mrb[6].mxu0  ;;  %v1189_v23 = vpop.f32.mrb[7].mxu1 }
 0x126   : > { %v1381_v22 = vadd.f32 %v1380_v21, %v1187_v20  ;;  %v1382_v24 = vpop.f32.mrb[7].mxu0 }
 0x127   : > { %v2236_v25 = vpack.c.bf16 %v1379_v19, %v1377_v16  ;;  %v1383_v26 = vadd.f32 %v1382_v24, %v1189_v23 }
 0x129   : > { %1914 = vst [vmem:[%s2874_s30 + $0x10] sm:$0xff] %v2236_v25  ;;  %v2237_v27 = vpack.c.bf16 %v1383_v26, %v1381_v22 }
 0x12a   : > { %v1193_v28 = vpop.f32.mrb[8].mxu1 }
 0x12b   : > { %1915 = vst [vmem:[%s2874_s30 + $0x18] sm:$0xff] %v2237_v27  ;;  %v1386_v29 = vpop.f32.mrb[8].mxu0  ;;  %v1195_v31 = vpop.f32.mrb[9].mxu1 }
 0x12c   : > { %v1387_v30 = vadd.f32 %v1386_v29, %v1193_v28  ;;  %v1388_v32 = vpop.f32.mrb[9].mxu0  ;;  %v1197_v34 = vpop.f32.mrb[10].mxu1 }
 0x12d   : > { %v1389_v33 = vadd.f32 %v1388_v32, %v1195_v31  ;;  %v1390_v35 = vpop.f32.mrb[10].mxu0  ;;  %v1199_v37 = vpop.f32.mrb[11].mxu1 }
 0x12e   : > { %v1391_v36 = vadd.f32 %v1390_v35, %v1197_v34  ;;  %v1392_v38 = vpop.f32.mrb[11].mxu0 }
 0x12f   : > { %v2238_v39 = vpack.c.bf16 %v1389_v33, %v1387_v30  ;;  %v1393_v40 = vadd.f32 %v1392_v38, %v1199_v37 }
 0x131   : > { %1916 = vst [vmem:[%s2874_s30 + $0x20] sm:$0xff] %v2238_v39  ;;  %v2239_v41 = vpack.c.bf16 %v1393_v40, %v1391_v36 }
 0x132   : > { %v1203_v42 = vpop.f32.mrb[12].mxu1 }
 0x133   : > { %1917 = vst [vmem:[%s2874_s30 + $0x28] sm:$0xff] %v2239_v41  ;;  %v1396_v43 = vpop.f32.mrb[12].mxu0  ;;  %v1205_v45 = vpop.f32.mrb[13].mxu1 }
 0x134   : > { %v1397_v44 = vadd.f32 %v1396_v43, %v1203_v42  ;;  %v1398_v46 = vpop.f32.mrb[13].mxu0  ;;  %v1207_v48 = vpop.f32.mrb[14].mxu1 }
 0x135   : > { %v1399_v47 = vadd.f32 %v1398_v46, %v1205_v45  ;;  %v1400_v49 = vpop.f32.mrb[14].mxu0  ;;  %v1209_v51 = vpop.f32.mrb[15].mxu1 }
 0x136   : > { %v1401_v50 = vadd.f32 %v1400_v49, %v1207_v48  ;;  %v1402_v52 = vpop.f32.mrb[15].mxu0 }
 0x137   : > { %v2240_v53 = vpack.c.bf16 %v1399_v47, %v1397_v44  ;;  %v1403_v54 = vadd.f32 %v1402_v52, %v1209_v51 }
 0x139   : > { %1918 = vst [vmem:[%s2874_s30 + $0x30] sm:$0xff] %v2240_v53  ;;  %v2241_v55 = vpack.c.bf16 %v1403_v54, %v1401_v50 }
 0x13a   : > { %v1213_v56 = vpop.f32.mrb[16].mxu1 }
 0x13b   : > { %1919 = vst [vmem:[%s2874_s30 + $0x38] sm:$0xff] %v2241_v55  ;;  %v1406_v57 = vpop.f32.mrb[16].mxu0  ;;  %v1215_v59 = vpop.f32.mrb[17].mxu1 }
 0x13c   : > { %v1407_v58 = vadd.f32 %v1406_v57, %v1213_v56  ;;  %v1408_v60 = vpop.f32.mrb[17].mxu0  ;;  %v1217_v62 = vpop.f32.mrb[18].mxu1 }
 0x13d   : > { %v1409_v61 = vadd.f32 %v1408_v60, %v1215_v59  ;;  %v1410_v63 = vpop.f32.mrb[18].mxu0  ;;  %v1219_v1 = vpop.f32.mrb[19].mxu1 }
 0x13e   : > { %v1411_v0 = vadd.f32 %v1410_v63, %v1217_v62  ;;  %v1412_v2 = vpop.f32.mrb[19].mxu0 }
 0x13f   : > { %v2242_v3 = vpack.c.bf16 %v1409_v61, %v1407_v58  ;;  %v1413_v4 = vadd.f32 %v1412_v2, %v1219_v1 }
 0x141   : > { %1920 = vst [vmem:[%s2874_s30 + $0x40] sm:$0xff] %v2242_v3  ;;  %v2243_v5 = vpack.c.bf16 %v1413_v4, %v1411_v0 }
 0x142   : > { %v1223_v6 = vpop.f32.mrb[20].mxu1 }
 0x143   : > { %1921 = vst [vmem:[%s2874_s30 + $0x48] sm:$0xff] %v2243_v5  ;;  %v1416_v7 = vpop.f32.mrb[20].mxu0  ;;  %v1225_v9 = vpop.f32.mrb[21].mxu1 }
 0x144   : > { %v1417_v8 = vadd.f32 %v1416_v7, %v1223_v6  ;;  %v1418_v10 = vpop.f32.mrb[21].mxu0  ;;  %v1227_v12 = vpop.f32.mrb[22].mxu1 }
 0x145   : > { %v1419_v11 = vadd.f32 %v1418_v10, %v1225_v9  ;;  %v1420_v13 = vpop.f32.mrb[22].mxu0  ;;  %v1229_v15 = vpop.f32.mrb[23].mxu1 }
 0x146   : > { %v1421_v14 = vadd.f32 %v1420_v13, %v1227_v12  ;;  %v1422_v16 = vpop.f32.mrb[23].mxu0 }
 0x147   : > { %v2244_v17 = vpack.c.bf16 %v1419_v11, %v1417_v8  ;;  %v1423_v18 = vadd.f32 %v1422_v16, %v1229_v15 }
 0x149   : > { %1922 = vst [vmem:[%s2874_s30 + $0x50] sm:$0xff] %v2244_v17  ;;  %v2245_v19 = vpack.c.bf16 %v1423_v18, %v1421_v14 }
 0x14a   : > { %v1233_v20 = vpop.f32.mrb[24].mxu1 }
 0x14b   : > { %1923 = vst [vmem:[%s2874_s30 + $0x58] sm:$0xff] %v2245_v19  ;;  %v1426_v21 = vpop.f32.mrb[24].mxu0  ;;  %v1235_v23 = vpop.f32.mrb[25].mxu1 }
 0x14c   : > { %v1427_v22 = vadd.f32 %v1426_v21, %v1233_v20  ;;  %v1428_v24 = vpop.f32.mrb[25].mxu0  ;;  %v1237_v26 = vpop.f32.mrb[26].mxu1 }
 0x14d   : > { %v1429_v25 = vadd.f32 %v1428_v24, %v1235_v23  ;;  %v1430_v27 = vpop.f32.mrb[26].mxu0  ;;  %v1239_v29 = vpop.f32.mrb[27].mxu1 }
 0x14e   : > { %v1431_v28 = vadd.f32 %v1430_v27, %v1237_v26  ;;  %v1432_v30 = vpop.f32.mrb[27].mxu0 }
 0x14f   : > { %v2246_v31 = vpack.c.bf16 %v1429_v25, %v1427_v22  ;;  %v1433_v32 = vadd.f32 %v1432_v30, %v1239_v29 }
 0x151   : > { %1924 = vst [vmem:[%s2874_s30 + $0x60] sm:$0xff] %v2246_v31  ;;  %v2247_v33 = vpack.c.bf16 %v1433_v32, %v1431_v28 }
 0x152   : > { %v1243_v34 = vpop.f32.mrb[28].mxu1 }
 0x153   : > { %1925 = vst [vmem:[%s2874_s30 + $0x68] sm:$0xff] %v2247_v33  ;;  %v1436_v35 = vpop.f32.mrb[28].mxu0  ;;  %v1245_v37 = vpop.f32.mrb[29].mxu1 }
 0x154   : > { %v1437_v36 = vadd.f32 %v1436_v35, %v1243_v34  ;;  %v1438_v38 = vpop.f32.mrb[29].mxu0  ;;  %v1247_v40 = vpop.f32.mrb[30].mxu1 }
 0x155   : > { %v1439_v39 = vadd.f32 %v1438_v38, %v1245_v37  ;;  %v1440_v41 = vpop.f32.mrb[30].mxu0  ;;  %v1249_v43 = vpop.f32.mrb[31].mxu1 }
 0x156   : > { %v1441_v42 = vadd.f32 %v1440_v41, %v1247_v40  ;;  %v1442_v44 = vpop.f32.mrb[31].mxu0 }
 0x157   : > { %v2248_v45 = vpack.c.bf16 %v1439_v39, %v1437_v36  ;;  %v1443_v46 = vadd.f32 %v1442_v44, %v1249_v43 }
 0x159   : > { %1926 = vst [vmem:[%s2874_s30 + $0x70] sm:$0xff] %v2248_v45  ;;  %v2249_v47 = vpack.c.bf16 %v1443_v46, %v1441_v42 }
 0x15a   : > { %v1253_v48 = vpop.f32.mrb[32].mxu1 }
 0x15b   : > { %1927 = vst [vmem:[%s2874_s30 + $0x78] sm:$0xff] %v2249_v47  ;;  %v1446_v49 = vpop.f32.mrb[32].mxu0  ;;  %v1255_v51 = vpop.f32.mrb[33].mxu1 }
 0x15c   : > { %v1447_v50 = vadd.f32 %v1446_v49, %v1253_v48  ;;  %v1448_v52 = vpop.f32.mrb[33].mxu0  ;;  %v1257_v54 = vpop.f32.mrb[34].mxu1 }
 0x15d   : > { %v1449_v53 = vadd.f32 %v1448_v52, %v1255_v51  ;;  %v1450_v55 = vpop.f32.mrb[34].mxu0  ;;  %v1259_v57 = vpop.f32.mrb[35].mxu1 }
 0x15e   : > { %v1451_v56 = vadd.f32 %v1450_v55, %v1257_v54  ;;  %v1452_v58 = vpop.f32.mrb[35].mxu0 }
 0x15f   : > { %v2250_v59 = vpack.c.bf16 %v1449_v53, %v1447_v50  ;;  %v1453_v60 = vadd.f32 %v1452_v58, %v1259_v57 }
 0x161   : > { %1928 = vst [vmem:[%s2874_s30 + $0x80] sm:$0xff] %v2250_v59  ;;  %v2251_v61 = vpack.c.bf16 %v1453_v60, %v1451_v56 }
 0x162   : > { %v1263_v62 = vpop.f32.mrb[36].mxu1 }
 0x163   : > { %1929 = vst [vmem:[%s2874_s30 + $0x88] sm:$0xff] %v2251_v61  ;;  %v1456_v63 = vpop.f32.mrb[36].mxu0  ;;  %v1265_v1 = vpop.f32.mrb[37].mxu1 }
 0x164   : > { %v1457_v0 = vadd.f32 %v1456_v63, %v1263_v62  ;;  %v1458_v2 = vpop.f32.mrb[37].mxu0  ;;  %v1267_v4 = vpop.f32.mrb[38].mxu1 }
 0x165   : > { %v1459_v3 = vadd.f32 %v1458_v2, %v1265_v1  ;;  %v1460_v5 = vpop.f32.mrb[38].mxu0  ;;  %v1269_v7 = vpop.f32.mrb[39].mxu1 }
 0x166   : > { %v1461_v6 = vadd.f32 %v1460_v5, %v1267_v4  ;;  %v1462_v8 = vpop.f32.mrb[39].mxu0 }
 0x167   : > { %v2252_v9 = vpack.c.bf16 %v1459_v3, %v1457_v0  ;;  %v1463_v10 = vadd.f32 %v1462_v8, %v1269_v7 }
 0x169   : > { %1930 = vst [vmem:[%s2874_s30 + $0x90] sm:$0xff] %v2252_v9  ;;  %v2253_v11 = vpack.c.bf16 %v1463_v10, %v1461_v6 }
 0x16a   : > { %v1273_v12 = vpop.f32.mrb[40].mxu1 }
 0x16b   : > { %1931 = vst [vmem:[%s2874_s30 + $0x98] sm:$0xff] %v2253_v11  ;;  %v1466_v13 = vpop.f32.mrb[40].mxu0  ;;  %v1275_v15 = vpop.f32.mrb[41].mxu1 }
 0x16c   : > { %v1467_v14 = vadd.f32 %v1466_v13, %v1273_v12  ;;  %v1468_v16 = vpop.f32.mrb[41].mxu0  ;;  %v1277_v18 = vpop.f32.mrb[42].mxu1 }
 0x16d   : > { %v1469_v17 = vadd.f32 %v1468_v16, %v1275_v15  ;;  %v1470_v19 = vpop.f32.mrb[42].mxu0  ;;  %v1279_v21 = vpop.f32.mrb[43].mxu1 }
 0x16e   : > { %v1471_v20 = vadd.f32 %v1470_v19, %v1277_v18  ;;  %v1472_v22 = vpop.f32.mrb[43].mxu0 }
 0x16f   : > { %v2254_v23 = vpack.c.bf16 %v1469_v17, %v1467_v14  ;;  %v1473_v24 = vadd.f32 %v1472_v22, %v1279_v21 }
 0x171   : > { %1932 = vst [vmem:[%s2874_s30 + $0xa0] sm:$0xff] %v2254_v23  ;;  %v2255_v25 = vpack.c.bf16 %v1473_v24, %v1471_v20 }
 0x172   : > { %v1283_v26 = vpop.f32.mrb[44].mxu1 }
 0x173   : > { %1933 = vst [vmem:[%s2874_s30 + $0xa8] sm:$0xff] %v2255_v25  ;;  %v1476_v27 = vpop.f32.mrb[44].mxu0  ;;  %v1285_v29 = vpop.f32.mrb[45].mxu1 }
 0x174   : > { %v1477_v28 = vadd.f32 %v1476_v27, %v1283_v26  ;;  %v1478_v30 = vpop.f32.mrb[45].mxu0  ;;  %v1287_v32 = vpop.f32.mrb[46].mxu1 }
 0x175   : > { %v1479_v31 = vadd.f32 %v1478_v30, %v1285_v29  ;;  %v1480_v33 = vpop.f32.mrb[46].mxu0  ;;  %v1289_v35 = vpop.f32.mrb[47].mxu1 }
 0x176   : > { %v1481_v34 = vadd.f32 %v1480_v33, %v1287_v32  ;;  %v1482_v36 = vpop.f32.mrb[47].mxu0 }
 0x177   : > { %v2256_v37 = vpack.c.bf16 %v1479_v31, %v1477_v28  ;;  %v1483_v38 = vadd.f32 %v1482_v36, %v1289_v35 }
 0x179   : > { %1934 = vst [vmem:[%s2874_s30 + $0xb0] sm:$0xff] %v2256_v37  ;;  %v2257_v39 = vpack.c.bf16 %v1483_v38, %v1481_v34 }
 0x17a   : > { %v1293_v40 = vpop.f32.mrb[48].mxu1 }
 0x17b   : > { %1935 = vst [vmem:[%s2874_s30 + $0xb8] sm:$0xff] %v2257_v39  ;;  %v1486_v41 = vpop.f32.mrb[48].mxu0  ;;  %v1295_v43 = vpop.f32.mrb[49].mxu1 }
 0x17c   : > { %v1487_v42 = vadd.f32 %v1486_v41, %v1293_v40  ;;  %v1488_v44 = vpop.f32.mrb[49].mxu0  ;;  %v1297_v46 = vpop.f32.mrb[50].mxu1 }
 0x17d   : > { %v1489_v45 = vadd.f32 %v1488_v44, %v1295_v43  ;;  %v1490_v47 = vpop.f32.mrb[50].mxu0  ;;  %v1299_v49 = vpop.f32.mrb[51].mxu1 }
 0x17e   : > { %v1491_v48 = vadd.f32 %v1490_v47, %v1297_v46  ;;  %v1492_v50 = vpop.f32.mrb[51].mxu0 }
 0x17f   : > { %v2258_v51 = vpack.c.bf16 %v1489_v45, %v1487_v42  ;;  %v1493_v52 = vadd.f32 %v1492_v50, %v1299_v49 }
 0x181   : > { %1936 = vst [vmem:[%s2874_s30 + $0xc0] sm:$0xff] %v2258_v51  ;;  %v2259_v53 = vpack.c.bf16 %v1493_v52, %v1491_v48 }
 0x182   : > { %v1303_v54 = vpop.f32.mrb[52].mxu1 }
 0x183   : > { %1937 = vst [vmem:[%s2874_s30 + $0xc8] sm:$0xff] %v2259_v53  ;;  %v1496_v55 = vpop.f32.mrb[52].mxu0  ;;  %v1305_v57 = vpop.f32.mrb[53].mxu1 }
 0x184   : > { %v1497_v56 = vadd.f32 %v1496_v55, %v1303_v54  ;;  %v1498_v58 = vpop.f32.mrb[53].mxu0  ;;  %v1307_v60 = vpop.f32.mrb[54].mxu1 }
 0x185   : > { %v1499_v59 = vadd.f32 %v1498_v58, %v1305_v57  ;;  %v1500_v61 = vpop.f32.mrb[54].mxu0  ;;  %v1309_v63 = vpop.f32.mrb[55].mxu1 }
 0x186   : > { %v1501_v62 = vadd.f32 %v1500_v61, %v1307_v60  ;;  %v1502_v0 = vpop.f32.mrb[55].mxu0 }
 0x187   : > { %v2260_v1 = vpack.c.bf16 %v1499_v59, %v1497_v56  ;;  %v1503_v2 = vadd.f32 %v1502_v0, %v1309_v63 }
 0x189   : > { %1938 = vst [vmem:[%s2874_s30 + $0xd0] sm:$0xff] %v2260_v1  ;;  %v2261_v3 = vpack.c.bf16 %v1503_v2, %v1501_v62 }
 0x18a   : > { %v1313_v4 = vpop.f32.mrb[56].mxu1 }
 0x18b   : > { %1939 = vst [vmem:[%s2874_s30 + $0xd8] sm:$0xff] %v2261_v3  ;;  %v1506_v5 = vpop.f32.mrb[56].mxu0  ;;  %v1315_v7 = vpop.f32.mrb[57].mxu1 }
 0x18c   : > { %v1507_v6 = vadd.f32 %v1506_v5, %v1313_v4  ;;  %v1508_v8 = vpop.f32.mrb[57].mxu0  ;;  %v1317_v10 = vpop.f32.mrb[58].mxu1 }
 0x18d   : > { %v1509_v9 = vadd.f32 %v1508_v8, %v1315_v7  ;;  %v1510_v11 = vpop.f32.mrb[58].mxu0  ;;  %v1319_v13 = vpop.f32.mrb[59].mxu1 }
 0x18e   : > { %v1511_v12 = vadd.f32 %v1510_v11, %v1317_v10  ;;  %v1512_v14 = vpop.f32.mrb[59].mxu0 }
 0x18f   : > { %v2262_v15 = vpack.c.bf16 %v1509_v9, %v1507_v6  ;;  %v1513_v16 = vadd.f32 %v1512_v14, %v1319_v13 }
 0x191   : > { %1940 = vst [vmem:[%s2874_s30 + $0xe0] sm:$0xff] %v2262_v15  ;;  %v2263_v17 = vpack.c.bf16 %v1513_v16, %v1511_v12 }
 0x192   : > { %v1323_v18 = vpop.f32.mrb[60].mxu1 }
 0x193   : > { %1941 = vst [vmem:[%s2874_s30 + $0xe8] sm:$0xff] %v2263_v17  ;;  %v1516_v19 = vpop.f32.mrb[60].mxu0  ;;  %v1325_v21 = vpop.f32.mrb[61].mxu1 }
 0x194   : > { %v1517_v20 = vadd.f32 %v1516_v19, %v1323_v18  ;;  %v1518_v22 = vpop.f32.mrb[61].mxu0  ;;  %v1327_v24 = vpop.f32.mrb[62].mxu1 }
 0x195   : > { %v1519_v23 = vadd.f32 %v1518_v22, %v1325_v21  ;;  %v1520_v25 = vpop.f32.mrb[62].mxu0  ;;  %v1329_v27 = vpop.f32.mrb[63].mxu1 }
 0x196   : > { %v1521_v26 = vadd.f32 %v1520_v25, %v1327_v24  ;;  %v1522_v28 = vpop.f32.mrb[63].mxu0 }
 0x197   : > { %v2264_v29 = vpack.c.bf16 %v1519_v23, %v1517_v20  ;;  %v1523_v30 = vadd.f32 %v1522_v28, %v1329_v27 }
 0x199   : > { %1942 = vst [vmem:[%s2874_s30 + $0xf0] sm:$0xff] %v2264_v29  ;;  %v2265_v31 = vpack.c.bf16 %v1523_v30, %v1521_v26 }
 0x19b   : > { %1943 = vst [vmem:[%s2874_s30 + $0xf8] sm:$0xff] %v2265_v31 }
 0x19c PF: > { %s12_s11 = sadd.s32 1, %s2568_s11   ;;  %s2920_s9 = smov %s2564_s10 }
 0x19d   : > { %p9_p5 = scmp.ge.s32.totalorder %s12_s11, 4   ;;  %s2921_s10 = smov %s2923_s12 }
 0x19f   :  { %11 = sbr.rel (!%p9_p5) target bundleno = 2 (0x2), region = 69 }

</bundles_post_ra>
